<compile_context>
chip_gen: v6e
topology: v6e:2x2x1
jax: 0.10.0
libtpu: 0.0.40
codegen_flags: <defaults>
</compile_context>

<pallas_src>
import functools

import numpy as np
import jax
import jax.numpy as jnp
from jax import lax
from jax.experimental import pallas as pl
from jax.experimental.pallas import tpu as pltpu


# ----------------------------- hyperparameters ------------------------------
class HParams:
    ic_dim = 12
    gen_dim = 32
    con_dim = 16
    co_dim = 4
    fac_dim = 8
    ci_enc_dim = 8
    ext_input_dim = 2
    recon_seq_len = 8
    cell_clip = 5.0
    dropout_rate = 0.0


def state_dims(hps):
    return [hps.gen_dim, hps.con_dim, hps.co_dim, hps.co_dim,
            hps.co_dim + hps.ext_input_dim, hps.fac_dim]


# ------------------- reference-only GRU math (unfused weights) ----------------
def _gru_step_ref(x, h, w_ih_t, b_ih, w_hh_t, b_hh, hidden_size, clip_value,
                  precision=None):
    """ClippedGRUCell.forward semantics (weights pre-transposed to (in, 3H))."""
    x_all = jnp.dot(x, w_ih_t, preferred_element_type=jnp.float32,
                    precision=precision) + b_ih
    x_z = x_all[:, :hidden_size]
    x_r = x_all[:, hidden_size:2 * hidden_size]
    x_n = x_all[:, 2 * hidden_size:]
    w_zr_t = w_hh_t[:, :2 * hidden_size]
    w_n_t = w_hh_t[:, 2 * hidden_size:]
    b_zr = b_hh[:, :2 * hidden_size]
    b_n = b_hh[:, 2 * hidden_size:]
    h_all = jnp.dot(h, w_zr_t, preferred_element_type=jnp.float32,
                    precision=precision) + b_zr
    h_z = h_all[:, :hidden_size]
    h_r = h_all[:, hidden_size:]
    z = jax.nn.sigmoid(x_z + h_z)
    r = jax.nn.sigmoid(x_r + h_r)
    h_n = jnp.dot(r * h, w_n_t, preferred_element_type=jnp.float32,
                  precision=precision) + b_n
    n = jnp.tanh(x_n + h_n)
    h_new = z * h + (1.0 - z) * n
    return jnp.clip(h_new, -clip_value, clip_value)


# --------------------------------- kernel ------------------------------------
def decoder_kernel(
    ic_ref, x_ref, eps_ref, con_h0_ref,
    w_ic_ref, b_ic_ref,
    gen_wcat_ref, gen_bcat_ref, gen_wn_ref, gen_bn_ref,
    con_wcat_ref, con_bcat_ref, con_wn_ref, con_bn_ref,
    co_wm_ref, co_bm_ref, co_wlv_ref, co_blv_ref,
    fac_wn_ref,
    gen_init_ref, gen_states_ref, con_states_ref, co_means_ref,
    co_stds_ref, gen_inputs_ref, factors_ref,
    *, hps, sample_posteriors,
):
    gen_dim, con_dim = hps.gen_dim, hps.con_dim
    ci2 = 2 * hps.ci_enc_dim
    clip = float(hps.cell_clip)
    T = hps.recon_seq_len
    B = ic_ref.shape[0]

    # Load all step-invariant weights once, outside the recurrence.
    gen_wcat = gen_wcat_ref[...]; gen_bcat = gen_bcat_ref[...]
    gen_wn = gen_wn_ref[...];     gen_bn = gen_bn_ref[...]
    con_wcat = con_wcat_ref[...]; con_bcat = con_bcat_ref[...]
    con_wn = con_wn_ref[...];     con_bn = con_bn_ref[...]
    co_wm = co_wm_ref[...];       co_bm = co_bm_ref[...]
    co_wlv = co_wlv_ref[...];     co_blv = co_blv_ref[...]
    fac_wn = fac_wn_ref[...]      # pre-normalized in the wrapper

    def gru(fused_in, h, wcat, bcat, wn, bn, H):
        # fused_in = concat([x, h]); wcat packs [W_ih^T ; W_hh_zr^T (n-cols 0)]
        # and bcat = b_ih + [b_hh_zr, 0]  =>  one dot covers x_all + h_zr.
        all_ = jnp.dot(fused_in, wcat, preferred_element_type=jnp.float32) + bcat
        z = jax.nn.sigmoid(all_[:, :H])
        r = jax.nn.sigmoid(all_[:, H:2 * H])
        hn = jnp.dot(r * h, wn, preferred_element_type=jnp.float32) + bn
        n = jnp.tanh(all_[:, 2 * H:] + hn)
        return jnp.clip(z * h + (1.0 - z) * n, -clip, clip)

    # --- initial state: ic_to_g0, tiled con_h0, initial factor readout ---
    gen_init = (jnp.dot(ic_ref[...], w_ic_ref[...],
                        preferred_element_type=jnp.float32) + b_ic_ref[...])
    gen_init_ref[...] = gen_init
    gen_state0 = gen_init
    con_state0 = jnp.broadcast_to(con_h0_ref[...], (B, con_dim))
    factor0 = jnp.dot(gen_init, fac_wn, preferred_element_type=jnp.float32)

    def step(t, carry):
        gen_state, con_state, factor = carry
        x = x_ref[t]                    # (B, 2*ci_enc + ext)
        ci_step = x[:, :ci2]
        ext_step = x[:, ci2:]

        # Controller GRU (dropout on con_input is identity).
        con_state = gru(
            jnp.concatenate([ci_step, factor, con_state], axis=1),
            con_state, con_wcat, con_bcat, con_wn, con_bn, con_dim)

        # Controller-output posterior (Normal; rsample = mean + std * eps).
        co_mean = (jnp.dot(con_state, co_wm,
                           preferred_element_type=jnp.float32) + co_bm)
        co_logvar = (jnp.dot(con_state, co_wlv,
                             preferred_element_type=jnp.float32) + co_blv)
        co_std = jnp.exp(0.5 * co_logvar)
        if sample_posteriors:
            con_output = co_mean + co_std * eps_ref[t]
        else:
            con_output = co_mean
        gen_input = jnp.concatenate([con_output, ext_step], axis=1)

        # Generator GRU + normalized factor readout (dropout = identity).
        gen_state = gru(
            jnp.concatenate([gen_input, gen_state], axis=1),
            gen_state, gen_wcat, gen_bcat, gen_wn, gen_bn, gen_dim)
        factor = jnp.dot(gen_state, fac_wn, preferred_element_type=jnp.float32)

        # Per-component outputs (each starts at lane offset 0 — no packing).
        gen_states_ref[t] = gen_state
        con_states_ref[t] = con_state
        co_means_ref[t] = co_mean
        co_stds_ref[t] = co_std
        gen_inputs_ref[t] = gen_input
        factors_ref[t] = factor
        return (gen_state, con_state, factor)

    lax.fori_loop(0, T, step, (gen_state0, con_state0, factor0), unroll=True)


# ------------------------ wrapper-side weight preparation ---------------------
def _prepare_fused_weights(params, hps):
    """Trace-time prep of all step-invariant weight transforms."""
    def fuse(wih_t, bih, whh_t, bhh, H):
        w_zr = whh_t[:, :2 * H]
        w_n = whh_t[:, 2 * H:]
        b_zr = bhh[:, :2 * H]
        b_n = bhh[:, 2 * H:]
        wcat = jnp.concatenate(
            [wih_t,
             jnp.concatenate([w_zr, jnp.zeros((H, H), jnp.float32)], axis=1)],
            axis=0)                                          # (in+H, 3H)
        bcat = bih + jnp.concatenate(
            [b_zr, jnp.zeros((1, H), jnp.float32)], axis=1)  # (1, 3H)
        return wcat, bcat, w_n, b_n

    gen_wcat, gen_bcat, gen_wn, gen_bn = fuse(
        params["gen_wih_t"], params["gen_bih"],
        params["gen_whh_t"], params["gen_bhh"], hps.gen_dim)
    con_wcat, con_bcat, con_wn, con_bn = fuse(
        params["con_wih_t"], params["con_bih"],
        params["con_whh_t"], params["con_bhh"], hps.con_dim)

    # KernelNormalizedLinear: F.normalize(weight, p=2, dim=1) on (fac, gen)
    # == column-wise L2 normalization of the transposed (gen, fac) weight.
    fac_w_t = params["fac_w_t"]
    norms = jnp.sqrt(jnp.sum(fac_w_t * fac_w_t, axis=0, keepdims=True))
    fac_wn = fac_w_t / jnp.maximum(norms, 1e-12)

    co = hps.co_dim
    return dict(
        gen_wcat=gen_wcat, gen_bcat=gen_bcat, gen_wn=gen_wn, gen_bn=gen_bn,
        con_wcat=con_wcat, con_bcat=con_bcat, con_wn=con_wn, con_bn=con_bn,
        co_wm=params["co_w_t"][:, :co], co_bm=params["co_b"][:, :co],
        co_wlv=params["co_w_t"][:, co:], co_blv=params["co_b"][:, co:],
        fac_wn=fac_wn,
    )


# -------------------------------- wrapper -------------------------------------
def decoder_forward(params, ic_samp, ci, ext_input, eps, hps,
                    sample_posteriors=True):
    B = ic_samp.shape[0]
    T = hps.recon_seq_len

    # Pad external input in time (glue from Decoder.forward).
    fwd_steps = T - ext_input.shape[1]
    if fwd_steps > 0:
        pad = jnp.zeros((B, fwd_steps, hps.ext_input_dim), ext_input.dtype)
        ext_input = jnp.concatenate([ext_input, pad], axis=1)

    dec_rnn_input = jnp.concatenate([ci, ext_input], axis=2)   # (B, T, D_in)
    x_tbd = jnp.transpose(dec_rnn_input, (1, 0, 2))            # (T, B, D_in)

    fw = _prepare_fused_weights(params, hps)

    kernel = functools.partial(decoder_kernel, hps=hps,
                               sample_posteriors=sample_posteriors)

    out_shape = (
        jax.ShapeDtypeStruct((B, hps.gen_dim), jnp.float32),                 # gen_init
        jax.ShapeDtypeStruct((T, B, hps.gen_dim), jnp.float32),              # gen_states
        jax.ShapeDtypeStruct((T, B, hps.con_dim), jnp.float32),              # con_states
        jax.ShapeDtypeStruct((T, B, hps.co_dim), jnp.float32),               # co_means
        jax.ShapeDtypeStruct((T, B, hps.co_dim), jnp.float32),               # co_stds
        jax.ShapeDtypeStruct((T, B, hps.co_dim + hps.ext_input_dim),
                             jnp.float32),                                   # gen_inputs
        jax.ShapeDtypeStruct((T, B, hps.fac_dim), jnp.float32),              # factors
    )

    # Single invocation (grid=()): everything is a whole-array VMEM block.
    vmem = pl.BlockSpec(memory_space=pltpu.MemorySpace.VMEM)
    outs = pl.pallas_call(
        kernel,
        out_shape=out_shape,
        in_specs=[vmem] * 19,
        out_specs=tuple([vmem] * 7),
    )(ic_samp, x_tbd, eps, params["con_h0"],
      params["w_ic_t"], params["b_ic"],
      fw["gen_wcat"], fw["gen_bcat"], fw["gen_wn"], fw["gen_bn"],
      fw["con_wcat"], fw["con_bcat"], fw["con_wn"], fw["con_bn"],
      fw["co_wm"], fw["co_bm"], fw["co_wlv"], fw["co_blv"],
      fw["fac_wn"])

    gen_init = outs[0]
    comps = tuple(jnp.transpose(o, (1, 0, 2)) for o in outs[1:])  # (B, T, dim)
    return (gen_init,) + comps


# ------------------------------- pure-JAX reference ---------------------------
def decoder_reference(params, ic_samp, ci, ext_input, eps, hps,
                      sample_posteriors=True):
    prec = jax.lax.Precision.HIGHEST
    B = ic_samp.shape[0]
    T = hps.recon_seq_len
    co, ext = hps.co_dim, hps.ext_input_dim
    ci2 = 2 * hps.ci_enc_dim
    dims = state_dims(hps)
    offs = np.cumsum([0] + dims)

    fwd_steps = T - ext_input.shape[1]
    if fwd_steps > 0:
        pad = jnp.zeros((B, fwd_steps, ext), ext_input.dtype)
        ext_input = jnp.concatenate([ext_input, pad], axis=1)
    dec_rnn_input = jnp.concatenate([ci, ext_input], axis=2)

    gen_init = jnp.dot(ic_samp, params["w_ic_t"], precision=prec) + params["b_ic"]
    fac_w_t = params["fac_w_t"]
    norms = jnp.sqrt(jnp.sum(fac_w_t * fac_w_t, axis=0, keepdims=True))
    fac_w_n = fac_w_t / jnp.maximum(norms, 1e-12)

    h = jnp.concatenate([
        gen_init,
        jnp.tile(params["con_h0"], (B, 1)),
        jnp.zeros((B, co), jnp.float32),
        jnp.ones((B, co), jnp.float32),
        jnp.zeros((B, co + ext), jnp.float32),
        jnp.dot(gen_init, fac_w_n, precision=prec),
    ], axis=1)

    outs = []
    for t in range(T):
        x = dec_rnn_input[:, t, :]
        ci_step, ext_step = x[:, :ci2], x[:, ci2:]
        gen_state = h[:, offs[0]:offs[1]]
        con_state = h[:, offs[1]:offs[2]]
        factor = h[:, offs[5]:offs[6]]

        con_input = jnp.concatenate([ci_step, factor], axis=1)
        con_state = _gru_step_ref(con_input, con_state,
                                  params["con_wih_t"], params["con_bih"],
                                  params["con_whh_t"], params["con_bhh"],
                                  hps.con_dim, hps.cell_clip, precision=prec)
        co_params = jnp.dot(con_state, params["co_w_t"], precision=prec) + params["co_b"]
        co_mean, co_logvar = co_params[:, :co], co_params[:, co:]
        co_std = jnp.sqrt(jnp.exp(co_logvar))
        con_output = co_mean + co_std * eps[t] if sample_posteriors else co_mean
        gen_input = jnp.concatenate([con_output, ext_step], axis=1)

        gen_state = _gru_step_ref(gen_input, gen_state,
                                  params["gen_wih_t"], params["gen_bih"],
                                  params["gen_whh_t"], params["gen_bhh"],
                                  hps.gen_dim, hps.cell_clip, precision=prec)
        factor = jnp.dot(gen_state, fac_w_n, precision=prec)
        h = jnp.concatenate(
            [gen_state, con_state, co_mean, co_std, gen_input, factor], axis=1)
        outs.append(h)

    states = jnp.stack(outs, axis=1)
    splits = tuple(states[:, :, offs[i]:offs[i + 1]] for i in range(6))
    return (gen_init,) + splits


# ------------------------------- params init ---------------------------------
def init_params(hps, key):
    def unif(k, shape, fan):
        bound = 1.0 / (float(fan) ** 0.5)
        return jax.random.uniform(k, shape, jnp.float32, -bound, bound)

    gen_in = hps.ext_input_dim + hps.co_dim
    con_in = 2 * hps.ci_enc_dim + hps.fac_dim
    ks = jax.random.split(key, 13)
    p = {
        "w_ic_t": unif(ks[0], (hps.ic_dim, hps.gen_dim), hps.ic_dim),
        "b_ic": unif(ks[1], (1, hps.gen_dim), hps.ic_dim),
        "gen_wih_t": unif(ks[2], (gen_in, 3 * hps.gen_dim), hps.gen_dim),
        "gen_bih": unif(ks[3], (1, 3 * hps.gen_dim), hps.gen_dim),
        "gen_whh_t": unif(ks[4], (hps.gen_dim, 3 * hps.gen_dim), hps.gen_dim),
        "gen_bhh": unif(ks[5], (1, 3 * hps.gen_dim), hps.gen_dim),  # frozen in torch, still initialized
        "con_wih_t": unif(ks[6], (con_in, 3 * hps.con_dim), hps.con_dim),
        "con_bih": unif(ks[7], (1, 3 * hps.con_dim), hps.con_dim),
        "con_whh_t": unif(ks[8], (hps.con_dim, 3 * hps.con_dim), hps.con_dim),
        "con_bhh": unif(ks[9], (1, 3 * hps.con_dim), hps.con_dim),
        "co_w_t": unif(ks[10], (hps.con_dim, 2 * hps.co_dim), hps.con_dim),
        "co_b": unif(ks[11], (1, 2 * hps.co_dim), hps.con_dim),
        "fac_w_t": unif(ks[12], (hps.gen_dim, hps.fac_dim), hps.gen_dim),
        "con_h0": jnp.zeros((1, hps.con_dim), jnp.float32),
    }
    return p


# ----------------------------------- main -------------------------------------
if __name__ == "__main__":
    hps = HParams()
    key = jax.random.PRNGKey(0)
    k_param, k_ic, k_ci, k_ext, k_eps = jax.random.split(key, 5)

    params = init_params(hps, k_param)

    B = 2
    T = hps.recon_seq_len
    ic_samp = jax.random.normal(k_ic, (B, hps.ic_dim), jnp.float32)
    ci = jax.random.normal(k_ci, (B, T, 2 * hps.ci_enc_dim), jnp.float32)
    ext_input = jax.random.normal(k_ext, (B, T - 2, hps.ext_input_dim), jnp.float32)
    eps = jax.random.normal(k_eps, (T, B, hps.co_dim), jnp.float32)  # posterior noise

    out = decoder_forward(params, ic_samp, ci, ext_input, eps, hps,
                          sample_posteriors=True)
    out = jax.block_until_ready(out)

    ref = decoder_reference(params, ic_samp, ci, ext_input, eps, hps,
                            sample_posteriors=True)
    names = ["gen_init", "gen_states", "con_states", "co_means", "co_stds",
             "gen_inputs", "factors"]
    for name, a, b in zip(names, out, ref):
        np.testing.assert_allclose(np.asarray(a), np.asarray(b),
                                   rtol=3e-3, atol=3e-3, err_msg=name)

    print("KERNEL_OK")
</pallas_src>

<mosaic_0001>
module attributes {stable_mosaic.version = 11 : i64} {
  func.func @decoder_kernel(%arg0: memref<2x12xf32, #tpu.memory_space<vmem>>, %arg1: memref<8x2x18xf32, #tpu.memory_space<vmem>>, %arg2: memref<8x2x4xf32, #tpu.memory_space<vmem>>, %arg3: memref<1x16xf32, #tpu.memory_space<vmem>>, %arg4: memref<12x32xf32, #tpu.memory_space<vmem>>, %arg5: memref<1x32xf32, #tpu.memory_space<vmem>>, %arg6: memref<38x96xf32, #tpu.memory_space<vmem>>, %arg7: memref<1x96xf32, #tpu.memory_space<vmem>>, %arg8: memref<32x32xf32, #tpu.memory_space<vmem>>, %arg9: memref<1x32xf32, #tpu.memory_space<vmem>>, %arg10: memref<40x48xf32, #tpu.memory_space<vmem>>, %arg11: memref<1x48xf32, #tpu.memory_space<vmem>>, %arg12: memref<16x16xf32, #tpu.memory_space<vmem>>, %arg13: memref<1x16xf32, #tpu.memory_space<vmem>>, %arg14: memref<16x4xf32, #tpu.memory_space<vmem>>, %arg15: memref<1x4xf32, #tpu.memory_space<vmem>>, %arg16: memref<16x4xf32, #tpu.memory_space<vmem>>, %arg17: memref<1x4xf32, #tpu.memory_space<vmem>>, %arg18: memref<32x8xf32, #tpu.memory_space<vmem>>, %arg19: memref<2x32xf32, #tpu.memory_space<vmem>>, %arg20: memref<8x2x32xf32, #tpu.memory_space<vmem>>, %arg21: memref<8x2x16xf32, #tpu.memory_space<vmem>>, %arg22: memref<8x2x4xf32, #tpu.memory_space<vmem>>, %arg23: memref<8x2x4xf32, #tpu.memory_space<vmem>>, %arg24: memref<8x2x6xf32, #tpu.memory_space<vmem>>, %arg25: memref<8x2x8xf32, #tpu.memory_space<vmem>>) attributes {dimension_semantics = [], scalar_prefetch = 0 : i64, scratch_operands = 0 : i64, tpu.core_type = #tpu.core_type<tc>} {
    %c0 = arith.constant 0 : index
    %c0_0 = arith.constant 0 : index
    %0 = vector.load %arg6[%c0, %c0_0] : memref<38x96xf32, #tpu.memory_space<vmem>>, vector<38x96xf32>
    %c0_1 = arith.constant 0 : index
    %c0_2 = arith.constant 0 : index
    %1 = vector.load %arg7[%c0_1, %c0_2] : memref<1x96xf32, #tpu.memory_space<vmem>>, vector<1x96xf32>
    %c0_3 = arith.constant 0 : index
    %c0_4 = arith.constant 0 : index
    %2 = vector.load %arg8[%c0_3, %c0_4] : memref<32x32xf32, #tpu.memory_space<vmem>>, vector<32x32xf32>
    %c0_5 = arith.constant 0 : index
    %c0_6 = arith.constant 0 : index
    %3 = vector.load %arg9[%c0_5, %c0_6] : memref<1x32xf32, #tpu.memory_space<vmem>>, vector<1x32xf32>
    %c0_7 = arith.constant 0 : index
    %c0_8 = arith.constant 0 : index
    %4 = vector.load %arg10[%c0_7, %c0_8] : memref<40x48xf32, #tpu.memory_space<vmem>>, vector<40x48xf32>
    %c0_9 = arith.constant 0 : index
    %c0_10 = arith.constant 0 : index
    %5 = vector.load %arg11[%c0_9, %c0_10] : memref<1x48xf32, #tpu.memory_space<vmem>>, vector<1x48xf32>
    %c0_11 = arith.constant 0 : index
    %c0_12 = arith.constant 0 : index
    %6 = vector.load %arg12[%c0_11, %c0_12] : memref<16x16xf32, #tpu.memory_space<vmem>>, vector<16x16xf32>
    %c0_13 = arith.constant 0 : index
    %c0_14 = arith.constant 0 : index
    %7 = vector.load %arg13[%c0_13, %c0_14] : memref<1x16xf32, #tpu.memory_space<vmem>>, vector<1x16xf32>
    %c0_15 = arith.constant 0 : index
    %c0_16 = arith.constant 0 : index
    %8 = vector.load %arg14[%c0_15, %c0_16] : memref<16x4xf32, #tpu.memory_space<vmem>>, vector<16x4xf32>
    %c0_17 = arith.constant 0 : index
    %c0_18 = arith.constant 0 : index
    %9 = vector.load %arg15[%c0_17, %c0_18] : memref<1x4xf32, #tpu.memory_space<vmem>>, vector<1x4xf32>
    %c0_19 = arith.constant 0 : index
    %c0_20 = arith.constant 0 : index
    %10 = vector.load %arg16[%c0_19, %c0_20] : memref<16x4xf32, #tpu.memory_space<vmem>>, vector<16x4xf32>
    %c0_21 = arith.constant 0 : index
    %c0_22 = arith.constant 0 : index
    %11 = vector.load %arg17[%c0_21, %c0_22] : memref<1x4xf32, #tpu.memory_space<vmem>>, vector<1x4xf32>
    %c0_23 = arith.constant 0 : index
    %c0_24 = arith.constant 0 : index
    %12 = vector.load %arg18[%c0_23, %c0_24] : memref<32x8xf32, #tpu.memory_space<vmem>>, vector<32x8xf32>
    %c0_25 = arith.constant 0 : index
    %c0_26 = arith.constant 0 : index
    %13 = vector.load %arg0[%c0_25, %c0_26] : memref<2x12xf32, #tpu.memory_space<vmem>>, vector<2x12xf32>
    %c0_27 = arith.constant 0 : index
    %c0_28 = arith.constant 0 : index
    %14 = vector.load %arg4[%c0_27, %c0_28] : memref<12x32xf32, #tpu.memory_space<vmem>>, vector<12x32xf32>
    %cst = arith.constant dense<0.000000e+00> : vector<2x32xf32>
    %15 = tpu.matmul %13, %14, %cst {dimension_numbers = #tpu.dot_dimension_numbers<[1], [0], [0], [1], [0, 0, 1, 1], [], []>} : vector<2x12xf32>, vector<12x32xf32>, vector<2x32xf32> -> vector<2x32xf32>
    %c0_29 = arith.constant 0 : index
    %c0_30 = arith.constant 0 : index
    %16 = vector.load %arg5[%c0_29, %c0_30] : memref<1x32xf32, #tpu.memory_space<vmem>>, vector<1x32xf32>
    %17 = vector.broadcast %16 : vector<1x32xf32> to vector<2x32xf32>
    %18 = arith.addf %15, %17 : vector<2x32xf32>
    %c0_31 = arith.constant 0 : index
    %c0_32 = arith.constant 0 : index
    %19 = vector.load %arg19[%c0_31, %c0_32] : memref<2x32xf32, #tpu.memory_space<vmem>>, vector<2x32xf32>
    tpu.vector_store %arg19[%c0_31, %c0_32], %18 {strides = array<i32>} : memref<2x32xf32, #tpu.memory_space<vmem>>, vector<2x32xf32>,
    %c0_33 = arith.constant 0 : index
    %c0_34 = arith.constant 0 : index
    %20 = vector.load %arg3[%c0_33, %c0_34] : memref<1x16xf32, #tpu.memory_space<vmem>>, vector<1x16xf32>
    %21 = vector.shape_cast %20 : vector<1x16xf32> to vector<1x16xf32>
    %22 = vector.broadcast %21 : vector<1x16xf32> to vector<2x16xf32>
    %cst_35 = arith.constant dense<0.000000e+00> : vector<2x8xf32>
    %23 = tpu.matmul %18, %12, %cst_35 {dimension_numbers = #tpu.dot_dimension_numbers<[1], [0], [0], [1], [0, 0, 1, 1], [], []>} : vector<2x32xf32>, vector<32x8xf32>, vector<2x8xf32> -> vector<2x8xf32>
    %c0_i32 = arith.constant 0 : i32
    %24 = arith.index_cast %c0_i32 : i32 to index
    %c0_36 = arith.constant 0 : index
    %c0_37 = arith.constant 0 : index
    %25 = vector.load %arg1[%24, %c0_36, %c0_37] : memref<8x2x18xf32, #tpu.memory_space<vmem>>, vector<1x2x18xf32>
    %26 = vector.shape_cast %25 : vector<1x2x18xf32> to vector<2x18xf32>
    %27 = vector.extract_strided_slice %26 {offsets = [0, 0], sizes = [2, 16], strides = [1, 1]} : vector<2x18xf32> to vector<2x16xf32>
    %28 = vector.extract_strided_slice %26 {offsets = [0, 16], sizes = [2, 2], strides = [1, 1]} : vector<2x18xf32> to vector<2x2xf32>
    %29 = tpu.concatenate %27, %23, %22 in 1 : vector<2x16xf32>, vector<2x8xf32>, vector<2x16xf32> -> vector<2x40xf32>
    %cst_38 = arith.constant dense<0.000000e+00> : vector<2x48xf32>
    %30 = tpu.matmul %29, %4, %cst_38 {dimension_numbers = #tpu.dot_dimension_numbers<[1], [0], [0], [1], [0, 0, 1, 1], [], []>} : vector<2x40xf32>, vector<40x48xf32>, vector<2x48xf32> -> vector<2x48xf32>
    %31 = vector.broadcast %5 : vector<1x48xf32> to vector<2x48xf32>
    %32 = arith.addf %30, %31 : vector<2x48xf32>
    %33 = vector.extract_strided_slice %32 {offsets = [0, 0], sizes = [2, 16], strides = [1, 1]} : vector<2x48xf32> to vector<2x16xf32>
    %34 = arith.negf %33 : vector<2x16xf32>
    %35 = math.exp %34 : vector<2x16xf32>
    %cst_39 = arith.constant 1.000000e+00 : f32
    %36 = vector.broadcast %cst_39 : f32 to vector<2x16xf32>
    %37 = arith.addf %36, %35 : vector<2x16xf32>
    %38 = arith.divf %36, %37 : vector<2x16xf32>
    %39 = vector.extract_strided_slice %32 {offsets = [0, 16], sizes = [2, 16], strides = [1, 1]} : vector<2x48xf32> to vector<2x16xf32>
    %40 = arith.negf %39 : vector<2x16xf32>
    %41 = math.exp %40 : vector<2x16xf32>
    %cst_40 = arith.constant 1.000000e+00 : f32
    %42 = vector.broadcast %cst_40 : f32 to vector<2x16xf32>
    %43 = arith.addf %42, %41 : vector<2x16xf32>
    %44 = arith.divf %42, %43 : vector<2x16xf32>
    %45 = arith.mulf %44, %22 : vector<2x16xf32>
    %cst_41 = arith.constant dense<0.000000e+00> : vector<2x16xf32>
    %46 = tpu.matmul %45, %6, %cst_41 {dimension_numbers = #tpu.dot_dimension_numbers<[1], [0], [0], [1], [0, 0, 1, 1], [], []>} : vector<2x16xf32>, vector<16x16xf32>, vector<2x16xf32> -> vector<2x16xf32>
    %47 = vector.broadcast %7 : vector<1x16xf32> to vector<2x16xf32>
    %48 = arith.addf %46, %47 : vector<2x16xf32>
    %49 = vector.extract_strided_slice %32 {offsets = [0, 32], sizes = [2, 16], strides = [1, 1]} : vector<2x48xf32> to vector<2x16xf32>
    %50 = arith.addf %49, %48 : vector<2x16xf32>
    %51 = math.tanh %50 : vector<2x16xf32>
    %52 = arith.mulf %38, %22 : vector<2x16xf32>
    %cst_42 = arith.constant 1.000000e+00 : f32
    %53 = vector.broadcast %cst_42 : f32 to vector<2x16xf32>
    %54 = arith.subf %53, %38 : vector<2x16xf32>
    %55 = arith.mulf %54, %51 : vector<2x16xf32>
    %56 = arith.addf %52, %55 : vector<2x16xf32>
    %cst_43 = arith.constant -5.000000e+00 : f32
    %cst_44 = arith.constant 5.000000e+00 : f32
    %57 = vector.broadcast %cst_43 : f32 to vector<2x16xf32>
    %58 = arith.maximumf %57, %56 : vector<2x16xf32>
    %59 = vector.broadcast %cst_44 : f32 to vector<2x16xf32>
    %60 = arith.minimumf %59, %58 : vector<2x16xf32>
    %cst_45 = arith.constant dense<0.000000e+00> : vector<2x4xf32>
    %61 = tpu.matmul %60, %8, %cst_45 {dimension_numbers = #tpu.dot_dimension_numbers<[1], [0], [0], [1], [0, 0, 1, 1], [], []>} : vector<2x16xf32>, vector<16x4xf32>, vector<2x4xf32> -> vector<2x4xf32>
    %62 = vector.broadcast %9 : vector<1x4xf32> to vector<2x4xf32>
    %63 = arith.addf %61, %62 : vector<2x4xf32>
    %cst_46 = arith.constant dense<0.000000e+00> : vector<2x4xf32>
    %64 = tpu.matmul %60, %10, %cst_46 {dimension_numbers = #tpu.dot_dimension_numbers<[1], [0], [0], [1], [0, 0, 1, 1], [], []>} : vector<2x16xf32>, vector<16x4xf32>, vector<2x4xf32> -> vector<2x4xf32>
    %65 = vector.broadcast %11 : vector<1x4xf32> to vector<2x4xf32>
    %66 = arith.addf %64, %65 : vector<2x4xf32>
    %cst_47 = arith.constant 5.000000e-01 : f32
    %67 = vector.broadcast %cst_47 : f32 to vector<2x4xf32>
    %68 = arith.mulf %67, %66 : vector<2x4xf32>
    %69 = math.exp %68 : vector<2x4xf32>
    %70 = arith.index_cast %c0_i32 : i32 to index
    %c0_48 = arith.constant 0 : index
    %c0_49 = arith.constant 0 : index
    %71 = vector.load %arg2[%70, %c0_48, %c0_49] : memref<8x2x4xf32, #tpu.memory_space<vmem>>, vector<1x2x4xf32>
    %72 = vector.shape_cast %71 : vector<1x2x4xf32> to vector<2x4xf32>
    %73 = arith.mulf %69, %72 : vector<2x4xf32>
    %74 = arith.addf %63, %73 : vector<2x4xf32>
    %75 = tpu.concatenate %74, %28 in 1 : vector<2x4xf32>, vector<2x2xf32> -> vector<2x6xf32>
    %76 = tpu.concatenate %75, %18 in 1 : vector<2x6xf32>, vector<2x32xf32> -> vector<2x38xf32>
    %cst_50 = arith.constant dense<0.000000e+00> : vector<2x96xf32>
    %77 = tpu.matmul %76, %0, %cst_50 {dimension_numbers = #tpu.dot_dimension_numbers<[1], [0], [0], [1], [0, 0, 1, 1], [], []>} : vector<2x38xf32>, vector<38x96xf32>, vector<2x96xf32> -> vector<2x96xf32>
    %78 = vector.broadcast %1 : vector<1x96xf32> to vector<2x96xf32>
    %79 = arith.addf %77, %78 : vector<2x96xf32>
    %80 = vector.extract_strided_slice %79 {offsets = [0, 0], sizes = [2, 32], strides = [1, 1]} : vector<2x96xf32> to vector<2x32xf32>
    %81 = arith.negf %80 : vector<2x32xf32>
    %82 = math.exp %81 : vector<2x32xf32>
    %cst_51 = arith.constant 1.000000e+00 : f32
    %83 = vector.broadcast %cst_51 : f32 to vector<2x32xf32>
    %84 = arith.addf %83, %82 : vector<2x32xf32>
    %85 = arith.divf %83, %84 : vector<2x32xf32>
    %86 = vector.extract_strided_slice %79 {offsets = [0, 32], sizes = [2, 32], strides = [1, 1]} : vector<2x96xf32> to vector<2x32xf32>
    %87 = arith.negf %86 : vector<2x32xf32>
    %88 = math.exp %87 : vector<2x32xf32>
    %cst_52 = arith.constant 1.000000e+00 : f32
    %89 = vector.broadcast %cst_52 : f32 to vector<2x32xf32>
    %90 = arith.addf %89, %88 : vector<2x32xf32>
    %91 = arith.divf %89, %90 : vector<2x32xf32>
    %92 = arith.mulf %91, %18 : vector<2x32xf32>
    %cst_53 = arith.constant dense<0.000000e+00> : vector<2x32xf32>
    %93 = tpu.matmul %92, %2, %cst_53 {dimension_numbers = #tpu.dot_dimension_numbers<[1], [0], [0], [1], [0, 0, 1, 1], [], []>} : vector<2x32xf32>, vector<32x32xf32>, vector<2x32xf32> -> vector<2x32xf32>
    %94 = vector.broadcast %3 : vector<1x32xf32> to vector<2x32xf32>
    %95 = arith.addf %93, %94 : vector<2x32xf32>
    %96 = vector.extract_strided_slice %79 {offsets = [0, 64], sizes = [2, 32], strides = [1, 1]} : vector<2x96xf32> to vector<2x32xf32>
    %97 = arith.addf %96, %95 : vector<2x32xf32>
    %98 = math.tanh %97 : vector<2x32xf32>
    %99 = arith.mulf %85, %18 : vector<2x32xf32>
    %cst_54 = arith.constant 1.000000e+00 : f32
    %100 = vector.broadcast %cst_54 : f32 to vector<2x32xf32>
    %101 = arith.subf %100, %85 : vector<2x32xf32>
    %102 = arith.mulf %101, %98 : vector<2x32xf32>
    %103 = arith.addf %99, %102 : vector<2x32xf32>
    %cst_55 = arith.constant -5.000000e+00 : f32
    %cst_56 = arith.constant 5.000000e+00 : f32
    %104 = vector.broadcast %cst_55 : f32 to vector<2x32xf32>
    %105 = arith.maximumf %104, %103 : vector<2x32xf32>
    %106 = vector.broadcast %cst_56 : f32 to vector<2x32xf32>
    %107 = arith.minimumf %106, %105 : vector<2x32xf32>
    %cst_57 = arith.constant dense<0.000000e+00> : vector<2x8xf32>
    %108 = tpu.matmul %107, %12, %cst_57 {dimension_numbers = #tpu.dot_dimension_numbers<[1], [0], [0], [1], [0, 0, 1, 1], [], []>} : vector<2x32xf32>, vector<32x8xf32>, vector<2x8xf32> -> vector<2x8xf32>
    %109 = arith.index_cast %c0_i32 : i32 to index
    %c0_58 = arith.constant 0 : index
    %c0_59 = arith.constant 0 : index
    %110 = vector.load %arg20[%109, %c0_58, %c0_59] : memref<8x2x32xf32, #tpu.memory_space<vmem>>, vector<1x2x32xf32>
    %111 = vector.shape_cast %110 : vector<1x2x32xf32> to vector<2x32xf32>
    %112 = vector.shape_cast %107 : vector<2x32xf32> to vector<1x2x32xf32>
    tpu.vector_store %arg20[%109, %c0_58, %c0_59], %112 {strides = array<i32>} : memref<8x2x32xf32, #tpu.memory_space<vmem>>, vector<1x2x32xf32>,
    %113 = arith.index_cast %c0_i32 : i32 to index
    %c0_60 = arith.constant 0 : index
    %c0_61 = arith.constant 0 : index
    %114 = vector.load %arg21[%113, %c0_60, %c0_61] : memref<8x2x16xf32, #tpu.memory_space<vmem>>, vector<1x2x16xf32>
    %115 = vector.shape_cast %114 : vector<1x2x16xf32> to vector<2x16xf32>
    %116 = vector.shape_cast %60 : vector<2x16xf32> to vector<1x2x16xf32>
    tpu.vector_store %arg21[%113, %c0_60, %c0_61], %116 {strides = array<i32>} : memref<8x2x16xf32, #tpu.memory_space<vmem>>, vector<1x2x16xf32>,
    %117 = arith.index_cast %c0_i32 : i32 to index
    %c0_62 = arith.constant 0 : index
    %c0_63 = arith.constant 0 : index
    %118 = vector.load %arg22[%117, %c0_62, %c0_63] : memref<8x2x4xf32, #tpu.memory_space<vmem>>, vector<1x2x4xf32>
    %119 = vector.shape_cast %118 : vector<1x2x4xf32> to vector<2x4xf32>
    %120 = vector.shape_cast %63 : vector<2x4xf32> to vector<1x2x4xf32>
    tpu.vector_store %arg22[%117, %c0_62, %c0_63], %120 {strides = array<i32>} : memref<8x2x4xf32, #tpu.memory_space<vmem>>, vector<1x2x4xf32>,
    %121 = arith.index_cast %c0_i32 : i32 to index
    %c0_64 = arith.constant 0 : index
    %c0_65 = arith.constant 0 : index
    %122 = vector.load %arg23[%121, %c0_64, %c0_65] : memref<8x2x4xf32, #tpu.memory_space<vmem>>, vector<1x2x4xf32>
    %123 = vector.shape_cast %122 : vector<1x2x4xf32> to vector<2x4xf32>
    %124 = vector.shape_cast %69 : vector<2x4xf32> to vector<1x2x4xf32>
    tpu.vector_store %arg23[%121, %c0_64, %c0_65], %124 {strides = array<i32>} : memref<8x2x4xf32, #tpu.memory_space<vmem>>, vector<1x2x4xf32>,
    %125 = arith.index_cast %c0_i32 : i32 to index
    %c0_66 = arith.constant 0 : index
    %c0_67 = arith.constant 0 : index
    %126 = vector.load %arg24[%125, %c0_66, %c0_67] : memref<8x2x6xf32, #tpu.memory_space<vmem>>, vector<1x2x6xf32>
    %127 = vector.shape_cast %126 : vector<1x2x6xf32> to vector<2x6xf32>
    %128 = vector.shape_cast %75 : vector<2x6xf32> to vector<1x2x6xf32>
    tpu.vector_store %arg24[%125, %c0_66, %c0_67], %128 {strides = array<i32>} : memref<8x2x6xf32, #tpu.memory_space<vmem>>, vector<1x2x6xf32>,
    %129 = arith.index_cast %c0_i32 : i32 to index
    %c0_68 = arith.constant 0 : index
    %c0_69 = arith.constant 0 : index
    %130 = vector.load %arg25[%129, %c0_68, %c0_69] : memref<8x2x8xf32, #tpu.memory_space<vmem>>, vector<1x2x8xf32>
    %131 = vector.shape_cast %130 : vector<1x2x8xf32> to vector<2x8xf32>
    %132 = vector.shape_cast %108 : vector<2x8xf32> to vector<1x2x8xf32>
    tpu.vector_store %arg25[%129, %c0_68, %c0_69], %132 {strides = array<i32>} : memref<8x2x8xf32, #tpu.memory_space<vmem>>, vector<1x2x8xf32>,
    %c1_i32 = arith.constant 1 : i32
    %133 = arith.index_cast %c1_i32 : i32 to index
    %c0_70 = arith.constant 0 : index
    %c0_71 = arith.constant 0 : index
    %134 = vector.load %arg1[%133, %c0_70, %c0_71] : memref<8x2x18xf32, #tpu.memory_space<vmem>>, vector<1x2x18xf32>
    %135 = vector.shape_cast %134 : vector<1x2x18xf32> to vector<2x18xf32>
    %136 = vector.extract_strided_slice %135 {offsets = [0, 0], sizes = [2, 16], strides = [1, 1]} : vector<2x18xf32> to vector<2x16xf32>
    %137 = vector.extract_strided_slice %135 {offsets = [0, 16], sizes = [2, 2], strides = [1, 1]} : vector<2x18xf32> to vector<2x2xf32>
    %138 = tpu.concatenate %136, %108, %60 in 1 : vector<2x16xf32>, vector<2x8xf32>, vector<2x16xf32> -> vector<2x40xf32>
    %cst_72 = arith.constant dense<0.000000e+00> : vector<2x48xf32>
    %139 = tpu.matmul %138, %4, %cst_72 {dimension_numbers = #tpu.dot_dimension_numbers<[1], [0], [0], [1], [0, 0, 1, 1], [], []>} : vector<2x40xf32>, vector<40x48xf32>, vector<2x48xf32> -> vector<2x48xf32>
    %140 = vector.broadcast %5 : vector<1x48xf32> to vector<2x48xf32>
    %141 = arith.addf %139, %140 : vector<2x48xf32>
    %142 = vector.extract_strided_slice %141 {offsets = [0, 0], sizes = [2, 16], strides = [1, 1]} : vector<2x48xf32> to vector<2x16xf32>
    %143 = arith.negf %142 : vector<2x16xf32>
    %144 = math.exp %143 : vector<2x16xf32>
    %cst_73 = arith.constant 1.000000e+00 : f32
    %145 = vector.broadcast %cst_73 : f32 to vector<2x16xf32>
    %146 = arith.addf %145, %144 : vector<2x16xf32>
    %147 = arith.divf %145, %146 : vector<2x16xf32>
    %148 = vector.extract_strided_slice %141 {offsets = [0, 16], sizes = [2, 16], strides = [1, 1]} : vector<2x48xf32> to vector<2x16xf32>
    %149 = arith.negf %148 : vector<2x16xf32>
    %150 = math.exp %149 : vector<2x16xf32>
    %cst_74 = arith.constant 1.000000e+00 : f32
    %151 = vector.broadcast %cst_74 : f32 to vector<2x16xf32>
    %152 = arith.addf %151, %150 : vector<2x16xf32>
    %153 = arith.divf %151, %152 : vector<2x16xf32>
    %154 = arith.mulf %153, %60 : vector<2x16xf32>
    %cst_75 = arith.constant dense<0.000000e+00> : vector<2x16xf32>
    %155 = tpu.matmul %154, %6, %cst_75 {dimension_numbers = #tpu.dot_dimension_numbers<[1], [0], [0], [1], [0, 0, 1, 1], [], []>} : vector<2x16xf32>, vector<16x16xf32>, vector<2x16xf32> -> vector<2x16xf32>
    %156 = vector.broadcast %7 : vector<1x16xf32> to vector<2x16xf32>
    %157 = arith.addf %155, %156 : vector<2x16xf32>
    %158 = vector.extract_strided_slice %141 {offsets = [0, 32], sizes = [2, 16], strides = [1, 1]} : vector<2x48xf32> to vector<2x16xf32>
    %159 = arith.addf %158, %157 : vector<2x16xf32>
    %160 = math.tanh %159 : vector<2x16xf32>
    %161 = arith.mulf %147, %60 : vector<2x16xf32>
    %cst_76 = arith.constant 1.000000e+00 : f32
    %162 = vector.broadcast %cst_76 : f32 to vector<2x16xf32>
    %163 = arith.subf %162, %147 : vector<2x16xf32>
    %164 = arith.mulf %163, %160 : vector<2x16xf32>
    %165 = arith.addf %161, %164 : vector<2x16xf32>
    %cst_77 = arith.constant -5.000000e+00 : f32
    %cst_78 = arith.constant 5.000000e+00 : f32
    %166 = vector.broadcast %cst_77 : f32 to vector<2x16xf32>
    %167 = arith.maximumf %166, %165 : vector<2x16xf32>
    %168 = vector.broadcast %cst_78 : f32 to vector<2x16xf32>
    %169 = arith.minimumf %168, %167 : vector<2x16xf32>
    %cst_79 = arith.constant dense<0.000000e+00> : vector<2x4xf32>
    %170 = tpu.matmul %169, %8, %cst_79 {dimension_numbers = #tpu.dot_dimension_numbers<[1], [0], [0], [1], [0, 0, 1, 1], [], []>} : vector<2x16xf32>, vector<16x4xf32>, vector<2x4xf32> -> vector<2x4xf32>
    %171 = vector.broadcast %9 : vector<1x4xf32> to vector<2x4xf32>
    %172 = arith.addf %170, %171 : vector<2x4xf32>
    %cst_80 = arith.constant dense<0.000000e+00> : vector<2x4xf32>
    %173 = tpu.matmul %169, %10, %cst_80 {dimension_numbers = #tpu.dot_dimension_numbers<[1], [0], [0], [1], [0, 0, 1, 1], [], []>} : vector<2x16xf32>, vector<16x4xf32>, vector<2x4xf32> -> vector<2x4xf32>
    %174 = vector.broadcast %11 : vector<1x4xf32> to vector<2x4xf32>
    %175 = arith.addf %173, %174 : vector<2x4xf32>
    %cst_81 = arith.constant 5.000000e-01 : f32
    %176 = vector.broadcast %cst_81 : f32 to vector<2x4xf32>
    %177 = arith.mulf %176, %175 : vector<2x4xf32>
    %178 = math.exp %177 : vector<2x4xf32>
    %179 = arith.index_cast %c1_i32 : i32 to index
    %c0_82 = arith.constant 0 : index
    %c0_83 = arith.constant 0 : index
    %180 = vector.load %arg2[%179, %c0_82, %c0_83] : memref<8x2x4xf32, #tpu.memory_space<vmem>>, vector<1x2x4xf32>
    %181 = vector.shape_cast %180 : vector<1x2x4xf32> to vector<2x4xf32>
    %182 = arith.mulf %178, %181 : vector<2x4xf32>
    %183 = arith.addf %172, %182 : vector<2x4xf32>
    %184 = tpu.concatenate %183, %137 in 1 : vector<2x4xf32>, vector<2x2xf32> -> vector<2x6xf32>
    %185 = tpu.concatenate %184, %107 in 1 : vector<2x6xf32>, vector<2x32xf32> -> vector<2x38xf32>
    %cst_84 = arith.constant dense<0.000000e+00> : vector<2x96xf32>
    %186 = tpu.matmul %185, %0, %cst_84 {dimension_numbers = #tpu.dot_dimension_numbers<[1], [0], [0], [1], [0, 0, 1, 1], [], []>} : vector<2x38xf32>, vector<38x96xf32>, vector<2x96xf32> -> vector<2x96xf32>
    %187 = vector.broadcast %1 : vector<1x96xf32> to vector<2x96xf32>
    %188 = arith.addf %186, %187 : vector<2x96xf32>
    %189 = vector.extract_strided_slice %188 {offsets = [0, 0], sizes = [2, 32], strides = [1, 1]} : vector<2x96xf32> to vector<2x32xf32>
    %190 = arith.negf %189 : vector<2x32xf32>
    %191 = math.exp %190 : vector<2x32xf32>
    %cst_85 = arith.constant 1.000000e+00 : f32
    %192 = vector.broadcast %cst_85 : f32 to vector<2x32xf32>
    %193 = arith.addf %192, %191 : vector<2x32xf32>
    %194 = arith.divf %192, %193 : vector<2x32xf32>
    %195 = vector.extract_strided_slice %188 {offsets = [0, 32], sizes = [2, 32], strides = [1, 1]} : vector<2x96xf32> to vector<2x32xf32>
    %196 = arith.negf %195 : vector<2x32xf32>
    %197 = math.exp %196 : vector<2x32xf32>
    %cst_86 = arith.constant 1.000000e+00 : f32
    %198 = vector.broadcast %cst_86 : f32 to vector<2x32xf32>
    %199 = arith.addf %198, %197 : vector<2x32xf32>
    %200 = arith.divf %198, %199 : vector<2x32xf32>
    %201 = arith.mulf %200, %107 : vector<2x32xf32>
    %cst_87 = arith.constant dense<0.000000e+00> : vector<2x32xf32>
    %202 = tpu.matmul %201, %2, %cst_87 {dimension_numbers = #tpu.dot_dimension_numbers<[1], [0], [0], [1], [0, 0, 1, 1], [], []>} : vector<2x32xf32>, vector<32x32xf32>, vector<2x32xf32> -> vector<2x32xf32>
    %203 = vector.broadcast %3 : vector<1x32xf32> to vector<2x32xf32>
    %204 = arith.addf %202, %203 : vector<2x32xf32>
    %205 = vector.extract_strided_slice %188 {offsets = [0, 64], sizes = [2, 32], strides = [1, 1]} : vector<2x96xf32> to vector<2x32xf32>
    %206 = arith.addf %205, %204 : vector<2x32xf32>
    %207 = math.tanh %206 : vector<2x32xf32>
    %208 = arith.mulf %194, %107 : vector<2x32xf32>
    %cst_88 = arith.constant 1.000000e+00 : f32
    %209 = vector.broadcast %cst_88 : f32 to vector<2x32xf32>
    %210 = arith.subf %209, %194 : vector<2x32xf32>
    %211 = arith.mulf %210, %207 : vector<2x32xf32>
    %212 = arith.addf %208, %211 : vector<2x32xf32>
    %cst_89 = arith.constant -5.000000e+00 : f32
    %cst_90 = arith.constant 5.000000e+00 : f32
    %213 = vector.broadcast %cst_89 : f32 to vector<2x32xf32>
    %214 = arith.maximumf %213, %212 : vector<2x32xf32>
    %215 = vector.broadcast %cst_90 : f32 to vector<2x32xf32>
    %216 = arith.minimumf %215, %214 : vector<2x32xf32>
    %cst_91 = arith.constant dense<0.000000e+00> : vector<2x8xf32>
    %217 = tpu.matmul %216, %12, %cst_91 {dimension_numbers = #tpu.dot_dimension_numbers<[1], [0], [0], [1], [0, 0, 1, 1], [], []>} : vector<2x32xf32>, vector<32x8xf32>, vector<2x8xf32> -> vector<2x8xf32>
    %218 = arith.index_cast %c1_i32 : i32 to index
    %c0_92 = arith.constant 0 : index
    %c0_93 = arith.constant 0 : index
    %219 = vector.load %arg20[%218, %c0_92, %c0_93] : memref<8x2x32xf32, #tpu.memory_space<vmem>>, vector<1x2x32xf32>
    %220 = vector.shape_cast %219 : vector<1x2x32xf32> to vector<2x32xf32>
    %221 = vector.shape_cast %216 : vector<2x32xf32> to vector<1x2x32xf32>
    tpu.vector_store %arg20[%218, %c0_92, %c0_93], %221 {strides = array<i32>} : memref<8x2x32xf32, #tpu.memory_space<vmem>>, vector<1x2x32xf32>,
    %222 = arith.index_cast %c1_i32 : i32 to index
    %c0_94 = arith.constant 0 : index
    %c0_95 = arith.constant 0 : index
    %223 = vector.load %arg21[%222, %c0_94, %c0_95] : memref<8x2x16xf32, #tpu.memory_space<vmem>>, vector<1x2x16xf32>
    %224 = vector.shape_cast %223 : vector<1x2x16xf32> to vector<2x16xf32>
    %225 = vector.shape_cast %169 : vector<2x16xf32> to vector<1x2x16xf32>
    tpu.vector_store %arg21[%222, %c0_94, %c0_95], %225 {strides = array<i32>} : memref<8x2x16xf32, #tpu.memory_space<vmem>>, vector<1x2x16xf32>,
    %226 = arith.index_cast %c1_i32 : i32 to index
    %c0_96 = arith.constant 0 : index
    %c0_97 = arith.constant 0 : index
    %227 = vector.load %arg22[%226, %c0_96, %c0_97] : memref<8x2x4xf32, #tpu.memory_space<vmem>>, vector<1x2x4xf32>
    %228 = vector.shape_cast %227 : vector<1x2x4xf32> to vector<2x4xf32>
    %229 = vector.shape_cast %172 : vector<2x4xf32> to vector<1x2x4xf32>
    tpu.vector_store %arg22[%226, %c0_96, %c0_97], %229 {strides = array<i32>} : memref<8x2x4xf32, #tpu.memory_space<vmem>>, vector<1x2x4xf32>,
    %230 = arith.index_cast %c1_i32 : i32 to index
    %c0_98 = arith.constant 0 : index
    %c0_99 = arith.constant 0 : index
    %231 = vector.load %arg23[%230, %c0_98, %c0_99] : memref<8x2x4xf32, #tpu.memory_space<vmem>>, vector<1x2x4xf32>
    %232 = vector.shape_cast %231 : vector<1x2x4xf32> to vector<2x4xf32>
    %233 = vector.shape_cast %178 : vector<2x4xf32> to vector<1x2x4xf32>
    tpu.vector_store %arg23[%230, %c0_98, %c0_99], %233 {strides = array<i32>} : memref<8x2x4xf32, #tpu.memory_space<vmem>>, vector<1x2x4xf32>,
    %234 = arith.index_cast %c1_i32 : i32 to index
    %c0_100 = arith.constant 0 : index
    %c0_101 = arith.constant 0 : index
    %235 = vector.load %arg24[%234, %c0_100, %c0_101] : memref<8x2x6xf32, #tpu.memory_space<vmem>>, vector<1x2x6xf32>
    %236 = vector.shape_cast %235 : vector<1x2x6xf32> to vector<2x6xf32>
    %237 = vector.shape_cast %184 : vector<2x6xf32> to vector<1x2x6xf32>
    tpu.vector_store %arg24[%234, %c0_100, %c0_101], %237 {strides = array<i32>} : memref<8x2x6xf32, #tpu.memory_space<vmem>>, vector<1x2x6xf32>,
    %238 = arith.index_cast %c1_i32 : i32 to index
    %c0_102 = arith.constant 0 : index
    %c0_103 = arith.constant 0 : index
    %239 = vector.load %arg25[%238, %c0_102, %c0_103] : memref<8x2x8xf32, #tpu.memory_space<vmem>>, vector<1x2x8xf32>
    %240 = vector.shape_cast %239 : vector<1x2x8xf32> to vector<2x8xf32>
    %241 = vector.shape_cast %217 : vector<2x8xf32> to vector<1x2x8xf32>
    tpu.vector_store %arg25[%238, %c0_102, %c0_103], %241 {strides = array<i32>} : memref<8x2x8xf32, #tpu.memory_space<vmem>>, vector<1x2x8xf32>,
    %c2_i32 = arith.constant 2 : i32
    %242 = arith.index_cast %c2_i32 : i32 to index
    %c0_104 = arith.constant 0 : index
    %c0_105 = arith.constant 0 : index
    %243 = vector.load %arg1[%242, %c0_104, %c0_105] : memref<8x2x18xf32, #tpu.memory_space<vmem>>, vector<1x2x18xf32>
    %244 = vector.shape_cast %243 : vector<1x2x18xf32> to vector<2x18xf32>
    %245 = vector.extract_strided_slice %244 {offsets = [0, 0], sizes = [2, 16], strides = [1, 1]} : vector<2x18xf32> to vector<2x16xf32>
    %246 = vector.extract_strided_slice %244 {offsets = [0, 16], sizes = [2, 2], strides = [1, 1]} : vector<2x18xf32> to vector<2x2xf32>
    %247 = tpu.concatenate %245, %217, %169 in 1 : vector<2x16xf32>, vector<2x8xf32>, vector<2x16xf32> -> vector<2x40xf32>
    %cst_106 = arith.constant dense<0.000000e+00> : vector<2x48xf32>
    %248 = tpu.matmul %247, %4, %cst_106 {dimension_numbers = #tpu.dot_dimension_numbers<[1], [0], [0], [1], [0, 0, 1, 1], [], []>} : vector<2x40xf32>, vector<40x48xf32>, vector<2x48xf32> -> vector<2x48xf32>
    %249 = vector.broadcast %5 : vector<1x48xf32> to vector<2x48xf32>
    %250 = arith.addf %248, %249 : vector<2x48xf32>
    %251 = vector.extract_strided_slice %250 {offsets = [0, 0], sizes = [2, 16], strides = [1, 1]} : vector<2x48xf32> to vector<2x16xf32>
    %252 = arith.negf %251 : vector<2x16xf32>
    %253 = math.exp %252 : vector<2x16xf32>
    %cst_107 = arith.constant 1.000000e+00 : f32
    %254 = vector.broadcast %cst_107 : f32 to vector<2x16xf32>
    %255 = arith.addf %254, %253 : vector<2x16xf32>
    %256 = arith.divf %254, %255 : vector<2x16xf32>
    %257 = vector.extract_strided_slice %250 {offsets = [0, 16], sizes = [2, 16], strides = [1, 1]} : vector<2x48xf32> to vector<2x16xf32>
    %258 = arith.negf %257 : vector<2x16xf32>
    %259 = math.exp %258 : vector<2x16xf32>
    %cst_108 = arith.constant 1.000000e+00 : f32
    %260 = vector.broadcast %cst_108 : f32 to vector<2x16xf32>
    %261 = arith.addf %260, %259 : vector<2x16xf32>
    %262 = arith.divf %260, %261 : vector<2x16xf32>
    %263 = arith.mulf %262, %169 : vector<2x16xf32>
    %cst_109 = arith.constant dense<0.000000e+00> : vector<2x16xf32>
    %264 = tpu.matmul %263, %6, %cst_109 {dimension_numbers = #tpu.dot_dimension_numbers<[1], [0], [0], [1], [0, 0, 1, 1], [], []>} : vector<2x16xf32>, vector<16x16xf32>, vector<2x16xf32> -> vector<2x16xf32>
    %265 = vector.broadcast %7 : vector<1x16xf32> to vector<2x16xf32>
    %266 = arith.addf %264, %265 : vector<2x16xf32>
    %267 = vector.extract_strided_slice %250 {offsets = [0, 32], sizes = [2, 16], strides = [1, 1]} : vector<2x48xf32> to vector<2x16xf32>
    %268 = arith.addf %267, %266 : vector<2x16xf32>
    %269 = math.tanh %268 : vector<2x16xf32>
    %270 = arith.mulf %256, %169 : vector<2x16xf32>
    %cst_110 = arith.constant 1.000000e+00 : f32
    %271 = vector.broadcast %cst_110 : f32 to vector<2x16xf32>
    %272 = arith.subf %271, %256 : vector<2x16xf32>
    %273 = arith.mulf %272, %269 : vector<2x16xf32>
    %274 = arith.addf %270, %273 : vector<2x16xf32>
    %cst_111 = arith.constant -5.000000e+00 : f32
    %cst_112 = arith.constant 5.000000e+00 : f32
    %275 = vector.broadcast %cst_111 : f32 to vector<2x16xf32>
    %276 = arith.maximumf %275, %274 : vector<2x16xf32>
    %277 = vector.broadcast %cst_112 : f32 to vector<2x16xf32>
    %278 = arith.minimumf %277, %276 : vector<2x16xf32>
    %cst_113 = arith.constant dense<0.000000e+00> : vector<2x4xf32>
    %279 = tpu.matmul %278, %8, %cst_113 {dimension_numbers = #tpu.dot_dimension_numbers<[1], [0], [0], [1], [0, 0, 1, 1], [], []>} : vector<2x16xf32>, vector<16x4xf32>, vector<2x4xf32> -> vector<2x4xf32>
    %280 = vector.broadcast %9 : vector<1x4xf32> to vector<2x4xf32>
    %281 = arith.addf %279, %280 : vector<2x4xf32>
    %cst_114 = arith.constant dense<0.000000e+00> : vector<2x4xf32>
    %282 = tpu.matmul %278, %10, %cst_114 {dimension_numbers = #tpu.dot_dimension_numbers<[1], [0], [0], [1], [0, 0, 1, 1], [], []>} : vector<2x16xf32>, vector<16x4xf32>, vector<2x4xf32> -> vector<2x4xf32>
    %283 = vector.broadcast %11 : vector<1x4xf32> to vector<2x4xf32>
    %284 = arith.addf %282, %283 : vector<2x4xf32>
    %cst_115 = arith.constant 5.000000e-01 : f32
    %285 = vector.broadcast %cst_115 : f32 to vector<2x4xf32>
    %286 = arith.mulf %285, %284 : vector<2x4xf32>
    %287 = math.exp %286 : vector<2x4xf32>
    %288 = arith.index_cast %c2_i32 : i32 to index
    %c0_116 = arith.constant 0 : index
    %c0_117 = arith.constant 0 : index
    %289 = vector.load %arg2[%288, %c0_116, %c0_117] : memref<8x2x4xf32, #tpu.memory_space<vmem>>, vector<1x2x4xf32>
    %290 = vector.shape_cast %289 : vector<1x2x4xf32> to vector<2x4xf32>
    %291 = arith.mulf %287, %290 : vector<2x4xf32>
    %292 = arith.addf %281, %291 : vector<2x4xf32>
    %293 = tpu.concatenate %292, %246 in 1 : vector<2x4xf32>, vector<2x2xf32> -> vector<2x6xf32>
    %294 = tpu.concatenate %293, %216 in 1 : vector<2x6xf32>, vector<2x32xf32> -> vector<2x38xf32>
    %cst_118 = arith.constant dense<0.000000e+00> : vector<2x96xf32>
    %295 = tpu.matmul %294, %0, %cst_118 {dimension_numbers = #tpu.dot_dimension_numbers<[1], [0], [0], [1], [0, 0, 1, 1], [], []>} : vector<2x38xf32>, vector<38x96xf32>, vector<2x96xf32> -> vector<2x96xf32>
    %296 = vector.broadcast %1 : vector<1x96xf32> to vector<2x96xf32>
    %297 = arith.addf %295, %296 : vector<2x96xf32>
    %298 = vector.extract_strided_slice %297 {offsets = [0, 0], sizes = [2, 32], strides = [1, 1]} : vector<2x96xf32> to vector<2x32xf32>
    %299 = arith.negf %298 : vector<2x32xf32>
    %300 = math.exp %299 : vector<2x32xf32>
    %cst_119 = arith.constant 1.000000e+00 : f32
    %301 = vector.broadcast %cst_119 : f32 to vector<2x32xf32>
    %302 = arith.addf %301, %300 : vector<2x32xf32>
    %303 = arith.divf %301, %302 : vector<2x32xf32>
    %304 = vector.extract_strided_slice %297 {offsets = [0, 32], sizes = [2, 32], strides = [1, 1]} : vector<2x96xf32> to vector<2x32xf32>
    %305 = arith.negf %304 : vector<2x32xf32>
    %306 = math.exp %305 : vector<2x32xf32>
    %cst_120 = arith.constant 1.000000e+00 : f32
    %307 = vector.broadcast %cst_120 : f32 to vector<2x32xf32>
    %308 = arith.addf %307, %306 : vector<2x32xf32>
    %309 = arith.divf %307, %308 : vector<2x32xf32>
    %310 = arith.mulf %309, %216 : vector<2x32xf32>
    %cst_121 = arith.constant dense<0.000000e+00> : vector<2x32xf32>
    %311 = tpu.matmul %310, %2, %cst_121 {dimension_numbers = #tpu.dot_dimension_numbers<[1], [0], [0], [1], [0, 0, 1, 1], [], []>} : vector<2x32xf32>, vector<32x32xf32>, vector<2x32xf32> -> vector<2x32xf32>
    %312 = vector.broadcast %3 : vector<1x32xf32> to vector<2x32xf32>
    %313 = arith.addf %311, %312 : vector<2x32xf32>
    %314 = vector.extract_strided_slice %297 {offsets = [0, 64], sizes = [2, 32], strides = [1, 1]} : vector<2x96xf32> to vector<2x32xf32>
    %315 = arith.addf %314, %313 : vector<2x32xf32>
    %316 = math.tanh %315 : vector<2x32xf32>
    %317 = arith.mulf %303, %216 : vector<2x32xf32>
    %cst_122 = arith.constant 1.000000e+00 : f32
    %318 = vector.broadcast %cst_122 : f32 to vector<2x32xf32>
    %319 = arith.subf %318, %303 : vector<2x32xf32>
    %320 = arith.mulf %319, %316 : vector<2x32xf32>
    %321 = arith.addf %317, %320 : vector<2x32xf32>
    %cst_123 = arith.constant -5.000000e+00 : f32
    %cst_124 = arith.constant 5.000000e+00 : f32
    %322 = vector.broadcast %cst_123 : f32 to vector<2x32xf32>
    %323 = arith.maximumf %322, %321 : vector<2x32xf32>
    %324 = vector.broadcast %cst_124 : f32 to vector<2x32xf32>
    %325 = arith.minimumf %324, %323 : vector<2x32xf32>
    %cst_125 = arith.constant dense<0.000000e+00> : vector<2x8xf32>
    %326 = tpu.matmul %325, %12, %cst_125 {dimension_numbers = #tpu.dot_dimension_numbers<[1], [0], [0], [1], [0, 0, 1, 1], [], []>} : vector<2x32xf32>, vector<32x8xf32>, vector<2x8xf32> -> vector<2x8xf32>
    %327 = arith.index_cast %c2_i32 : i32 to index
    %c0_126 = arith.constant 0 : index
    %c0_127 = arith.constant 0 : index
    %328 = vector.load %arg20[%327, %c0_126, %c0_127] : memref<8x2x32xf32, #tpu.memory_space<vmem>>, vector<1x2x32xf32>
    %329 = vector.shape_cast %328 : vector<1x2x32xf32> to vector<2x32xf32>
    %330 = vector.shape_cast %325 : vector<2x32xf32> to vector<1x2x32xf32>
    tpu.vector_store %arg20[%327, %c0_126, %c0_127], %330 {strides = array<i32>} : memref<8x2x32xf32, #tpu.memory_space<vmem>>, vector<1x2x32xf32>,
    %331 = arith.index_cast %c2_i32 : i32 to index
    %c0_128 = arith.constant 0 : index
    %c0_129 = arith.constant 0 : index
    %332 = vector.load %arg21[%331, %c0_128, %c0_129] : memref<8x2x16xf32, #tpu.memory_space<vmem>>, vector<1x2x16xf32>
    %333 = vector.shape_cast %332 : vector<1x2x16xf32> to vector<2x16xf32>
    %334 = vector.shape_cast %278 : vector<2x16xf32> to vector<1x2x16xf32>
    tpu.vector_store %arg21[%331, %c0_128, %c0_129], %334 {strides = array<i32>} : memref<8x2x16xf32, #tpu.memory_space<vmem>>, vector<1x2x16xf32>,
    %335 = arith.index_cast %c2_i32 : i32 to index
    %c0_130 = arith.constant 0 : index
    %c0_131 = arith.constant 0 : index
    %336 = vector.load %arg22[%335, %c0_130, %c0_131] : memref<8x2x4xf32, #tpu.memory_space<vmem>>, vector<1x2x4xf32>
    %337 = vector.shape_cast %336 : vector<1x2x4xf32> to vector<2x4xf32>
    %338 = vector.shape_cast %281 : vector<2x4xf32> to vector<1x2x4xf32>
    tpu.vector_store %arg22[%335, %c0_130, %c0_131], %338 {strides = array<i32>} : memref<8x2x4xf32, #tpu.memory_space<vmem>>, vector<1x2x4xf32>,
    %339 = arith.index_cast %c2_i32 : i32 to index
    %c0_132 = arith.constant 0 : index
    %c0_133 = arith.constant 0 : index
    %340 = vector.load %arg23[%339, %c0_132, %c0_133] : memref<8x2x4xf32, #tpu.memory_space<vmem>>, vector<1x2x4xf32>
    %341 = vector.shape_cast %340 : vector<1x2x4xf32> to vector<2x4xf32>
    %342 = vector.shape_cast %287 : vector<2x4xf32> to vector<1x2x4xf32>
    tpu.vector_store %arg23[%339, %c0_132, %c0_133], %342 {strides = array<i32>} : memref<8x2x4xf32, #tpu.memory_space<vmem>>, vector<1x2x4xf32>,
    %343 = arith.index_cast %c2_i32 : i32 to index
    %c0_134 = arith.constant 0 : index
    %c0_135 = arith.constant 0 : index
    %344 = vector.load %arg24[%343, %c0_134, %c0_135] : memref<8x2x6xf32, #tpu.memory_space<vmem>>, vector<1x2x6xf32>
    %345 = vector.shape_cast %344 : vector<1x2x6xf32> to vector<2x6xf32>
    %346 = vector.shape_cast %293 : vector<2x6xf32> to vector<1x2x6xf32>
    tpu.vector_store %arg24[%343, %c0_134, %c0_135], %346 {strides = array<i32>} : memref<8x2x6xf32, #tpu.memory_space<vmem>>, vector<1x2x6xf32>,
    %347 = arith.index_cast %c2_i32 : i32 to index
    %c0_136 = arith.constant 0 : index
    %c0_137 = arith.constant 0 : index
    %348 = vector.load %arg25[%347, %c0_136, %c0_137] : memref<8x2x8xf32, #tpu.memory_space<vmem>>, vector<1x2x8xf32>
    %349 = vector.shape_cast %348 : vector<1x2x8xf32> to vector<2x8xf32>
    %350 = vector.shape_cast %326 : vector<2x8xf32> to vector<1x2x8xf32>
    tpu.vector_store %arg25[%347, %c0_136, %c0_137], %350 {strides = array<i32>} : memref<8x2x8xf32, #tpu.memory_space<vmem>>, vector<1x2x8xf32>,
    %c3_i32 = arith.constant 3 : i32
    %351 = arith.index_cast %c3_i32 : i32 to index
    %c0_138 = arith.constant 0 : index
    %c0_139 = arith.constant 0 : index
    %352 = vector.load %arg1[%351, %c0_138, %c0_139] : memref<8x2x18xf32, #tpu.memory_space<vmem>>, vector<1x2x18xf32>
    %353 = vector.shape_cast %352 : vector<1x2x18xf32> to vector<2x18xf32>
    %354 = vector.extract_strided_slice %353 {offsets = [0, 0], sizes = [2, 16], strides = [1, 1]} : vector<2x18xf32> to vector<2x16xf32>
    %355 = vector.extract_strided_slice %353 {offsets = [0, 16], sizes = [2, 2], strides = [1, 1]} : vector<2x18xf32> to vector<2x2xf32>
    %356 = tpu.concatenate %354, %326, %278 in 1 : vector<2x16xf32>, vector<2x8xf32>, vector<2x16xf32> -> vector<2x40xf32>
    %cst_140 = arith.constant dense<0.000000e+00> : vector<2x48xf32>
    %357 = tpu.matmul %356, %4, %cst_140 {dimension_numbers = #tpu.dot_dimension_numbers<[1], [0], [0], [1], [0, 0, 1, 1], [], []>} : vector<2x40xf32>, vector<40x48xf32>, vector<2x48xf32> -> vector<2x48xf32>
    %358 = vector.broadcast %5 : vector<1x48xf32> to vector<2x48xf32>
    %359 = arith.addf %357, %358 : vector<2x48xf32>
    %360 = vector.extract_strided_slice %359 {offsets = [0, 0], sizes = [2, 16], strides = [1, 1]} : vector<2x48xf32> to vector<2x16xf32>
    %361 = arith.negf %360 : vector<2x16xf32>
    %362 = math.exp %361 : vector<2x16xf32>
    %cst_141 = arith.constant 1.000000e+00 : f32
    %363 = vector.broadcast %cst_141 : f32 to vector<2x16xf32>
    %364 = arith.addf %363, %362 : vector<2x16xf32>
    %365 = arith.divf %363, %364 : vector<2x16xf32>
    %366 = vector.extract_strided_slice %359 {offsets = [0, 16], sizes = [2, 16], strides = [1, 1]} : vector<2x48xf32> to vector<2x16xf32>
    %367 = arith.negf %366 : vector<2x16xf32>
    %368 = math.exp %367 : vector<2x16xf32>
    %cst_142 = arith.constant 1.000000e+00 : f32
    %369 = vector.broadcast %cst_142 : f32 to vector<2x16xf32>
    %370 = arith.addf %369, %368 : vector<2x16xf32>
    %371 = arith.divf %369, %370 : vector<2x16xf32>
    %372 = arith.mulf %371, %278 : vector<2x16xf32>
    %cst_143 = arith.constant dense<0.000000e+00> : vector<2x16xf32>
    %373 = tpu.matmul %372, %6, %cst_143 {dimension_numbers = #tpu.dot_dimension_numbers<[1], [0], [0], [1], [0, 0, 1, 1], [], []>} : vector<2x16xf32>, vector<16x16xf32>, vector<2x16xf32> -> vector<2x16xf32>
    %374 = vector.broadcast %7 : vector<1x16xf32> to vector<2x16xf32>
    %375 = arith.addf %373, %374 : vector<2x16xf32>
    %376 = vector.extract_strided_slice %359 {offsets = [0, 32], sizes = [2, 16], strides = [1, 1]} : vector<2x48xf32> to vector<2x16xf32>
    %377 = arith.addf %376, %375 : vector<2x16xf32>
    %378 = math.tanh %377 : vector<2x16xf32>
    %379 = arith.mulf %365, %278 : vector<2x16xf32>
    %cst_144 = arith.constant 1.000000e+00 : f32
    %380 = vector.broadcast %cst_144 : f32 to vector<2x16xf32>
    %381 = arith.subf %380, %365 : vector<2x16xf32>
    %382 = arith.mulf %381, %378 : vector<2x16xf32>
    %383 = arith.addf %379, %382 : vector<2x16xf32>
    %cst_145 = arith.constant -5.000000e+00 : f32
    %cst_146 = arith.constant 5.000000e+00 : f32
    %384 = vector.broadcast %cst_145 : f32 to vector<2x16xf32>
    %385 = arith.maximumf %384, %383 : vector<2x16xf32>
    %386 = vector.broadcast %cst_146 : f32 to vector<2x16xf32>
    %387 = arith.minimumf %386, %385 : vector<2x16xf32>
    %cst_147 = arith.constant dense<0.000000e+00> : vector<2x4xf32>
    %388 = tpu.matmul %387, %8, %cst_147 {dimension_numbers = #tpu.dot_dimension_numbers<[1], [0], [0], [1], [0, 0, 1, 1], [], []>} : vector<2x16xf32>, vector<16x4xf32>, vector<2x4xf32> -> vector<2x4xf32>
    %389 = vector.broadcast %9 : vector<1x4xf32> to vector<2x4xf32>
    %390 = arith.addf %388, %389 : vector<2x4xf32>
    %cst_148 = arith.constant dense<0.000000e+00> : vector<2x4xf32>
    %391 = tpu.matmul %387, %10, %cst_148 {dimension_numbers = #tpu.dot_dimension_numbers<[1], [0], [0], [1], [0, 0, 1, 1], [], []>} : vector<2x16xf32>, vector<16x4xf32>, vector<2x4xf32> -> vector<2x4xf32>
    %392 = vector.broadcast %11 : vector<1x4xf32> to vector<2x4xf32>
    %393 = arith.addf %391, %392 : vector<2x4xf32>
    %cst_149 = arith.constant 5.000000e-01 : f32
    %394 = vector.broadcast %cst_149 : f32 to vector<2x4xf32>
    %395 = arith.mulf %394, %393 : vector<2x4xf32>
    %396 = math.exp %395 : vector<2x4xf32>
    %397 = arith.index_cast %c3_i32 : i32 to index
    %c0_150 = arith.constant 0 : index
    %c0_151 = arith.constant 0 : index
    %398 = vector.load %arg2[%397, %c0_150, %c0_151] : memref<8x2x4xf32, #tpu.memory_space<vmem>>, vector<1x2x4xf32>
    %399 = vector.shape_cast %398 : vector<1x2x4xf32> to vector<2x4xf32>
    %400 = arith.mulf %396, %399 : vector<2x4xf32>
    %401 = arith.addf %390, %400 : vector<2x4xf32>
    %402 = tpu.concatenate %401, %355 in 1 : vector<2x4xf32>, vector<2x2xf32> -> vector<2x6xf32>
    %403 = tpu.concatenate %402, %325 in 1 : vector<2x6xf32>, vector<2x32xf32> -> vector<2x38xf32>
    %cst_152 = arith.constant dense<0.000000e+00> : vector<2x96xf32>
    %404 = tpu.matmul %403, %0, %cst_152 {dimension_numbers = #tpu.dot_dimension_numbers<[1], [0], [0], [1], [0, 0, 1, 1], [], []>} : vector<2x38xf32>, vector<38x96xf32>, vector<2x96xf32> -> vector<2x96xf32>
    %405 = vector.broadcast %1 : vector<1x96xf32> to vector<2x96xf32>
    %406 = arith.addf %404, %405 : vector<2x96xf32>
    %407 = vector.extract_strided_slice %406 {offsets = [0, 0], sizes = [2, 32], strides = [1, 1]} : vector<2x96xf32> to vector<2x32xf32>
    %408 = arith.negf %407 : vector<2x32xf32>
    %409 = math.exp %408 : vector<2x32xf32>
    %cst_153 = arith.constant 1.000000e+00 : f32
    %410 = vector.broadcast %cst_153 : f32 to vector<2x32xf32>
    %411 = arith.addf %410, %409 : vector<2x32xf32>
    %412 = arith.divf %410, %411 : vector<2x32xf32>
    %413 = vector.extract_strided_slice %406 {offsets = [0, 32], sizes = [2, 32], strides = [1, 1]} : vector<2x96xf32> to vector<2x32xf32>
    %414 = arith.negf %413 : vector<2x32xf32>
    %415 = math.exp %414 : vector<2x32xf32>
    %cst_154 = arith.constant 1.000000e+00 : f32
    %416 = vector.broadcast %cst_154 : f32 to vector<2x32xf32>
    %417 = arith.addf %416, %415 : vector<2x32xf32>
    %418 = arith.divf %416, %417 : vector<2x32xf32>
    %419 = arith.mulf %418, %325 : vector<2x32xf32>
    %cst_155 = arith.constant dense<0.000000e+00> : vector<2x32xf32>
    %420 = tpu.matmul %419, %2, %cst_155 {dimension_numbers = #tpu.dot_dimension_numbers<[1], [0], [0], [1], [0, 0, 1, 1], [], []>} : vector<2x32xf32>, vector<32x32xf32>, vector<2x32xf32> -> vector<2x32xf32>
    %421 = vector.broadcast %3 : vector<1x32xf32> to vector<2x32xf32>
    %422 = arith.addf %420, %421 : vector<2x32xf32>
    %423 = vector.extract_strided_slice %406 {offsets = [0, 64], sizes = [2, 32], strides = [1, 1]} : vector<2x96xf32> to vector<2x32xf32>
    %424 = arith.addf %423, %422 : vector<2x32xf32>
    %425 = math.tanh %424 : vector<2x32xf32>
    %426 = arith.mulf %412, %325 : vector<2x32xf32>
    %cst_156 = arith.constant 1.000000e+00 : f32
    %427 = vector.broadcast %cst_156 : f32 to vector<2x32xf32>
    %428 = arith.subf %427, %412 : vector<2x32xf32>
    %429 = arith.mulf %428, %425 : vector<2x32xf32>
    %430 = arith.addf %426, %429 : vector<2x32xf32>
    %cst_157 = arith.constant -5.000000e+00 : f32
    %cst_158 = arith.constant 5.000000e+00 : f32
    %431 = vector.broadcast %cst_157 : f32 to vector<2x32xf32>
    %432 = arith.maximumf %431, %430 : vector<2x32xf32>
    %433 = vector.broadcast %cst_158 : f32 to vector<2x32xf32>
    %434 = arith.minimumf %433, %432 : vector<2x32xf32>
    %cst_159 = arith.constant dense<0.000000e+00> : vector<2x8xf32>
    %435 = tpu.matmul %434, %12, %cst_159 {dimension_numbers = #tpu.dot_dimension_numbers<[1], [0], [0], [1], [0, 0, 1, 1], [], []>} : vector<2x32xf32>, vector<32x8xf32>, vector<2x8xf32> -> vector<2x8xf32>
    %436 = arith.index_cast %c3_i32 : i32 to index
    %c0_160 = arith.constant 0 : index
    %c0_161 = arith.constant 0 : index
    %437 = vector.load %arg20[%436, %c0_160, %c0_161] : memref<8x2x32xf32, #tpu.memory_space<vmem>>, vector<1x2x32xf32>
    %438 = vector.shape_cast %437 : vector<1x2x32xf32> to vector<2x32xf32>
    %439 = vector.shape_cast %434 : vector<2x32xf32> to vector<1x2x32xf32>
    tpu.vector_store %arg20[%436, %c0_160, %c0_161], %439 {strides = array<i32>} : memref<8x2x32xf32, #tpu.memory_space<vmem>>, vector<1x2x32xf32>,
    %440 = arith.index_cast %c3_i32 : i32 to index
    %c0_162 = arith.constant 0 : index
    %c0_163 = arith.constant 0 : index
    %441 = vector.load %arg21[%440, %c0_162, %c0_163] : memref<8x2x16xf32, #tpu.memory_space<vmem>>, vector<1x2x16xf32>
    %442 = vector.shape_cast %441 : vector<1x2x16xf32> to vector<2x16xf32>
    %443 = vector.shape_cast %387 : vector<2x16xf32> to vector<1x2x16xf32>
    tpu.vector_store %arg21[%440, %c0_162, %c0_163], %443 {strides = array<i32>} : memref<8x2x16xf32, #tpu.memory_space<vmem>>, vector<1x2x16xf32>,
    %444 = arith.index_cast %c3_i32 : i32 to index
    %c0_164 = arith.constant 0 : index
    %c0_165 = arith.constant 0 : index
    %445 = vector.load %arg22[%444, %c0_164, %c0_165] : memref<8x2x4xf32, #tpu.memory_space<vmem>>, vector<1x2x4xf32>
    %446 = vector.shape_cast %445 : vector<1x2x4xf32> to vector<2x4xf32>
    %447 = vector.shape_cast %390 : vector<2x4xf32> to vector<1x2x4xf32>
    tpu.vector_store %arg22[%444, %c0_164, %c0_165], %447 {strides = array<i32>} : memref<8x2x4xf32, #tpu.memory_space<vmem>>, vector<1x2x4xf32>,
    %448 = arith.index_cast %c3_i32 : i32 to index
    %c0_166 = arith.constant 0 : index
    %c0_167 = arith.constant 0 : index
    %449 = vector.load %arg23[%448, %c0_166, %c0_167] : memref<8x2x4xf32, #tpu.memory_space<vmem>>, vector<1x2x4xf32>
    %450 = vector.shape_cast %449 : vector<1x2x4xf32> to vector<2x4xf32>
    %451 = vector.shape_cast %396 : vector<2x4xf32> to vector<1x2x4xf32>
    tpu.vector_store %arg23[%448, %c0_166, %c0_167], %451 {strides = array<i32>} : memref<8x2x4xf32, #tpu.memory_space<vmem>>, vector<1x2x4xf32>,
    %452 = arith.index_cast %c3_i32 : i32 to index
    %c0_168 = arith.constant 0 : index
    %c0_169 = arith.constant 0 : index
    %453 = vector.load %arg24[%452, %c0_168, %c0_169] : memref<8x2x6xf32, #tpu.memory_space<vmem>>, vector<1x2x6xf32>
    %454 = vector.shape_cast %453 : vector<1x2x6xf32> to vector<2x6xf32>
    %455 = vector.shape_cast %402 : vector<2x6xf32> to vector<1x2x6xf32>
    tpu.vector_store %arg24[%452, %c0_168, %c0_169], %455 {strides = array<i32>} : memref<8x2x6xf32, #tpu.memory_space<vmem>>, vector<1x2x6xf32>,
    %456 = arith.index_cast %c3_i32 : i32 to index
    %c0_170 = arith.constant 0 : index
    %c0_171 = arith.constant 0 : index
    %457 = vector.load %arg25[%456, %c0_170, %c0_171] : memref<8x2x8xf32, #tpu.memory_space<vmem>>, vector<1x2x8xf32>
    %458 = vector.shape_cast %457 : vector<1x2x8xf32> to vector<2x8xf32>
    %459 = vector.shape_cast %435 : vector<2x8xf32> to vector<1x2x8xf32>
    tpu.vector_store %arg25[%456, %c0_170, %c0_171], %459 {strides = array<i32>} : memref<8x2x8xf32, #tpu.memory_space<vmem>>, vector<1x2x8xf32>,
    %c4_i32 = arith.constant 4 : i32
    %460 = arith.index_cast %c4_i32 : i32 to index
    %c0_172 = arith.constant 0 : index
    %c0_173 = arith.constant 0 : index
    %461 = vector.load %arg1[%460, %c0_172, %c0_173] : memref<8x2x18xf32, #tpu.memory_space<vmem>>, vector<1x2x18xf32>
    %462 = vector.shape_cast %461 : vector<1x2x18xf32> to vector<2x18xf32>
    %463 = vector.extract_strided_slice %462 {offsets = [0, 0], sizes = [2, 16], strides = [1, 1]} : vector<2x18xf32> to vector<2x16xf32>
    %464 = vector.extract_strided_slice %462 {offsets = [0, 16], sizes = [2, 2], strides = [1, 1]} : vector<2x18xf32> to vector<2x2xf32>
    %465 = tpu.concatenate %463, %435, %387 in 1 : vector<2x16xf32>, vector<2x8xf32>, vector<2x16xf32> -> vector<2x40xf32>
    %cst_174 = arith.constant dense<0.000000e+00> : vector<2x48xf32>
    %466 = tpu.matmul %465, %4, %cst_174 {dimension_numbers = #tpu.dot_dimension_numbers<[1], [0], [0], [1], [0, 0, 1, 1], [], []>} : vector<2x40xf32>, vector<40x48xf32>, vector<2x48xf32> -> vector<2x48xf32>
    %467 = vector.broadcast %5 : vector<1x48xf32> to vector<2x48xf32>
    %468 = arith.addf %466, %467 : vector<2x48xf32>
    %469 = vector.extract_strided_slice %468 {offsets = [0, 0], sizes = [2, 16], strides = [1, 1]} : vector<2x48xf32> to vector<2x16xf32>
    %470 = arith.negf %469 : vector<2x16xf32>
    %471 = math.exp %470 : vector<2x16xf32>
    %cst_175 = arith.constant 1.000000e+00 : f32
    %472 = vector.broadcast %cst_175 : f32 to vector<2x16xf32>
    %473 = arith.addf %472, %471 : vector<2x16xf32>
    %474 = arith.divf %472, %473 : vector<2x16xf32>
    %475 = vector.extract_strided_slice %468 {offsets = [0, 16], sizes = [2, 16], strides = [1, 1]} : vector<2x48xf32> to vector<2x16xf32>
    %476 = arith.negf %475 : vector<2x16xf32>
    %477 = math.exp %476 : vector<2x16xf32>
    %cst_176 = arith.constant 1.000000e+00 : f32
    %478 = vector.broadcast %cst_176 : f32 to vector<2x16xf32>
    %479 = arith.addf %478, %477 : vector<2x16xf32>
    %480 = arith.divf %478, %479 : vector<2x16xf32>
    %481 = arith.mulf %480, %387 : vector<2x16xf32>
    %cst_177 = arith.constant dense<0.000000e+00> : vector<2x16xf32>
    %482 = tpu.matmul %481, %6, %cst_177 {dimension_numbers = #tpu.dot_dimension_numbers<[1], [0], [0], [1], [0, 0, 1, 1], [], []>} : vector<2x16xf32>, vector<16x16xf32>, vector<2x16xf32> -> vector<2x16xf32>
    %483 = vector.broadcast %7 : vector<1x16xf32> to vector<2x16xf32>
    %484 = arith.addf %482, %483 : vector<2x16xf32>
    %485 = vector.extract_strided_slice %468 {offsets = [0, 32], sizes = [2, 16], strides = [1, 1]} : vector<2x48xf32> to vector<2x16xf32>
    %486 = arith.addf %485, %484 : vector<2x16xf32>
    %487 = math.tanh %486 : vector<2x16xf32>
    %488 = arith.mulf %474, %387 : vector<2x16xf32>
    %cst_178 = arith.constant 1.000000e+00 : f32
    %489 = vector.broadcast %cst_178 : f32 to vector<2x16xf32>
    %490 = arith.subf %489, %474 : vector<2x16xf32>
    %491 = arith.mulf %490, %487 : vector<2x16xf32>
    %492 = arith.addf %488, %491 : vector<2x16xf32>
    %cst_179 = arith.constant -5.000000e+00 : f32
    %cst_180 = arith.constant 5.000000e+00 : f32
    %493 = vector.broadcast %cst_179 : f32 to vector<2x16xf32>
    %494 = arith.maximumf %493, %492 : vector<2x16xf32>
    %495 = vector.broadcast %cst_180 : f32 to vector<2x16xf32>
    %496 = arith.minimumf %495, %494 : vector<2x16xf32>
    %cst_181 = arith.constant dense<0.000000e+00> : vector<2x4xf32>
    %497 = tpu.matmul %496, %8, %cst_181 {dimension_numbers = #tpu.dot_dimension_numbers<[1], [0], [0], [1], [0, 0, 1, 1], [], []>} : vector<2x16xf32>, vector<16x4xf32>, vector<2x4xf32> -> vector<2x4xf32>
    %498 = vector.broadcast %9 : vector<1x4xf32> to vector<2x4xf32>
    %499 = arith.addf %497, %498 : vector<2x4xf32>
    %cst_182 = arith.constant dense<0.000000e+00> : vector<2x4xf32>
    %500 = tpu.matmul %496, %10, %cst_182 {dimension_numbers = #tpu.dot_dimension_numbers<[1], [0], [0], [1], [0, 0, 1, 1], [], []>} : vector<2x16xf32>, vector<16x4xf32>, vector<2x4xf32> -> vector<2x4xf32>
    %501 = vector.broadcast %11 : vector<1x4xf32> to vector<2x4xf32>
    %502 = arith.addf %500, %501 : vector<2x4xf32>
    %cst_183 = arith.constant 5.000000e-01 : f32
    %503 = vector.broadcast %cst_183 : f32 to vector<2x4xf32>
    %504 = arith.mulf %503, %502 : vector<2x4xf32>
    %505 = math.exp %504 : vector<2x4xf32>
    %506 = arith.index_cast %c4_i32 : i32 to index
    %c0_184 = arith.constant 0 : index
    %c0_185 = arith.constant 0 : index
    %507 = vector.load %arg2[%506, %c0_184, %c0_185] : memref<8x2x4xf32, #tpu.memory_space<vmem>>, vector<1x2x4xf32>
    %508 = vector.shape_cast %507 : vector<1x2x4xf32> to vector<2x4xf32>
    %509 = arith.mulf %505, %508 : vector<2x4xf32>
    %510 = arith.addf %499, %509 : vector<2x4xf32>
    %511 = tpu.concatenate %510, %464 in 1 : vector<2x4xf32>, vector<2x2xf32> -> vector<2x6xf32>
    %512 = tpu.concatenate %511, %434 in 1 : vector<2x6xf32>, vector<2x32xf32> -> vector<2x38xf32>
    %cst_186 = arith.constant dense<0.000000e+00> : vector<2x96xf32>
    %513 = tpu.matmul %512, %0, %cst_186 {dimension_numbers = #tpu.dot_dimension_numbers<[1], [0], [0], [1], [0, 0, 1, 1], [], []>} : vector<2x38xf32>, vector<38x96xf32>, vector<2x96xf32> -> vector<2x96xf32>
    %514 = vector.broadcast %1 : vector<1x96xf32> to vector<2x96xf32>
    %515 = arith.addf %513, %514 : vector<2x96xf32>
    %516 = vector.extract_strided_slice %515 {offsets = [0, 0], sizes = [2, 32], strides = [1, 1]} : vector<2x96xf32> to vector<2x32xf32>
    %517 = arith.negf %516 : vector<2x32xf32>
    %518 = math.exp %517 : vector<2x32xf32>
    %cst_187 = arith.constant 1.000000e+00 : f32
    %519 = vector.broadcast %cst_187 : f32 to vector<2x32xf32>
    %520 = arith.addf %519, %518 : vector<2x32xf32>
    %521 = arith.divf %519, %520 : vector<2x32xf32>
    %522 = vector.extract_strided_slice %515 {offsets = [0, 32], sizes = [2, 32], strides = [1, 1]} : vector<2x96xf32> to vector<2x32xf32>
    %523 = arith.negf %522 : vector<2x32xf32>
    %524 = math.exp %523 : vector<2x32xf32>
    %cst_188 = arith.constant 1.000000e+00 : f32
    %525 = vector.broadcast %cst_188 : f32 to vector<2x32xf32>
    %526 = arith.addf %525, %524 : vector<2x32xf32>
    %527 = arith.divf %525, %526 : vector<2x32xf32>
    %528 = arith.mulf %527, %434 : vector<2x32xf32>
    %cst_189 = arith.constant dense<0.000000e+00> : vector<2x32xf32>
    %529 = tpu.matmul %528, %2, %cst_189 {dimension_numbers = #tpu.dot_dimension_numbers<[1], [0], [0], [1], [0, 0, 1, 1], [], []>} : vector<2x32xf32>, vector<32x32xf32>, vector<2x32xf32> -> vector<2x32xf32>
    %530 = vector.broadcast %3 : vector<1x32xf32> to vector<2x32xf32>
    %531 = arith.addf %529, %530 : vector<2x32xf32>
    %532 = vector.extract_strided_slice %515 {offsets = [0, 64], sizes = [2, 32], strides = [1, 1]} : vector<2x96xf32> to vector<2x32xf32>
    %533 = arith.addf %532, %531 : vector<2x32xf32>
    %534 = math.tanh %533 : vector<2x32xf32>
    %535 = arith.mulf %521, %434 : vector<2x32xf32>
    %cst_190 = arith.constant 1.000000e+00 : f32
    %536 = vector.broadcast %cst_190 : f32 to vector<2x32xf32>
    %537 = arith.subf %536, %521 : vector<2x32xf32>
    %538 = arith.mulf %537, %534 : vector<2x32xf32>
    %539 = arith.addf %535, %538 : vector<2x32xf32>
    %cst_191 = arith.constant -5.000000e+00 : f32
    %cst_192 = arith.constant 5.000000e+00 : f32
    %540 = vector.broadcast %cst_191 : f32 to vector<2x32xf32>
    %541 = arith.maximumf %540, %539 : vector<2x32xf32>
    %542 = vector.broadcast %cst_192 : f32 to vector<2x32xf32>
    %543 = arith.minimumf %542, %541 : vector<2x32xf32>
    %cst_193 = arith.constant dense<0.000000e+00> : vector<2x8xf32>
    %544 = tpu.matmul %543, %12, %cst_193 {dimension_numbers = #tpu.dot_dimension_numbers<[1], [0], [0], [1], [0, 0, 1, 1], [], []>} : vector<2x32xf32>, vector<32x8xf32>, vector<2x8xf32> -> vector<2x8xf32>
    %545 = arith.index_cast %c4_i32 : i32 to index
    %c0_194 = arith.constant 0 : index
    %c0_195 = arith.constant 0 : index
    %546 = vector.load %arg20[%545, %c0_194, %c0_195] : memref<8x2x32xf32, #tpu.memory_space<vmem>>, vector<1x2x32xf32>
    %547 = vector.shape_cast %546 : vector<1x2x32xf32> to vector<2x32xf32>
    %548 = vector.shape_cast %543 : vector<2x32xf32> to vector<1x2x32xf32>
    tpu.vector_store %arg20[%545, %c0_194, %c0_195], %548 {strides = array<i32>} : memref<8x2x32xf32, #tpu.memory_space<vmem>>, vector<1x2x32xf32>,
    %549 = arith.index_cast %c4_i32 : i32 to index
    %c0_196 = arith.constant 0 : index
    %c0_197 = arith.constant 0 : index
    %550 = vector.load %arg21[%549, %c0_196, %c0_197] : memref<8x2x16xf32, #tpu.memory_space<vmem>>, vector<1x2x16xf32>
    %551 = vector.shape_cast %550 : vector<1x2x16xf32> to vector<2x16xf32>
    %552 = vector.shape_cast %496 : vector<2x16xf32> to vector<1x2x16xf32>
    tpu.vector_store %arg21[%549, %c0_196, %c0_197], %552 {strides = array<i32>} : memref<8x2x16xf32, #tpu.memory_space<vmem>>, vector<1x2x16xf32>,
    %553 = arith.index_cast %c4_i32 : i32 to index
    %c0_198 = arith.constant 0 : index
    %c0_199 = arith.constant 0 : index
    %554 = vector.load %arg22[%553, %c0_198, %c0_199] : memref<8x2x4xf32, #tpu.memory_space<vmem>>, vector<1x2x4xf32>
    %555 = vector.shape_cast %554 : vector<1x2x4xf32> to vector<2x4xf32>
    %556 = vector.shape_cast %499 : vector<2x4xf32> to vector<1x2x4xf32>
    tpu.vector_store %arg22[%553, %c0_198, %c0_199], %556 {strides = array<i32>} : memref<8x2x4xf32, #tpu.memory_space<vmem>>, vector<1x2x4xf32>,
    %557 = arith.index_cast %c4_i32 : i32 to index
    %c0_200 = arith.constant 0 : index
    %c0_201 = arith.constant 0 : index
    %558 = vector.load %arg23[%557, %c0_200, %c0_201] : memref<8x2x4xf32, #tpu.memory_space<vmem>>, vector<1x2x4xf32>
    %559 = vector.shape_cast %558 : vector<1x2x4xf32> to vector<2x4xf32>
    %560 = vector.shape_cast %505 : vector<2x4xf32> to vector<1x2x4xf32>
    tpu.vector_store %arg23[%557, %c0_200, %c0_201], %560 {strides = array<i32>} : memref<8x2x4xf32, #tpu.memory_space<vmem>>, vector<1x2x4xf32>,
    %561 = arith.index_cast %c4_i32 : i32 to index
    %c0_202 = arith.constant 0 : index
    %c0_203 = arith.constant 0 : index
    %562 = vector.load %arg24[%561, %c0_202, %c0_203] : memref<8x2x6xf32, #tpu.memory_space<vmem>>, vector<1x2x6xf32>
    %563 = vector.shape_cast %562 : vector<1x2x6xf32> to vector<2x6xf32>
    %564 = vector.shape_cast %511 : vector<2x6xf32> to vector<1x2x6xf32>
    tpu.vector_store %arg24[%561, %c0_202, %c0_203], %564 {strides = array<i32>} : memref<8x2x6xf32, #tpu.memory_space<vmem>>, vector<1x2x6xf32>,
    %565 = arith.index_cast %c4_i32 : i32 to index
    %c0_204 = arith.constant 0 : index
    %c0_205 = arith.constant 0 : index
    %566 = vector.load %arg25[%565, %c0_204, %c0_205] : memref<8x2x8xf32, #tpu.memory_space<vmem>>, vector<1x2x8xf32>
    %567 = vector.shape_cast %566 : vector<1x2x8xf32> to vector<2x8xf32>
    %568 = vector.shape_cast %544 : vector<2x8xf32> to vector<1x2x8xf32>
    tpu.vector_store %arg25[%565, %c0_204, %c0_205], %568 {strides = array<i32>} : memref<8x2x8xf32, #tpu.memory_space<vmem>>, vector<1x2x8xf32>,
    %c5_i32 = arith.constant 5 : i32
    %569 = arith.index_cast %c5_i32 : i32 to index
    %c0_206 = arith.constant 0 : index
    %c0_207 = arith.constant 0 : index
    %570 = vector.load %arg1[%569, %c0_206, %c0_207] : memref<8x2x18xf32, #tpu.memory_space<vmem>>, vector<1x2x18xf32>
    %571 = vector.shape_cast %570 : vector<1x2x18xf32> to vector<2x18xf32>
    %572 = vector.extract_strided_slice %571 {offsets = [0, 0], sizes = [2, 16], strides = [1, 1]} : vector<2x18xf32> to vector<2x16xf32>
    %573 = vector.extract_strided_slice %571 {offsets = [0, 16], sizes = [2, 2], strides = [1, 1]} : vector<2x18xf32> to vector<2x2xf32>
    %574 = tpu.concatenate %572, %544, %496 in 1 : vector<2x16xf32>, vector<2x8xf32>, vector<2x16xf32> -> vector<2x40xf32>
    %cst_208 = arith.constant dense<0.000000e+00> : vector<2x48xf32>
    %575 = tpu.matmul %574, %4, %cst_208 {dimension_numbers = #tpu.dot_dimension_numbers<[1], [0], [0], [1], [0, 0, 1, 1], [], []>} : vector<2x40xf32>, vector<40x48xf32>, vector<2x48xf32> -> vector<2x48xf32>
    %576 = vector.broadcast %5 : vector<1x48xf32> to vector<2x48xf32>
    %577 = arith.addf %575, %576 : vector<2x48xf32>
    %578 = vector.extract_strided_slice %577 {offsets = [0, 0], sizes = [2, 16], strides = [1, 1]} : vector<2x48xf32> to vector<2x16xf32>
    %579 = arith.negf %578 : vector<2x16xf32>
    %580 = math.exp %579 : vector<2x16xf32>
    %cst_209 = arith.constant 1.000000e+00 : f32
    %581 = vector.broadcast %cst_209 : f32 to vector<2x16xf32>
    %582 = arith.addf %581, %580 : vector<2x16xf32>
    %583 = arith.divf %581, %582 : vector<2x16xf32>
    %584 = vector.extract_strided_slice %577 {offsets = [0, 16], sizes = [2, 16], strides = [1, 1]} : vector<2x48xf32> to vector<2x16xf32>
    %585 = arith.negf %584 : vector<2x16xf32>
    %586 = math.exp %585 : vector<2x16xf32>
    %cst_210 = arith.constant 1.000000e+00 : f32
    %587 = vector.broadcast %cst_210 : f32 to vector<2x16xf32>
    %588 = arith.addf %587, %586 : vector<2x16xf32>
    %589 = arith.divf %587, %588 : vector<2x16xf32>
    %590 = arith.mulf %589, %496 : vector<2x16xf32>
    %cst_211 = arith.constant dense<0.000000e+00> : vector<2x16xf32>
    %591 = tpu.matmul %590, %6, %cst_211 {dimension_numbers = #tpu.dot_dimension_numbers<[1], [0], [0], [1], [0, 0, 1, 1], [], []>} : vector<2x16xf32>, vector<16x16xf32>, vector<2x16xf32> -> vector<2x16xf32>
    %592 = vector.broadcast %7 : vector<1x16xf32> to vector<2x16xf32>
    %593 = arith.addf %591, %592 : vector<2x16xf32>
    %594 = vector.extract_strided_slice %577 {offsets = [0, 32], sizes = [2, 16], strides = [1, 1]} : vector<2x48xf32> to vector<2x16xf32>
    %595 = arith.addf %594, %593 : vector<2x16xf32>
    %596 = math.tanh %595 : vector<2x16xf32>
    %597 = arith.mulf %583, %496 : vector<2x16xf32>
    %cst_212 = arith.constant 1.000000e+00 : f32
    %598 = vector.broadcast %cst_212 : f32 to vector<2x16xf32>
    %599 = arith.subf %598, %583 : vector<2x16xf32>
    %600 = arith.mulf %599, %596 : vector<2x16xf32>
    %601 = arith.addf %597, %600 : vector<2x16xf32>
    %cst_213 = arith.constant -5.000000e+00 : f32
    %cst_214 = arith.constant 5.000000e+00 : f32
    %602 = vector.broadcast %cst_213 : f32 to vector<2x16xf32>
    %603 = arith.maximumf %602, %601 : vector<2x16xf32>
    %604 = vector.broadcast %cst_214 : f32 to vector<2x16xf32>
    %605 = arith.minimumf %604, %603 : vector<2x16xf32>
    %cst_215 = arith.constant dense<0.000000e+00> : vector<2x4xf32>
    %606 = tpu.matmul %605, %8, %cst_215 {dimension_numbers = #tpu.dot_dimension_numbers<[1], [0], [0], [1], [0, 0, 1, 1], [], []>} : vector<2x16xf32>, vector<16x4xf32>, vector<2x4xf32> -> vector<2x4xf32>
    %607 = vector.broadcast %9 : vector<1x4xf32> to vector<2x4xf32>
    %608 = arith.addf %606, %607 : vector<2x4xf32>
    %cst_216 = arith.constant dense<0.000000e+00> : vector<2x4xf32>
    %609 = tpu.matmul %605, %10, %cst_216 {dimension_numbers = #tpu.dot_dimension_numbers<[1], [0], [0], [1], [0, 0, 1, 1], [], []>} : vector<2x16xf32>, vector<16x4xf32>, vector<2x4xf32> -> vector<2x4xf32>
    %610 = vector.broadcast %11 : vector<1x4xf32> to vector<2x4xf32>
    %611 = arith.addf %609, %610 : vector<2x4xf32>
    %cst_217 = arith.constant 5.000000e-01 : f32
    %612 = vector.broadcast %cst_217 : f32 to vector<2x4xf32>
    %613 = arith.mulf %612, %611 : vector<2x4xf32>
    %614 = math.exp %613 : vector<2x4xf32>
    %615 = arith.index_cast %c5_i32 : i32 to index
    %c0_218 = arith.constant 0 : index
    %c0_219 = arith.constant 0 : index
    %616 = vector.load %arg2[%615, %c0_218, %c0_219] : memref<8x2x4xf32, #tpu.memory_space<vmem>>, vector<1x2x4xf32>
    %617 = vector.shape_cast %616 : vector<1x2x4xf32> to vector<2x4xf32>
    %618 = arith.mulf %614, %617 : vector<2x4xf32>
    %619 = arith.addf %608, %618 : vector<2x4xf32>
    %620 = tpu.concatenate %619, %573 in 1 : vector<2x4xf32>, vector<2x2xf32> -> vector<2x6xf32>
    %621 = tpu.concatenate %620, %543 in 1 : vector<2x6xf32>, vector<2x32xf32> -> vector<2x38xf32>
    %cst_220 = arith.constant dense<0.000000e+00> : vector<2x96xf32>
    %622 = tpu.matmul %621, %0, %cst_220 {dimension_numbers = #tpu.dot_dimension_numbers<[1], [0], [0], [1], [0, 0, 1, 1], [], []>} : vector<2x38xf32>, vector<38x96xf32>, vector<2x96xf32> -> vector<2x96xf32>
    %623 = vector.broadcast %1 : vector<1x96xf32> to vector<2x96xf32>
    %624 = arith.addf %622, %623 : vector<2x96xf32>
    %625 = vector.extract_strided_slice %624 {offsets = [0, 0], sizes = [2, 32], strides = [1, 1]} : vector<2x96xf32> to vector<2x32xf32>
    %626 = arith.negf %625 : vector<2x32xf32>
    %627 = math.exp %626 : vector<2x32xf32>
    %cst_221 = arith.constant 1.000000e+00 : f32
    %628 = vector.broadcast %cst_221 : f32 to vector<2x32xf32>
    %629 = arith.addf %628, %627 : vector<2x32xf32>
    %630 = arith.divf %628, %629 : vector<2x32xf32>
    %631 = vector.extract_strided_slice %624 {offsets = [0, 32], sizes = [2, 32], strides = [1, 1]} : vector<2x96xf32> to vector<2x32xf32>
    %632 = arith.negf %631 : vector<2x32xf32>
    %633 = math.exp %632 : vector<2x32xf32>
    %cst_222 = arith.constant 1.000000e+00 : f32
    %634 = vector.broadcast %cst_222 : f32 to vector<2x32xf32>
    %635 = arith.addf %634, %633 : vector<2x32xf32>
    %636 = arith.divf %634, %635 : vector<2x32xf32>
    %637 = arith.mulf %636, %543 : vector<2x32xf32>
    %cst_223 = arith.constant dense<0.000000e+00> : vector<2x32xf32>
    %638 = tpu.matmul %637, %2, %cst_223 {dimension_numbers = #tpu.dot_dimension_numbers<[1], [0], [0], [1], [0, 0, 1, 1], [], []>} : vector<2x32xf32>, vector<32x32xf32>, vector<2x32xf32> -> vector<2x32xf32>
    %639 = vector.broadcast %3 : vector<1x32xf32> to vector<2x32xf32>
    %640 = arith.addf %638, %639 : vector<2x32xf32>
    %641 = vector.extract_strided_slice %624 {offsets = [0, 64], sizes = [2, 32], strides = [1, 1]} : vector<2x96xf32> to vector<2x32xf32>
    %642 = arith.addf %641, %640 : vector<2x32xf32>
    %643 = math.tanh %642 : vector<2x32xf32>
    %644 = arith.mulf %630, %543 : vector<2x32xf32>
    %cst_224 = arith.constant 1.000000e+00 : f32
    %645 = vector.broadcast %cst_224 : f32 to vector<2x32xf32>
    %646 = arith.subf %645, %630 : vector<2x32xf32>
    %647 = arith.mulf %646, %643 : vector<2x32xf32>
    %648 = arith.addf %644, %647 : vector<2x32xf32>
    %cst_225 = arith.constant -5.000000e+00 : f32
    %cst_226 = arith.constant 5.000000e+00 : f32
    %649 = vector.broadcast %cst_225 : f32 to vector<2x32xf32>
    %650 = arith.maximumf %649, %648 : vector<2x32xf32>
    %651 = vector.broadcast %cst_226 : f32 to vector<2x32xf32>
    %652 = arith.minimumf %651, %650 : vector<2x32xf32>
    %cst_227 = arith.constant dense<0.000000e+00> : vector<2x8xf32>
    %653 = tpu.matmul %652, %12, %cst_227 {dimension_numbers = #tpu.dot_dimension_numbers<[1], [0], [0], [1], [0, 0, 1, 1], [], []>} : vector<2x32xf32>, vector<32x8xf32>, vector<2x8xf32> -> vector<2x8xf32>
    %654 = arith.index_cast %c5_i32 : i32 to index
    %c0_228 = arith.constant 0 : index
    %c0_229 = arith.constant 0 : index
    %655 = vector.load %arg20[%654, %c0_228, %c0_229] : memref<8x2x32xf32, #tpu.memory_space<vmem>>, vector<1x2x32xf32>
    %656 = vector.shape_cast %655 : vector<1x2x32xf32> to vector<2x32xf32>
    %657 = vector.shape_cast %652 : vector<2x32xf32> to vector<1x2x32xf32>
    tpu.vector_store %arg20[%654, %c0_228, %c0_229], %657 {strides = array<i32>} : memref<8x2x32xf32, #tpu.memory_space<vmem>>, vector<1x2x32xf32>,
    %658 = arith.index_cast %c5_i32 : i32 to index
    %c0_230 = arith.constant 0 : index
    %c0_231 = arith.constant 0 : index
    %659 = vector.load %arg21[%658, %c0_230, %c0_231] : memref<8x2x16xf32, #tpu.memory_space<vmem>>, vector<1x2x16xf32>
    %660 = vector.shape_cast %659 : vector<1x2x16xf32> to vector<2x16xf32>
    %661 = vector.shape_cast %605 : vector<2x16xf32> to vector<1x2x16xf32>
    tpu.vector_store %arg21[%658, %c0_230, %c0_231], %661 {strides = array<i32>} : memref<8x2x16xf32, #tpu.memory_space<vmem>>, vector<1x2x16xf32>,
    %662 = arith.index_cast %c5_i32 : i32 to index
    %c0_232 = arith.constant 0 : index
    %c0_233 = arith.constant 0 : index
    %663 = vector.load %arg22[%662, %c0_232, %c0_233] : memref<8x2x4xf32, #tpu.memory_space<vmem>>, vector<1x2x4xf32>
    %664 = vector.shape_cast %663 : vector<1x2x4xf32> to vector<2x4xf32>
    %665 = vector.shape_cast %608 : vector<2x4xf32> to vector<1x2x4xf32>
    tpu.vector_store %arg22[%662, %c0_232, %c0_233], %665 {strides = array<i32>} : memref<8x2x4xf32, #tpu.memory_space<vmem>>, vector<1x2x4xf32>,
    %666 = arith.index_cast %c5_i32 : i32 to index
    %c0_234 = arith.constant 0 : index
    %c0_235 = arith.constant 0 : index
    %667 = vector.load %arg23[%666, %c0_234, %c0_235] : memref<8x2x4xf32, #tpu.memory_space<vmem>>, vector<1x2x4xf32>
    %668 = vector.shape_cast %667 : vector<1x2x4xf32> to vector<2x4xf32>
    %669 = vector.shape_cast %614 : vector<2x4xf32> to vector<1x2x4xf32>
    tpu.vector_store %arg23[%666, %c0_234, %c0_235], %669 {strides = array<i32>} : memref<8x2x4xf32, #tpu.memory_space<vmem>>, vector<1x2x4xf32>,
    %670 = arith.index_cast %c5_i32 : i32 to index
    %c0_236 = arith.constant 0 : index
    %c0_237 = arith.constant 0 : index
    %671 = vector.load %arg24[%670, %c0_236, %c0_237] : memref<8x2x6xf32, #tpu.memory_space<vmem>>, vector<1x2x6xf32>
    %672 = vector.shape_cast %671 : vector<1x2x6xf32> to vector<2x6xf32>
    %673 = vector.shape_cast %620 : vector<2x6xf32> to vector<1x2x6xf32>
    tpu.vector_store %arg24[%670, %c0_236, %c0_237], %673 {strides = array<i32>} : memref<8x2x6xf32, #tpu.memory_space<vmem>>, vector<1x2x6xf32>,
    %674 = arith.index_cast %c5_i32 : i32 to index
    %c0_238 = arith.constant 0 : index
    %c0_239 = arith.constant 0 : index
    %675 = vector.load %arg25[%674, %c0_238, %c0_239] : memref<8x2x8xf32, #tpu.memory_space<vmem>>, vector<1x2x8xf32>
    %676 = vector.shape_cast %675 : vector<1x2x8xf32> to vector<2x8xf32>
    %677 = vector.shape_cast %653 : vector<2x8xf32> to vector<1x2x8xf32>
    tpu.vector_store %arg25[%674, %c0_238, %c0_239], %677 {strides = array<i32>} : memref<8x2x8xf32, #tpu.memory_space<vmem>>, vector<1x2x8xf32>,
    %c6_i32 = arith.constant 6 : i32
    %678 = arith.index_cast %c6_i32 : i32 to index
    %c0_240 = arith.constant 0 : index
    %c0_241 = arith.constant 0 : index
    %679 = vector.load %arg1[%678, %c0_240, %c0_241] : memref<8x2x18xf32, #tpu.memory_space<vmem>>, vector<1x2x18xf32>
    %680 = vector.shape_cast %679 : vector<1x2x18xf32> to vector<2x18xf32>
    %681 = vector.extract_strided_slice %680 {offsets = [0, 0], sizes = [2, 16], strides = [1, 1]} : vector<2x18xf32> to vector<2x16xf32>
    %682 = vector.extract_strided_slice %680 {offsets = [0, 16], sizes = [2, 2], strides = [1, 1]} : vector<2x18xf32> to vector<2x2xf32>
    %683 = tpu.concatenate %681, %653, %605 in 1 : vector<2x16xf32>, vector<2x8xf32>, vector<2x16xf32> -> vector<2x40xf32>
    %cst_242 = arith.constant dense<0.000000e+00> : vector<2x48xf32>
    %684 = tpu.matmul %683, %4, %cst_242 {dimension_numbers = #tpu.dot_dimension_numbers<[1], [0], [0], [1], [0, 0, 1, 1], [], []>} : vector<2x40xf32>, vector<40x48xf32>, vector<2x48xf32> -> vector<2x48xf32>
    %685 = vector.broadcast %5 : vector<1x48xf32> to vector<2x48xf32>
    %686 = arith.addf %684, %685 : vector<2x48xf32>
    %687 = vector.extract_strided_slice %686 {offsets = [0, 0], sizes = [2, 16], strides = [1, 1]} : vector<2x48xf32> to vector<2x16xf32>
    %688 = arith.negf %687 : vector<2x16xf32>
    %689 = math.exp %688 : vector<2x16xf32>
    %cst_243 = arith.constant 1.000000e+00 : f32
    %690 = vector.broadcast %cst_243 : f32 to vector<2x16xf32>
    %691 = arith.addf %690, %689 : vector<2x16xf32>
    %692 = arith.divf %690, %691 : vector<2x16xf32>
    %693 = vector.extract_strided_slice %686 {offsets = [0, 16], sizes = [2, 16], strides = [1, 1]} : vector<2x48xf32> to vector<2x16xf32>
    %694 = arith.negf %693 : vector<2x16xf32>
    %695 = math.exp %694 : vector<2x16xf32>
    %cst_244 = arith.constant 1.000000e+00 : f32
    %696 = vector.broadcast %cst_244 : f32 to vector<2x16xf32>
    %697 = arith.addf %696, %695 : vector<2x16xf32>
    %698 = arith.divf %696, %697 : vector<2x16xf32>
    %699 = arith.mulf %698, %605 : vector<2x16xf32>
    %cst_245 = arith.constant dense<0.000000e+00> : vector<2x16xf32>
    %700 = tpu.matmul %699, %6, %cst_245 {dimension_numbers = #tpu.dot_dimension_numbers<[1], [0], [0], [1], [0, 0, 1, 1], [], []>} : vector<2x16xf32>, vector<16x16xf32>, vector<2x16xf32> -> vector<2x16xf32>
    %701 = vector.broadcast %7 : vector<1x16xf32> to vector<2x16xf32>
    %702 = arith.addf %700, %701 : vector<2x16xf32>
    %703 = vector.extract_strided_slice %686 {offsets = [0, 32], sizes = [2, 16], strides = [1, 1]} : vector<2x48xf32> to vector<2x16xf32>
    %704 = arith.addf %703, %702 : vector<2x16xf32>
    %705 = math.tanh %704 : vector<2x16xf32>
    %706 = arith.mulf %692, %605 : vector<2x16xf32>
    %cst_246 = arith.constant 1.000000e+00 : f32
    %707 = vector.broadcast %cst_246 : f32 to vector<2x16xf32>
    %708 = arith.subf %707, %692 : vector<2x16xf32>
    %709 = arith.mulf %708, %705 : vector<2x16xf32>
    %710 = arith.addf %706, %709 : vector<2x16xf32>
    %cst_247 = arith.constant -5.000000e+00 : f32
    %cst_248 = arith.constant 5.000000e+00 : f32
    %711 = vector.broadcast %cst_247 : f32 to vector<2x16xf32>
    %712 = arith.maximumf %711, %710 : vector<2x16xf32>
    %713 = vector.broadcast %cst_248 : f32 to vector<2x16xf32>
    %714 = arith.minimumf %713, %712 : vector<2x16xf32>
    %cst_249 = arith.constant dense<0.000000e+00> : vector<2x4xf32>
    %715 = tpu.matmul %714, %8, %cst_249 {dimension_numbers = #tpu.dot_dimension_numbers<[1], [0], [0], [1], [0, 0, 1, 1], [], []>} : vector<2x16xf32>, vector<16x4xf32>, vector<2x4xf32> -> vector<2x4xf32>
    %716 = vector.broadcast %9 : vector<1x4xf32> to vector<2x4xf32>
    %717 = arith.addf %715, %716 : vector<2x4xf32>
    %cst_250 = arith.constant dense<0.000000e+00> : vector<2x4xf32>
    %718 = tpu.matmul %714, %10, %cst_250 {dimension_numbers = #tpu.dot_dimension_numbers<[1], [0], [0], [1], [0, 0, 1, 1], [], []>} : vector<2x16xf32>, vector<16x4xf32>, vector<2x4xf32> -> vector<2x4xf32>
    %719 = vector.broadcast %11 : vector<1x4xf32> to vector<2x4xf32>
    %720 = arith.addf %718, %719 : vector<2x4xf32>
    %cst_251 = arith.constant 5.000000e-01 : f32
    %721 = vector.broadcast %cst_251 : f32 to vector<2x4xf32>
    %722 = arith.mulf %721, %720 : vector<2x4xf32>
    %723 = math.exp %722 : vector<2x4xf32>
    %724 = arith.index_cast %c6_i32 : i32 to index
    %c0_252 = arith.constant 0 : index
    %c0_253 = arith.constant 0 : index
    %725 = vector.load %arg2[%724, %c0_252, %c0_253] : memref<8x2x4xf32, #tpu.memory_space<vmem>>, vector<1x2x4xf32>
    %726 = vector.shape_cast %725 : vector<1x2x4xf32> to vector<2x4xf32>
    %727 = arith.mulf %723, %726 : vector<2x4xf32>
    %728 = arith.addf %717, %727 : vector<2x4xf32>
    %729 = tpu.concatenate %728, %682 in 1 : vector<2x4xf32>, vector<2x2xf32> -> vector<2x6xf32>
    %730 = tpu.concatenate %729, %652 in 1 : vector<2x6xf32>, vector<2x32xf32> -> vector<2x38xf32>
    %cst_254 = arith.constant dense<0.000000e+00> : vector<2x96xf32>
    %731 = tpu.matmul %730, %0, %cst_254 {dimension_numbers = #tpu.dot_dimension_numbers<[1], [0], [0], [1], [0, 0, 1, 1], [], []>} : vector<2x38xf32>, vector<38x96xf32>, vector<2x96xf32> -> vector<2x96xf32>
    %732 = vector.broadcast %1 : vector<1x96xf32> to vector<2x96xf32>
    %733 = arith.addf %731, %732 : vector<2x96xf32>
    %734 = vector.extract_strided_slice %733 {offsets = [0, 0], sizes = [2, 32], strides = [1, 1]} : vector<2x96xf32> to vector<2x32xf32>
    %735 = arith.negf %734 : vector<2x32xf32>
    %736 = math.exp %735 : vector<2x32xf32>
    %cst_255 = arith.constant 1.000000e+00 : f32
    %737 = vector.broadcast %cst_255 : f32 to vector<2x32xf32>
    %738 = arith.addf %737, %736 : vector<2x32xf32>
    %739 = arith.divf %737, %738 : vector<2x32xf32>
    %740 = vector.extract_strided_slice %733 {offsets = [0, 32], sizes = [2, 32], strides = [1, 1]} : vector<2x96xf32> to vector<2x32xf32>
    %741 = arith.negf %740 : vector<2x32xf32>
    %742 = math.exp %741 : vector<2x32xf32>
    %cst_256 = arith.constant 1.000000e+00 : f32
    %743 = vector.broadcast %cst_256 : f32 to vector<2x32xf32>
    %744 = arith.addf %743, %742 : vector<2x32xf32>
    %745 = arith.divf %743, %744 : vector<2x32xf32>
    %746 = arith.mulf %745, %652 : vector<2x32xf32>
    %cst_257 = arith.constant dense<0.000000e+00> : vector<2x32xf32>
    %747 = tpu.matmul %746, %2, %cst_257 {dimension_numbers = #tpu.dot_dimension_numbers<[1], [0], [0], [1], [0, 0, 1, 1], [], []>} : vector<2x32xf32>, vector<32x32xf32>, vector<2x32xf32> -> vector<2x32xf32>
    %748 = vector.broadcast %3 : vector<1x32xf32> to vector<2x32xf32>
    %749 = arith.addf %747, %748 : vector<2x32xf32>
    %750 = vector.extract_strided_slice %733 {offsets = [0, 64], sizes = [2, 32], strides = [1, 1]} : vector<2x96xf32> to vector<2x32xf32>
    %751 = arith.addf %750, %749 : vector<2x32xf32>
    %752 = math.tanh %751 : vector<2x32xf32>
    %753 = arith.mulf %739, %652 : vector<2x32xf32>
    %cst_258 = arith.constant 1.000000e+00 : f32
    %754 = vector.broadcast %cst_258 : f32 to vector<2x32xf32>
    %755 = arith.subf %754, %739 : vector<2x32xf32>
    %756 = arith.mulf %755, %752 : vector<2x32xf32>
    %757 = arith.addf %753, %756 : vector<2x32xf32>
    %cst_259 = arith.constant -5.000000e+00 : f32
    %cst_260 = arith.constant 5.000000e+00 : f32
    %758 = vector.broadcast %cst_259 : f32 to vector<2x32xf32>
    %759 = arith.maximumf %758, %757 : vector<2x32xf32>
    %760 = vector.broadcast %cst_260 : f32 to vector<2x32xf32>
    %761 = arith.minimumf %760, %759 : vector<2x32xf32>
    %cst_261 = arith.constant dense<0.000000e+00> : vector<2x8xf32>
    %762 = tpu.matmul %761, %12, %cst_261 {dimension_numbers = #tpu.dot_dimension_numbers<[1], [0], [0], [1], [0, 0, 1, 1], [], []>} : vector<2x32xf32>, vector<32x8xf32>, vector<2x8xf32> -> vector<2x8xf32>
    %763 = arith.index_cast %c6_i32 : i32 to index
    %c0_262 = arith.constant 0 : index
    %c0_263 = arith.constant 0 : index
    %764 = vector.load %arg20[%763, %c0_262, %c0_263] : memref<8x2x32xf32, #tpu.memory_space<vmem>>, vector<1x2x32xf32>
    %765 = vector.shape_cast %764 : vector<1x2x32xf32> to vector<2x32xf32>
    %766 = vector.shape_cast %761 : vector<2x32xf32> to vector<1x2x32xf32>
    tpu.vector_store %arg20[%763, %c0_262, %c0_263], %766 {strides = array<i32>} : memref<8x2x32xf32, #tpu.memory_space<vmem>>, vector<1x2x32xf32>,
    %767 = arith.index_cast %c6_i32 : i32 to index
    %c0_264 = arith.constant 0 : index
    %c0_265 = arith.constant 0 : index
    %768 = vector.load %arg21[%767, %c0_264, %c0_265] : memref<8x2x16xf32, #tpu.memory_space<vmem>>, vector<1x2x16xf32>
    %769 = vector.shape_cast %768 : vector<1x2x16xf32> to vector<2x16xf32>
    %770 = vector.shape_cast %714 : vector<2x16xf32> to vector<1x2x16xf32>
    tpu.vector_store %arg21[%767, %c0_264, %c0_265], %770 {strides = array<i32>} : memref<8x2x16xf32, #tpu.memory_space<vmem>>, vector<1x2x16xf32>,
    %771 = arith.index_cast %c6_i32 : i32 to index
    %c0_266 = arith.constant 0 : index
    %c0_267 = arith.constant 0 : index
    %772 = vector.load %arg22[%771, %c0_266, %c0_267] : memref<8x2x4xf32, #tpu.memory_space<vmem>>, vector<1x2x4xf32>
    %773 = vector.shape_cast %772 : vector<1x2x4xf32> to vector<2x4xf32>
    %774 = vector.shape_cast %717 : vector<2x4xf32> to vector<1x2x4xf32>
    tpu.vector_store %arg22[%771, %c0_266, %c0_267], %774 {strides = array<i32>} : memref<8x2x4xf32, #tpu.memory_space<vmem>>, vector<1x2x4xf32>,
    %775 = arith.index_cast %c6_i32 : i32 to index
    %c0_268 = arith.constant 0 : index
    %c0_269 = arith.constant 0 : index
    %776 = vector.load %arg23[%775, %c0_268, %c0_269] : memref<8x2x4xf32, #tpu.memory_space<vmem>>, vector<1x2x4xf32>
    %777 = vector.shape_cast %776 : vector<1x2x4xf32> to vector<2x4xf32>
    %778 = vector.shape_cast %723 : vector<2x4xf32> to vector<1x2x4xf32>
    tpu.vector_store %arg23[%775, %c0_268, %c0_269], %778 {strides = array<i32>} : memref<8x2x4xf32, #tpu.memory_space<vmem>>, vector<1x2x4xf32>,
    %779 = arith.index_cast %c6_i32 : i32 to index
    %c0_270 = arith.constant 0 : index
    %c0_271 = arith.constant 0 : index
    %780 = vector.load %arg24[%779, %c0_270, %c0_271] : memref<8x2x6xf32, #tpu.memory_space<vmem>>, vector<1x2x6xf32>
    %781 = vector.shape_cast %780 : vector<1x2x6xf32> to vector<2x6xf32>
    %782 = vector.shape_cast %729 : vector<2x6xf32> to vector<1x2x6xf32>
    tpu.vector_store %arg24[%779, %c0_270, %c0_271], %782 {strides = array<i32>} : memref<8x2x6xf32, #tpu.memory_space<vmem>>, vector<1x2x6xf32>,
    %783 = arith.index_cast %c6_i32 : i32 to index
    %c0_272 = arith.constant 0 : index
    %c0_273 = arith.constant 0 : index
    %784 = vector.load %arg25[%783, %c0_272, %c0_273] : memref<8x2x8xf32, #tpu.memory_space<vmem>>, vector<1x2x8xf32>
    %785 = vector.shape_cast %784 : vector<1x2x8xf32> to vector<2x8xf32>
    %786 = vector.shape_cast %762 : vector<2x8xf32> to vector<1x2x8xf32>
    tpu.vector_store %arg25[%783, %c0_272, %c0_273], %786 {strides = array<i32>} : memref<8x2x8xf32, #tpu.memory_space<vmem>>, vector<1x2x8xf32>,
    %c7_i32 = arith.constant 7 : i32
    %787 = arith.index_cast %c7_i32 : i32 to index
    %c0_274 = arith.constant 0 : index
    %c0_275 = arith.constant 0 : index
    %788 = vector.load %arg1[%787, %c0_274, %c0_275] : memref<8x2x18xf32, #tpu.memory_space<vmem>>, vector<1x2x18xf32>
    %789 = vector.shape_cast %788 : vector<1x2x18xf32> to vector<2x18xf32>
    %790 = vector.extract_strided_slice %789 {offsets = [0, 0], sizes = [2, 16], strides = [1, 1]} : vector<2x18xf32> to vector<2x16xf32>
    %791 = vector.extract_strided_slice %789 {offsets = [0, 16], sizes = [2, 2], strides = [1, 1]} : vector<2x18xf32> to vector<2x2xf32>
    %792 = tpu.concatenate %790, %762, %714 in 1 : vector<2x16xf32>, vector<2x8xf32>, vector<2x16xf32> -> vector<2x40xf32>
    %cst_276 = arith.constant dense<0.000000e+00> : vector<2x48xf32>
    %793 = tpu.matmul %792, %4, %cst_276 {dimension_numbers = #tpu.dot_dimension_numbers<[1], [0], [0], [1], [0, 0, 1, 1], [], []>} : vector<2x40xf32>, vector<40x48xf32>, vector<2x48xf32> -> vector<2x48xf32>
    %794 = vector.broadcast %5 : vector<1x48xf32> to vector<2x48xf32>
    %795 = arith.addf %793, %794 : vector<2x48xf32>
    %796 = vector.extract_strided_slice %795 {offsets = [0, 0], sizes = [2, 16], strides = [1, 1]} : vector<2x48xf32> to vector<2x16xf32>
    %797 = arith.negf %796 : vector<2x16xf32>
    %798 = math.exp %797 : vector<2x16xf32>
    %cst_277 = arith.constant 1.000000e+00 : f32
    %799 = vector.broadcast %cst_277 : f32 to vector<2x16xf32>
    %800 = arith.addf %799, %798 : vector<2x16xf32>
    %801 = arith.divf %799, %800 : vector<2x16xf32>
    %802 = vector.extract_strided_slice %795 {offsets = [0, 16], sizes = [2, 16], strides = [1, 1]} : vector<2x48xf32> to vector<2x16xf32>
    %803 = arith.negf %802 : vector<2x16xf32>
    %804 = math.exp %803 : vector<2x16xf32>
    %cst_278 = arith.constant 1.000000e+00 : f32
    %805 = vector.broadcast %cst_278 : f32 to vector<2x16xf32>
    %806 = arith.addf %805, %804 : vector<2x16xf32>
    %807 = arith.divf %805, %806 : vector<2x16xf32>
    %808 = arith.mulf %807, %714 : vector<2x16xf32>
    %cst_279 = arith.constant dense<0.000000e+00> : vector<2x16xf32>
    %809 = tpu.matmul %808, %6, %cst_279 {dimension_numbers = #tpu.dot_dimension_numbers<[1], [0], [0], [1], [0, 0, 1, 1], [], []>} : vector<2x16xf32>, vector<16x16xf32>, vector<2x16xf32> -> vector<2x16xf32>
    %810 = vector.broadcast %7 : vector<1x16xf32> to vector<2x16xf32>
    %811 = arith.addf %809, %810 : vector<2x16xf32>
    %812 = vector.extract_strided_slice %795 {offsets = [0, 32], sizes = [2, 16], strides = [1, 1]} : vector<2x48xf32> to vector<2x16xf32>
    %813 = arith.addf %812, %811 : vector<2x16xf32>
    %814 = math.tanh %813 : vector<2x16xf32>
    %815 = arith.mulf %801, %714 : vector<2x16xf32>
    %cst_280 = arith.constant 1.000000e+00 : f32
    %816 = vector.broadcast %cst_280 : f32 to vector<2x16xf32>
    %817 = arith.subf %816, %801 : vector<2x16xf32>
    %818 = arith.mulf %817, %814 : vector<2x16xf32>
    %819 = arith.addf %815, %818 : vector<2x16xf32>
    %cst_281 = arith.constant -5.000000e+00 : f32
    %cst_282 = arith.constant 5.000000e+00 : f32
    %820 = vector.broadcast %cst_281 : f32 to vector<2x16xf32>
    %821 = arith.maximumf %820, %819 : vector<2x16xf32>
    %822 = vector.broadcast %cst_282 : f32 to vector<2x16xf32>
    %823 = arith.minimumf %822, %821 : vector<2x16xf32>
    %cst_283 = arith.constant dense<0.000000e+00> : vector<2x4xf32>
    %824 = tpu.matmul %823, %8, %cst_283 {dimension_numbers = #tpu.dot_dimension_numbers<[1], [0], [0], [1], [0, 0, 1, 1], [], []>} : vector<2x16xf32>, vector<16x4xf32>, vector<2x4xf32> -> vector<2x4xf32>
    %825 = vector.broadcast %9 : vector<1x4xf32> to vector<2x4xf32>
    %826 = arith.addf %824, %825 : vector<2x4xf32>
    %cst_284 = arith.constant dense<0.000000e+00> : vector<2x4xf32>
    %827 = tpu.matmul %823, %10, %cst_284 {dimension_numbers = #tpu.dot_dimension_numbers<[1], [0], [0], [1], [0, 0, 1, 1], [], []>} : vector<2x16xf32>, vector<16x4xf32>, vector<2x4xf32> -> vector<2x4xf32>
    %828 = vector.broadcast %11 : vector<1x4xf32> to vector<2x4xf32>
    %829 = arith.addf %827, %828 : vector<2x4xf32>
    %cst_285 = arith.constant 5.000000e-01 : f32
    %830 = vector.broadcast %cst_285 : f32 to vector<2x4xf32>
    %831 = arith.mulf %830, %829 : vector<2x4xf32>
    %832 = math.exp %831 : vector<2x4xf32>
    %833 = arith.index_cast %c7_i32 : i32 to index
    %c0_286 = arith.constant 0 : index
    %c0_287 = arith.constant 0 : index
    %834 = vector.load %arg2[%833, %c0_286, %c0_287] : memref<8x2x4xf32, #tpu.memory_space<vmem>>, vector<1x2x4xf32>
    %835 = vector.shape_cast %834 : vector<1x2x4xf32> to vector<2x4xf32>
    %836 = arith.mulf %832, %835 : vector<2x4xf32>
    %837 = arith.addf %826, %836 : vector<2x4xf32>
    %838 = tpu.concatenate %837, %791 in 1 : vector<2x4xf32>, vector<2x2xf32> -> vector<2x6xf32>
    %839 = tpu.concatenate %838, %761 in 1 : vector<2x6xf32>, vector<2x32xf32> -> vector<2x38xf32>
    %cst_288 = arith.constant dense<0.000000e+00> : vector<2x96xf32>
    %840 = tpu.matmul %839, %0, %cst_288 {dimension_numbers = #tpu.dot_dimension_numbers<[1], [0], [0], [1], [0, 0, 1, 1], [], []>} : vector<2x38xf32>, vector<38x96xf32>, vector<2x96xf32> -> vector<2x96xf32>
    %841 = vector.broadcast %1 : vector<1x96xf32> to vector<2x96xf32>
    %842 = arith.addf %840, %841 : vector<2x96xf32>
    %843 = vector.extract_strided_slice %842 {offsets = [0, 0], sizes = [2, 32], strides = [1, 1]} : vector<2x96xf32> to vector<2x32xf32>
    %844 = arith.negf %843 : vector<2x32xf32>
    %845 = math.exp %844 : vector<2x32xf32>
    %cst_289 = arith.constant 1.000000e+00 : f32
    %846 = vector.broadcast %cst_289 : f32 to vector<2x32xf32>
    %847 = arith.addf %846, %845 : vector<2x32xf32>
    %848 = arith.divf %846, %847 : vector<2x32xf32>
    %849 = vector.extract_strided_slice %842 {offsets = [0, 32], sizes = [2, 32], strides = [1, 1]} : vector<2x96xf32> to vector<2x32xf32>
    %850 = arith.negf %849 : vector<2x32xf32>
    %851 = math.exp %850 : vector<2x32xf32>
    %cst_290 = arith.constant 1.000000e+00 : f32
    %852 = vector.broadcast %cst_290 : f32 to vector<2x32xf32>
    %853 = arith.addf %852, %851 : vector<2x32xf32>
    %854 = arith.divf %852, %853 : vector<2x32xf32>
    %855 = arith.mulf %854, %761 : vector<2x32xf32>
    %cst_291 = arith.constant dense<0.000000e+00> : vector<2x32xf32>
    %856 = tpu.matmul %855, %2, %cst_291 {dimension_numbers = #tpu.dot_dimension_numbers<[1], [0], [0], [1], [0, 0, 1, 1], [], []>} : vector<2x32xf32>, vector<32x32xf32>, vector<2x32xf32> -> vector<2x32xf32>
    %857 = vector.broadcast %3 : vector<1x32xf32> to vector<2x32xf32>
    %858 = arith.addf %856, %857 : vector<2x32xf32>
    %859 = vector.extract_strided_slice %842 {offsets = [0, 64], sizes = [2, 32], strides = [1, 1]} : vector<2x96xf32> to vector<2x32xf32>
    %860 = arith.addf %859, %858 : vector<2x32xf32>
    %861 = math.tanh %860 : vector<2x32xf32>
    %862 = arith.mulf %848, %761 : vector<2x32xf32>
    %cst_292 = arith.constant 1.000000e+00 : f32
    %863 = vector.broadcast %cst_292 : f32 to vector<2x32xf32>
    %864 = arith.subf %863, %848 : vector<2x32xf32>
    %865 = arith.mulf %864, %861 : vector<2x32xf32>
    %866 = arith.addf %862, %865 : vector<2x32xf32>
    %cst_293 = arith.constant -5.000000e+00 : f32
    %cst_294 = arith.constant 5.000000e+00 : f32
    %867 = vector.broadcast %cst_293 : f32 to vector<2x32xf32>
    %868 = arith.maximumf %867, %866 : vector<2x32xf32>
    %869 = vector.broadcast %cst_294 : f32 to vector<2x32xf32>
    %870 = arith.minimumf %869, %868 : vector<2x32xf32>
    %cst_295 = arith.constant dense<0.000000e+00> : vector<2x8xf32>
    %871 = tpu.matmul %870, %12, %cst_295 {dimension_numbers = #tpu.dot_dimension_numbers<[1], [0], [0], [1], [0, 0, 1, 1], [], []>} : vector<2x32xf32>, vector<32x8xf32>, vector<2x8xf32> -> vector<2x8xf32>
    %872 = arith.index_cast %c7_i32 : i32 to index
    %c0_296 = arith.constant 0 : index
    %c0_297 = arith.constant 0 : index
    %873 = vector.load %arg20[%872, %c0_296, %c0_297] : memref<8x2x32xf32, #tpu.memory_space<vmem>>, vector<1x2x32xf32>
    %874 = vector.shape_cast %873 : vector<1x2x32xf32> to vector<2x32xf32>
    %875 = vector.shape_cast %870 : vector<2x32xf32> to vector<1x2x32xf32>
    tpu.vector_store %arg20[%872, %c0_296, %c0_297], %875 {strides = array<i32>} : memref<8x2x32xf32, #tpu.memory_space<vmem>>, vector<1x2x32xf32>,
    %876 = arith.index_cast %c7_i32 : i32 to index
    %c0_298 = arith.constant 0 : index
    %c0_299 = arith.constant 0 : index
    %877 = vector.load %arg21[%876, %c0_298, %c0_299] : memref<8x2x16xf32, #tpu.memory_space<vmem>>, vector<1x2x16xf32>
    %878 = vector.shape_cast %877 : vector<1x2x16xf32> to vector<2x16xf32>
    %879 = vector.shape_cast %823 : vector<2x16xf32> to vector<1x2x16xf32>
    tpu.vector_store %arg21[%876, %c0_298, %c0_299], %879 {strides = array<i32>} : memref<8x2x16xf32, #tpu.memory_space<vmem>>, vector<1x2x16xf32>,
    %880 = arith.index_cast %c7_i32 : i32 to index
    %c0_300 = arith.constant 0 : index
    %c0_301 = arith.constant 0 : index
    %881 = vector.load %arg22[%880, %c0_300, %c0_301] : memref<8x2x4xf32, #tpu.memory_space<vmem>>, vector<1x2x4xf32>
    %882 = vector.shape_cast %881 : vector<1x2x4xf32> to vector<2x4xf32>
    %883 = vector.shape_cast %826 : vector<2x4xf32> to vector<1x2x4xf32>
    tpu.vector_store %arg22[%880, %c0_300, %c0_301], %883 {strides = array<i32>} : memref<8x2x4xf32, #tpu.memory_space<vmem>>, vector<1x2x4xf32>,
    %884 = arith.index_cast %c7_i32 : i32 to index
    %c0_302 = arith.constant 0 : index
    %c0_303 = arith.constant 0 : index
    %885 = vector.load %arg23[%884, %c0_302, %c0_303] : memref<8x2x4xf32, #tpu.memory_space<vmem>>, vector<1x2x4xf32>
    %886 = vector.shape_cast %885 : vector<1x2x4xf32> to vector<2x4xf32>
    %887 = vector.shape_cast %832 : vector<2x4xf32> to vector<1x2x4xf32>
    tpu.vector_store %arg23[%884, %c0_302, %c0_303], %887 {strides = array<i32>} : memref<8x2x4xf32, #tpu.memory_space<vmem>>, vector<1x2x4xf32>,
    %888 = arith.index_cast %c7_i32 : i32 to index
    %c0_304 = arith.constant 0 : index
    %c0_305 = arith.constant 0 : index
    %889 = vector.load %arg24[%888, %c0_304, %c0_305] : memref<8x2x6xf32, #tpu.memory_space<vmem>>, vector<1x2x6xf32>
    %890 = vector.shape_cast %889 : vector<1x2x6xf32> to vector<2x6xf32>
    %891 = vector.shape_cast %838 : vector<2x6xf32> to vector<1x2x6xf32>
    tpu.vector_store %arg24[%888, %c0_304, %c0_305], %891 {strides = array<i32>} : memref<8x2x6xf32, #tpu.memory_space<vmem>>, vector<1x2x6xf32>,
    %892 = arith.index_cast %c7_i32 : i32 to index
    %c0_306 = arith.constant 0 : index
    %c0_307 = arith.constant 0 : index
    %893 = vector.load %arg25[%892, %c0_306, %c0_307] : memref<8x2x8xf32, #tpu.memory_space<vmem>>, vector<1x2x8xf32>
    %894 = vector.shape_cast %893 : vector<1x2x8xf32> to vector<2x8xf32>
    %895 = vector.shape_cast %871 : vector<2x8xf32> to vector<1x2x8xf32>
    tpu.vector_store %arg25[%892, %c0_306, %c0_307], %895 {strides = array<i32>} : memref<8x2x8xf32, #tpu.memory_space<vmem>>, vector<1x2x8xf32>,
    %c8_i32 = arith.constant 8 : i32
    return
  }
}

</mosaic_0001>

<bundles_post_ra>
// kernel: tpu_custom_call.1
= control target key start
LH: loop header
LB: loop body
LE: loop exit
PB: predicated region body
PF: predicated region fallthrough
CT: control target
= control target key end

     0   :  { %s8246_s0 = inlined_call_operand.hbm [shape: f32[2,12], index: 0, kind: input, shape index: {}]   ;;  %s8247_s1 = inlined_call_operand.hbm [shape: f32[8,2,18], index: 1, kind: input, shape index: {}]   ;;  %s8248_s2 = inlined_call_operand.vmem [shape: f32[8,2,4], index: 2, kind: input, shape index: {}]   ;;  %s8249_s3 = inlined_call_operand.hbm [shape: f32[1,16], index: 3, kind: input, shape index: {}]   ;;  %s8250_s4 = inlined_call_operand.hbm [shape: f32[12,32], index: 4, kind: input, shape index: {}]   ;;  %s8251_s5 = inlined_call_operand.hbm [shape: f32[1,32], index: 5, kind: input, shape index: {}]   ;;  %s8252_s6 = inlined_call_operand.vmem [shape: f32[38,96], index: 6, kind: input, shape index: {}]   ;;  %s8253_s7 = inlined_call_operand.hbm [shape: f32[1,96], index: 7, kind: input, shape index: {}]   ;;  %s8254_s8 = inlined_call_operand.vmem [shape: f32[32,32], index: 8, kind: input, shape index: {}]   ;;  %s8255_s9 = inlined_call_operand.hbm [shape: f32[1,32], index: 9, kind: input, shape index: {}]   ;;  %s8256_s10 = inlined_call_operand.vmem [shape: f32[40,48], index: 10, kind: input, shape index: {}]   ;;  %s8257_s11 = inlined_call_operand.hbm [shape: f32[1,48], index: 11, kind: input, shape index: {}]   ;;  %s8258_s12 = inlined_call_operand.hbm [shape: f32[16,16], index: 12, kind: input, shape index: {}]   ;;  %s8259_s13 = inlined_call_operand.vmem [shape: f32[1,16], index: 13, kind: input, shape index: {}]   ;;  %s8260_s14 = inlined_call_operand.vmem [shape: f32[16,4], index: 14, kind: input, shape index: {}]   ;;  %s8261_s15 = inlined_call_operand.vmem [shape: f32[1,4], index: 15, kind: input, shape index: {}]   ;;  %s8262_s16 = inlined_call_operand.vmem [shape: f32[16,4], index: 16, kind: input, shape index: {}]   ;;  %s8263_s17 = inlined_call_operand.vmem [shape: f32[1,4], index: 17, kind: input, shape index: {}]   ;;  %s8264_s18 = inlined_call_operand.vmem [shape: f32[32,8], index: 18, kind: input, shape index: {}]   ;;  %s8265_s19 = inlined_call_operand.hbm [shape: f32[2,32], index: 19, kind: output, shape index: {0}]   ;;  %s8266_s20 = inlined_call_operand.hbm [shape: f32[8,2,32], index: 20, kind: output, shape index: {1}]   ;;  %s8267_s21 = inlined_call_operand.hbm [shape: f32[8,2,16], index: 21, kind: output, shape index: {2}]   ;;  %s8268_s22 = inlined_call_operand.vmem [shape: f32[8,2,4], index: 22, kind: output, shape index: {3}]   ;;  %s8269_s23 = inlined_call_operand.vmem [shape: f32[8,2,4], index: 23, kind: output, shape index: {4}]   ;;  %s8270_s24 = inlined_call_operand.vmem [shape: f32[8,2,6], index: 24, kind: output, shape index: {5}]   ;;  %s8271_s25 = inlined_call_operand.hbm [shape: f32[8,2,8], index: 25, kind: output, shape index: {6}]  }
   0x1   :  { %8279 = sst [smem:[#allocation31_spill]] %s8246_s0 }
   0x2   :  { %8280 = sst [smem:[#allocation32_spill]] %s8247_s1 }
   0x3   :  { %8281 = sst [smem:[#allocation33_spill]] %s8248_s2 }
   0x4   :  { %8282 = sst [smem:[#allocation34_spill]] %s8249_s3 }
   0x5   :  { %8283 = sst [smem:[#allocation35_spill]] %s8250_s4 }
   0x6   :  { %8284 = sst [smem:[#allocation36_spill]] %s8251_s5 }
   0x7   :  { %8285 = sst [smem:[#allocation37_spill]] %s8252_s6 }
   0x8   :  { %8286 = sst [smem:[#allocation38_spill]] %s8253_s7 }
   0x9   :  { %8287 = sst [smem:[#allocation39_spill]] %s8254_s8 }
   0xa   :  { %8288 = sst [smem:[#allocation40_spill]] %s8255_s9 }
   0xb   :  { %31 = vsyncpa [#allocation3], 0 }
   0xc   :  { %32 = vsyncpa [#allocation6], 0 }
   0xd   :  { %33 = vsyncpa [#allocation9], 0 }
   0xe   :  { %34 = vsyncpa [#allocation12], 0 }
   0xf   :  { %35 = vsyncpa [#allocation15], 0 }
  0x10   :  { %36 = vsyncpa [#allocation4], 0 }
  0x11   :  { %37 = vsyncpa [#allocation19], 0 }
  0x12   :  { %38 = vsyncpa [#allocation22], 0  ;;  %s6736_s29 = smov [#allocation5]  }
  0x13   :  { %s54_s2 = sshll.u32 %s6736_s29, 4  ;;  %s55_s2 = int_to_ptr.vmem [resolvable:$true] %s54_s2 }
  0x14   :  { %s6468_s6 = scalar_lea.vmem %s55_s2, 256  ;;  %p6473_p1 = scmp.lt.s32.totalorder %s55_s2, %s55_s2 }
  0x15   :  { %p6469_p0 = scmp.ne.s32.totalorder %s55_s2, %s6468_s6  ;;  %p6474_p2 = scmp.lt.s32.totalorder %s6468_s6, %s6468_s6 }
  0x17   :  { %p6475_p3 = por %p6474_p2, %p6473_p1 }
  0x19   :  { %p6476_p4 = pnand %p6475_p3, %p6469_p0 }
  0x1b   :  { %6479 = shalt.err (!%p6476_p4)
}
  0x1c   :  { %s8277_s30 = smov 32   ;;  %s8275_s7 = smov 2  }
  0x1d   :  { %s8289_s1 = sld [smem:[#allocation32_spill]]  ;;  %s6739_s8 = smov [#allocation8]  }
  0x1e   :  { %s78_s27 = sshll.u32 %s6739_s8, 4  ;;  %s79_s27 = int_to_ptr.vmem [resolvable:$true] %s78_s27 }
  0x1f   :  { %s6488_s4 = scalar_lea.vmem %s79_s27, 256  ;;  %p6493_p6 = scmp.lt.s32.totalorder %s79_s27, %s79_s27 }
  0x20   :  { %p6489_p5 = scmp.ne.s32.totalorder %s79_s27, %s6488_s4  ;;  %p6494_p7 = scmp.lt.s32.totalorder %s6488_s4, %s6488_s4 }
  0x22   :  { %p6495_p8 = por %p6494_p7, %p6493_p6 }
  0x23   :  { %60 = dma.hbm_to_vmem [thread:$0]  %s8289_s1, 256, %s55_s2, [#allocation6], %s8277_s30, %s8277_s30, %s8275_s7  }
  0x24   :  { %p6496_p9 = pnand %p6495_p8, %p6489_p5 }
  0x26   :  { %6499 = shalt.err (!%p6496_p9)
}
  0x27   :  { %s6740_s28 = smov 128   ;;  %s6741_s9 = smov 8  }
  0x28   :  { %s8290_s29 = sld [smem:[#allocation35_spill]]  ;;  %s6742_s2 = smov [#allocation11]  }
  0x29   :  { %s103_s6 = sshll.u32 %s6742_s2, 4  ;;  %s6743_s3 = smov [#allocation14]   ;;  %s104_s6 = int_to_ptr.vmem [resolvable:$true] %s103_s6 }
  0x2a   :  { %s127_s26 = sshll.u32 %s6743_s3, 4  ;;  %s6508_s1 = scalar_lea.vmem %s104_s6, 16  ;;  %s128_s26 = int_to_ptr.vmem [resolvable:$true] %s127_s26 }
  0x2b   :  { %p6509_p10 = scmp.ne.s32.totalorder %s104_s6, %s6508_s1  ;;  %s6512_s8 = scalar_lea.vmem %s104_s6, 32 }
  0x2c   :  { %p6513_p11 = scmp.lt.s32.totalorder %s104_s6, %s104_s6  ;;  %p6514_p12 = scmp.lt.s32.totalorder %s6512_s8, %s6508_s1 }
  0x2e   :  { %84 = dma.hbm_to_vmem [thread:$0]  %s8290_s29, 256, %s79_s27, [#allocation9], %s6740_s28, %s6740_s28, %s6741_s9  }
  0x2f   :  { %p6515_p13 = por %p6514_p12, %p6513_p11 }
  0x31   :  { %p6516_p0 = pnand %p6515_p13, %p6509_p10 }
  0x33   :  { %6519 = shalt.err (!%p6516_p0)
}
  0x34   :  { %s8291_s30 = sld [smem:[#allocation38_spill]]  ;;  %s6528_s5 = scalar_lea.vmem %s128_s26, 16 }
  0x35   :  { %p6529_p1 = scmp.ne.s32.totalorder %s128_s26, %s6528_s5  ;;  %s6532_s27 = scalar_lea.vmem %s128_s26, 32 }
  0x36   :  { %p6533_p2 = scmp.lt.s32.totalorder %s128_s26, %s128_s26  ;;  %p6534_p3 = scmp.lt.s32.totalorder %s6532_s27, %s6528_s5 }
  0x38   :  { %p6535_p4 = por %p6534_p3, %p6533_p2 }
  0x3a   :  { %106 = dma.hbm_to_vmem [thread:$0]  %s8291_s30, 16, %s104_s6, [#allocation12]  }
  0x3b   :  { %p6536_p5 = pnand %p6535_p4, %p6529_p1 }
  0x3d   :  { %6539 = shalt.err (!%p6536_p5)
}
  0x3e   :  { %130 = dma.hbm_to_vmem [thread:$0]  %s8257_s11, 16, %s128_s26, [#allocation15]  }
  0x3f   :  { %s6744_s2 = smov [#allocation2]   ;;  %s6745_s1 = smov [#allocation7]  }
  0x40   :  { %s45_s3 = sshll.u32 %s6744_s2, 4  ;;  %s69_s8 = sshll.u32 %s6745_s1, 4  ;;  %s46_s3 = int_to_ptr.vmem [resolvable:$true] %s45_s3  ;;  %s70_s8 = int_to_ptr.vmem [resolvable:$true] %s69_s8 }
  0x41   :  { %s6548_s7 = scalar_lea.vmem %s46_s3, 32  ;;  %p6553_p7 = scmp.lt.s32.totalorder %s46_s3, %s46_s3 }
  0x42   :  { %p6549_p6 = scmp.ne.s32.totalorder %s46_s3, %s6548_s7  ;;  %p6554_p8 = scmp.lt.s32.totalorder %s6548_s7, %s6548_s7 }
  0x44   :  { %p6555_p9 = por %p6554_p8, %p6553_p7 }
  0x46   :  { %p6556_p10 = pnand %p6555_p9, %p6549_p6 }
  0x48   :  { %6559 = shalt.err (!%p6556_p10)
}
  0x49   :  { %s8292_s4 = sld [smem:[#allocation31_spill]]  ;;  %s6568_s5 = scalar_lea.vmem %s70_s8, 16 }
  0x4a   :  { %p6569_p11 = scmp.ne.s32.totalorder %s70_s8, %s6568_s5  ;;  %s6572_s11 = scalar_lea.vmem %s70_s8, 32 }
  0x4b   :  { %p6573_p12 = scmp.lt.s32.totalorder %s70_s8, %s70_s8  ;;  %p6574_p13 = scmp.lt.s32.totalorder %s6572_s11, %s6568_s5 }
  0x4d   :  { %p6575_p0 = por %p6574_p13, %p6573_p12 }
  0x4f   :  { %48 = dma.hbm_to_vmem [thread:$0]  %s8292_s4, 32, %s46_s3, [#allocation3]  }
  0x50   :  { %p6576_p1 = pnand %p6575_p0, %p6569_p11 }
  0x52   :  { %6579 = shalt.err (!%p6576_p1)
}
  0x53   :  { %s8293_s0 = sld [smem:[#allocation34_spill]]  ;;  %s6746_s29 = smov [#allocation10]  }
  0x54   :  { %s91_s2 = sshll.u32 %s6746_s29, 4  ;;  %s6747_s1 = smov [#allocation13]   ;;  %s92_s2 = int_to_ptr.vmem [resolvable:$true] %s91_s2 }
  0x55   :  { %s115_s7 = sshll.u32 %s6747_s1, 4  ;;  %s6588_s30 = scalar_lea.vmem %s92_s2, 16  ;;  %s116_s7 = int_to_ptr.vmem [resolvable:$true] %s115_s7 }
  0x56   :  { %p6589_p2 = scmp.ne.s32.totalorder %s92_s2, %s6588_s30  ;;  %s6592_s3 = scalar_lea.vmem %s92_s2, 32 }
  0x57   :  { %p6593_p3 = scmp.lt.s32.totalorder %s92_s2, %s92_s2  ;;  %p6594_p4 = scmp.lt.s32.totalorder %s6592_s3, %s6588_s30 }
  0x59   :  { %72 = dma.hbm_to_vmem [thread:$0]  %s8293_s0, 16, %s70_s8, [#allocation6]  }
  0x5a   :  { %p6595_p5 = por %p6594_p4, %p6593_p3 }
  0x5c   :  { %p6596_p6 = pnand %p6595_p5, %p6589_p2 }
  0x5e   :  { %6599 = shalt.err (!%p6596_p6)
}
  0x5f   :  { %s8294_s5 = sld [smem:[#allocation36_spill]]  ;;  %s6608_s11 = scalar_lea.vmem %s116_s7, 16 }
  0x60   :  { %p6609_p7 = scmp.ne.s32.totalorder %s116_s7, %s6608_s11  ;;  %s6612_s8 = scalar_lea.vmem %s116_s7, 32 }
  0x61   :  { %p6613_p8 = scmp.lt.s32.totalorder %s116_s7, %s116_s7  ;;  %p6614_p9 = scmp.lt.s32.totalorder %s6612_s8, %s6608_s11 }
  0x63   :  { %p6615_p10 = por %p6614_p9, %p6613_p8 }
  0x65   :  { %94 = dma.hbm_to_vmem [thread:$0]  %s8294_s5, 16, %s92_s2, [#allocation9]  }
  0x66   :  { %p6616_p11 = pnand %p6615_p10, %p6609_p7 }
  0x68   :  { %6619 = shalt.err (!%p6616_p11)
}
  0x69   :  { %s8295_s0 = sld [smem:[#allocation40_spill]]  ;;  %s6748_s29 = smov [#allocation16]  }
  0x6a   :  { %s136_s1 = sshll.u32 %s6748_s29, 4  ;;  %s137_s1 = int_to_ptr.vmem [resolvable:$true] %s136_s1 }
  0x6b   :  { %s6628_s30 = scalar_lea.vmem %s137_s1, 256  ;;  %p6633_p13 = scmp.lt.s32.totalorder %s137_s1, %s137_s1 }
  0x6c   :  { %p6629_p12 = scmp.ne.s32.totalorder %s137_s1, %s6628_s30  ;;  %p6634_p0 = scmp.lt.s32.totalorder %s6628_s30, %s6628_s30 }
  0x6e   :  { %p6635_p1 = por %p6634_p0, %p6633_p13 }
  0x6f   :  { %118 = dma.hbm_to_vmem [thread:$0]  %s8295_s0, 16, %s116_s7, [#allocation12]  }
  0x70   :  { %p6636_p2 = pnand %p6635_p1, %p6629_p12 }
  0x72   :  { %6639 = shalt.err (!%p6636_p2)
}
  0x73   :  { %142 = dma.hbm_to_vmem [thread:$0]  %s8258_s12, 256, %s137_s1, [#allocation15], %s6740_s28, %s6740_s28, %s6741_s9  }
  0x74   :  { %6720 = dma.done.wait [#allocation3], 32  }
  0x75   :  { %6721 = vsyncadd [#allocation3], 4294967264 }
  0x76   :  { %6722 = dma.done.wait [#allocation6], 272  }
  0x77   :  { %6723 = vsyncadd [#allocation6], 4294967024 }
  0x78   :  { %6724 = dma.done.wait [#allocation9], 272  }
  0x79   :  { %6725 = vsyncadd [#allocation9], 4294967024 }
  0x7a   :  { %6726 = dma.done.wait [#allocation12], 32  }
  0x7b   :  { %6727 = vsyncadd [#allocation12], 4294967264 }
  0x7c   :  { %6728 = dma.done.wait [#allocation15], 272  }
  0x7d   :  { %6729 = vsyncadd [#allocation15], 4294967024  ;;  %v6749_v0 = vmov 0.0   ;;  %vm6750_vm0 = vmmov 0   ;;  %vm226_vm1 = vcmask 1043456   ;;  %v213_v2 = vld [vmem:[#allocation8] sm:$0xff] }
  0x7e   :  { %5718 = vmatprep.subr.mxu1 %v6749_v0  ;;  %5722 = vmatprep.mubr.msk.f32.mxu1 %vm6750_vm0, %v6749_v0  ;;  %v214_v1 = vld [vmem:[#allocation8 + $0x8] sm:$0xf]  ;;  %v212_v3 = vld [vmem:[#allocation2] sm:$0x3]  ;;  %vm222_vm2 = vcmask 97280   ;;  %v6944_v5 = vld [vmem:[%s8264_s18 + $0x10] sm:$0xff] }
  0x7f   :  { %5736 = vmatprep.subr.mxu0 %v6749_v0  ;;  %5746 = vmatprep.mubr.msk.f32.mxu0 %vm6750_vm0, %v6749_v0  ;;  %v6938_v4 = vld [vmem:[%s8264_s18 + $0x18] sm:$0xff]  ;;  %v6955_v6 = vld [vmem:[%s8264_s18 + $0x8] sm:$0xff]  ;;  %v6962_v7 = vld [vmem:[%s8264_s18] sm:$0xff]  ;;  %vm309_vm3 = vcmask 261120   ;;  %vm300_vm4 = vcmask 254976   ;;  %s6751_s8 = smov 16  }
  0x80   :  { %5719 = vmatpush3.msk.msra.mxu1 %vm226_vm1, %v214_v1  ;;  %v5327_v8 = vld [vmem:[#allocation10] ss:$0 sm:$0xff]  ;;  %v6974_v12 = vld [vmem:[#allocation7] ss:$0 sm:$0xff]  ;;  %v6986_v14 = vld [vmem:[%s8256_s10 + $0x18] sm:$0xff]  ;;  %s6752_s9 = smov 24  }
  0x81   :  { %5720 = vmatprep.subr.mxu1 %v6749_v0  ;;  %481 = vrot.lane.b32.xlu1 %v6974_v12, %s6751_s8  ;;  %v6981_v13 = vld [vmem:[%s8256_s10 + $0x20] sm:$0xff]  ;;  %v6995_v15 = vld [vmem:[%s8256_s10 + $0x10] sm:$0xff]  ;;  %v7001_v16 = vld [vmem:[%s8256_s10 + $0x8] sm:$0xff]  ;;  %vm391_vm5 = vcmask 130048   ;;  %vm393_vm6 = vcmask 195584   ;;  %vm401_vm7 = vcmask 326656  }
  0x82   :  { %5721 = vmatpush3.msra.mxu1 %v213_v2  ;;  %5737 = vmatpush3.msra.mxu0 %v6981_v13  ;;  %v7009_v17 = vld [vmem:[%s8256_s10] sm:$0xff]  ;;  %v7021_v25 = vld [vmem:[#allocation16 + $0x8] sm:$0xff]  ;;  %v7023_v26 = vld [vmem:[#allocation16] sm:$0xff]  ;;  %s6753_s7 = smov 112   ;;  %s8296_s5 = smov 32   ;;  %vm1019_vm8 = vcmask 123904  }
  0x83   :  { %5723 = vmatmul.mubr.msk.f32.vlgmr.msra.gmra.mxu1 %vm222_vm2, %v212_v3  ;;  %5725 = vmatprep.subr.mxu1 %v6749_v0  ;;  %v383_v21 = vld [vmem:[#allocation5] sm:$0x3]  ;;  %v7029_v27 = vld [vmem:[#allocation14] ss:$0 sm:$0xff]  ;;  %v7039_v38 = vld [vmem:[%s8259_s13] ss:$0 sm:$0xff] }
  0x84   :  { %5726 = vmatpush3.msra.mxu1 %v6938_v4  ;;  %5733 = vmatprep.mubr.msk.f32.mxu1 %vm6750_vm0, %v6749_v0  ;;  %s6754_s11 = smov 116   ;;  %v7049_v44 = vld [vmem:[%s8262_s16 + $0x8] sm:$0xff]  ;;  %v7063_v46 = vld [vmem:[%s8262_s16] sm:$0xff]  ;;  %s6755_s12 = smov 96   ;;  %vm764_vm9 = vcmask 1045504   ;;  %vm1021_vm10 = vcmask 25600  }
  0x85   :  { %5727 = vmatprep.subr.mxu1 %v6749_v0  ;;  %5738 = vmatprep.subr.mxu0 %v6749_v0  ;;  %v7054_v45 = vld [vmem:[%s8260_s14 + $0x8] sm:$0xff]  ;;  %v7068_v47 = vld [vmem:[%s8260_s14] sm:$0xff]  ;;  %s6756_s28 = smov 6   ;;  %s8297_s26 = sld [smem:[#allocation37_spill]]  ;;  %vm747_vm11 = vcmask 31744   ;;  %vm752_vm12 = vcmask 48128  }
  0x86   :  { %5728 = vmatpush3.msra.mxu1 %v6944_v5  ;;  %5739 = vmatpush3.msra.mxu0 %v6986_v14  ;;  %v7129_v60 = vld [vmem:[%s8261_s15] ss:$0 sm:$0xff]  ;;  %s8298_s6 = sld [smem:[#allocation33_spill]]  ;;  %vm1024_vm13 = vcmask 41984   ;;  %vm760_vm14 = vcmask 310272   ;;  %s6757_s30 = smov 64  }
  0x87   :  { %5729 = vmatprep.subr.mxu1 %v6749_v0  ;;  %5740 = vmatprep.subr.mxu0 %v6749_v0  ;;  %v7134_v61 = vld [vmem:[%s8263_s17] ss:$0 sm:$0xff]  ;;  %s8299_s2 = sld [smem:[#allocation39_spill]]  ;;  %vm1026_vm15 = vcmask 58368   ;;  %s6759_s4 = smov [#allocation17]  }
  0x88   :  { %5730 = vmatpush3.msra.mxu1 %v6955_v6  ;;  %5741 = vmatpush3.msra.mxu0 %v6995_v15 }
  0x89   :  { %5731 = vmatprep.subr.mxu1 %v6749_v0  ;;  %5742 = vmatprep.subr.mxu0 %v6749_v0 }
  0x8a   :  { %5732 = vmatpush3.msra.mxu1 %v6962_v7  ;;  %5743 = vmatpush3.msra.mxu0 %v7001_v16 }
  0x8b   :  { %5749 = vmatprep.subr.mxu1 %v6749_v0  ;;  %5744 = vmatprep.subr.mxu0 %v6749_v0  ;;  %v7093_v55 = vld [vmem:[%s8297_s26 + $0x20] sm:$0x3f]  ;;  %v7101_v56 = vld [vmem:[%s8297_s26 + $0x18] sm:$0xff]  ;;  %v7108_v57 = vld [vmem:[%s8297_s26 + $0x10] sm:$0xff] }
  0x8c   :  { %5745 = vmatpush3.msra.mxu0 %v7009_v17  ;;  %v7113_v58 = vld [vmem:[%s8297_s26 + $0x8] sm:$0xff]  ;;  %v7120_v59 = vld [vmem:[%s8297_s26] sm:$0xff] }
  0x8d   :  { %5763 = vmatprep.subr.mxu0 %v6749_v0 }
  0xf3   :  { %v482_v34 = vpop.permute.xlu1 %481 }
 0x143   :  { %v296_v9 = vpop.f32.mrf.mxu1 }
 0x144   :  { %v6966_v10 = vadd.f32 %v5327_v8, %v296_v9 }
 0x145   :  { %v5724_v11 = vpop.f32.mrf.mxu1 }
 0x146   :  { %5734 = vmatmul.mubr.msk.f32.vlgmr.msra.gmra.mxu1 %vm309_vm3, %v6966_v10  ;;  %301 = vst.msk [vmem:[#allocation17] sm:$0x3] %vm300_vm4, %v6966_v10 }
 0x147   :  { %5753 = vmatprep.mubr.msk.f32.mxu1 %vm6750_vm0, %v6749_v0  ;;  %5750 = vmatpush3.msra.mxu1 %v7021_v25 }
 0x148   :  { %5751 = vmatprep.subr.mxu1 %v6749_v0 }
 0x149   :  { %5752 = vmatpush3.msra.mxu1 %v7023_v26 }
 0x14a   :  { %5756 = vmatprep.subr.mxu1 %v6749_v0 }
 0x206   :  { %v379_v18 = vpop.f32.mrf.mxu1 }
 0x207   :  { %385 = vrot.lane.b32.xlu0 %v379_v18, %s6751_s8 }
 0x208   :  { %v5735_v19 = vpop.f32.mrf.mxu1 }
 0x20b   :  { %388 = vrot.lane.b32.xlu0 %v6974_v12, %s6752_s9 }
 0x279   :  { %v386_v20 = vpop.permute.xlu0 %385 }
 0x27a   :  { %v392_v22 = vsel %vm391_vm5, %v383_v21, %v386_v20 }
 0x27d   :  { %v389_v23 = vpop.permute.xlu0 %388 }
 0x27e   :  { %v394_v24 = vsel %vm393_vm6, %v392_v22, %v389_v23 }
 0x27f   :  { %5747 = vmatmul.mubr.msk.f32.vlgmr.msra.gmra.mxu0 %vm401_vm7, %v394_v24 }
 0x280   :  { %5767 = vmatprep.mubr.msk.f32.mxu0 %vm6750_vm0, %v6749_v0  ;;  %5764 = vmatpush3.msra.mxu0 %v7049_v44 }
 0x281   :  { %5765 = vmatprep.subr.mxu0 %v6749_v0 }
 0x282   :  { %5766 = vmatpush3.msra.mxu0 %v7063_v46 }
 0x283   :  { %5783 = vmatprep.subr.mxu0 %v6749_v0 }
 0x33f   :  { %v471_v28 = vpop.f32.mrf.mxu0 }
 0x340   :  { %v472_v29 = vadd.f32 %v7029_v27, %v471_v28  ;;  %v7171_v28 = vld [vmem:[%s8299_s2 + $0x18] sm:$0xff] }
 0x341   :  { %v5748_v30 = vpop.f32.mrf.mxu0 }
 0x342   :  { %v5334_v31 = vmul.f32 -1.442695, %v472_v29  ;;  %v7183_v30 = vld [vmem:[%s8299_s2 + $0x8] sm:$0xff] }
 0x344   :  { %6314 = vpow2.f32 %v5334_v31  ;;  %v7190_v31 = vld [vmem:[%s8299_s2] sm:$0xff] }
 0x351   :  { %v6315_v32 = vpop.eup %6314 }
 0x352   :  { %v478_v33 = vadd.f32 1.0, %v6315_v32  ;;  %v7196_v32 = vld [vmem:[#allocation11] ss:$0 sm:$0xff] }
 0x354   :  { %6316 = vrcp.f32 %v478_v33 }
 0x361   :  { %v6317_v35 = vpop.eup %6316 }
 0x362   :  { %v484_v36 = vmul.f32 %v6317_v35, %v482_v34  ;;  %v573_v49 = vsub.f32 1.0, %v6317_v35  ;;  %v572_v51 = vmul.f32 %v6317_v35, %v6974_v12  ;;  %v740_v12 = vld [vmem:[%s8298_s6] sm:$0x3] }
 0x364   :  { %492 = vrot.lane.b32.xlu1 %v484_v36, %s6753_s7 }
 0x3d6   :  { %v493_v37 = vpop.permute.xlu1 %492 }
 0x3d7   :  { %5754 = vmatmul.mubr.msk.f32.vlgmr.msra.gmra.mxu1 %vm391_vm5, %v493_v37 }
 0x3d8   :  { %5760 = vmatprep.mubr.msk.f32.mxu1 %vm6750_vm0, %v6749_v0  ;;  %5757 = vmatpush3.msra.mxu1 %v7054_v45 }
 0x3d9   :  { %5758 = vmatprep.subr.mxu1 %v6749_v0 }
 0x3da   :  { %5759 = vmatpush3.msra.mxu1 %v7068_v47 }
 0x3db   :  { %5770 = vmatprep.subr.mxu1 %v6749_v0 }
 0x497   :  { %v562_v39 = vpop.f32.mrf.mxu1 }
 0x498   :  { %v563_v40 = vadd.f32 %v7039_v38, %v562_v39 }
 0x499   :  { %v5755_v41 = vpop.f32.mrf.mxu1 }
 0x49a   :  { %567 = vrot.lane.b32.xlu0 %v563_v40, %s8296_s5 }
 0x49e   :  { %744 = vrot.lane.b32.xlu0 %v383_v21, %s6754_s11 }
 0x4a2   :  { %844 = vrot.lane.b32.xlu0 %v6966_v10, %s8296_s5 }
 0x50c   :  { %v568_v42 = vpop.permute.xlu0 %567 }
 0x50d   :  { %v570_v43 = vadd.f32 %v568_v42, %v472_v29  ;;  %v7176_v29 = vld [vmem:[%s8299_s2 + $0x10] sm:$0xff] }
 0x50f   :  { %6318 = vtanh.f32 %v570_v43 }
 0x510   :  { %v745_v21 = vpop.permute.xlu0 %744 }
 0x514   :  { %v845_v41 = vpop.permute.xlu0 %844 }
 0x51c   :  { %v6319_v48 = vpop.eup %6318 }
 0x51d   :  { %575 = vrot.lane.b32.xlu1 %v6319_v48, %s6755_s12  ;;  %v7211_v48 = vld [vmem:[#allocation13] ss:$0 sm:$0xff] }
 0x521   :  { %749 = vrot.lane.b32.xlu1 %v6966_v10, %s6756_s28 }
 0x58f   :  { %v576_v50 = vpop.permute.xlu1 %575 }
 0x590   :  { %v578_v52 = vmul.f32 %v576_v50, %v573_v49 }
 0x592   :  { %v579_v53 = vadd.f32 %v578_v52, %v572_v51 }
 0x593   :  { %v750_v22 = vpop.permute.xlu1 %749 }
 0x594   :  { %v7078_v54 = vclamps-f32 %v579_v53, 5.0 }
 0x596   :  { %1020 = vst.msk [vmem:[#allocation20] sm:$0x3] %vm1019_vm8, %v7078_v54  ;;  %5761 = vmatmul.mubr.msk.f32.vlgmr.msra.gmra.mxu1 %vm391_vm5, %v7078_v54  ;;  %5768 = vmatmul.mubr.msk.f32.vlgmr.msra.gmra.mxu0 %vm391_vm5, %v7078_v54 }
 0x597   :  { %5780 = vmatprep.mubr.msk.f32.mxu1 %vm6750_vm0, %v6749_v0  ;;  %5791 = vmatprep.mubr.msk.f32.mxu0 %vm6750_vm0, %v6749_v0 }
 0x598   :  { %5771 = vmatpush3.msk.msra.mxu1 %vm764_vm9, %v7093_v55  ;;  %5784 = vmatpush3.msra.mxu0 %v7171_v28 }
 0x599   :  { %5772 = vmatprep.subr.mxu1 %v6749_v0  ;;  %5785 = vmatprep.subr.mxu0 %v6749_v0 }
 0x59a   :  { %5773 = vmatpush3.msra.mxu1 %v7101_v56  ;;  %5786 = vmatpush3.msra.mxu0 %v7176_v29 }
 0x59b   :  { %5774 = vmatprep.subr.mxu1 %v6749_v0  ;;  %5787 = vmatprep.subr.mxu0 %v6749_v0 }
 0x59c   :  { %5775 = vmatpush3.msra.mxu1 %v7108_v57  ;;  %5788 = vmatpush3.msra.mxu0 %v7183_v30 }
 0x59d   :  { %5776 = vmatprep.subr.mxu1 %v6749_v0  ;;  %5789 = vmatprep.subr.mxu0 %v6749_v0 }
 0x59e   :  { %5777 = vmatpush3.msra.mxu1 %v7113_v58  ;;  %5790 = vmatpush3.msra.mxu0 %v7190_v31 }
 0x59f   :  { %5778 = vmatprep.subr.mxu1 %v6749_v0  ;;  %5794 = vmatprep.subr.mxu0 %v6749_v0 }
 0x5a0   :  { %5779 = vmatpush3.msra.mxu1 %v7120_v59 }
 0x5a1   :  { %5805 = vmatprep.subr.mxu1 %v6749_v0 }
 0x656   :  { %v657_v62 = vpop.f32.mrf.mxu1  ;;  %v733_v63 = vpop.f32.mrf.mxu0 }
 0x657   :  { %v658_v1 = vadd.f32 %v7129_v60, %v657_v62  ;;  %v734_v2 = vadd.f32 %v7134_v61, %v733_v63 }
 0x658   :  { %v5762_v3 = vpop.f32.mrf.mxu1  ;;  %v5769_v8 = vpop.f32.mrf.mxu0 }
 0x659   :  { %1022 = vst.msk [vmem:[%s8268_s22] sm:$0x3] %vm1021_vm10, %v658_v1  ;;  %v737_v9 = vmul.f32 0.5, %v734_v2 }
 0x65b   :  { %v738_v11 = vmul.f32 1.442695, %v737_v9 }
 0x65d   :  { %6320 = vpow2.f32 %v738_v11 }
 0x66a   :  { %v6321_v18 = vpop.eup %6320 }
 0x66b   :  { %1023 = vst.msk [vmem:[%s8269_s23] sm:$0x3] %vm1021_vm10, %v6321_v18  ;;  %v741_v19 = vmul.f32 %v6321_v18, %v740_v12  ;;  %v1029_v12 = vld [vmem:[#allocation5 + $0x2] sm:$0x3] }
 0x66d   :  { %v742_v20 = vadd.f32 %v741_v19, %v658_v1 }
 0x66f   :  { %v748_v23 = vsel %vm747_vm11, %v742_v20, %v745_v21 }
 0x670   :  { %v753_v24 = vsel %vm752_vm12, %v748_v23, %v750_v22  ;;  %1025 = vst.msk [vmem:[%s8270_s24] sm:$0x3] %vm1024_vm13, %v748_v23 }
 0x671   :  { %5781 = vmatmul.mubr.msk.f32.vlgmr.msra.gmra.mxu1 %vm760_vm14, %v753_v24 }
 0x672   :  { %5806 = vmatpush3.msra.mxu1 %v6981_v13  ;;  %5815 = vmatprep.mubr.msk.f32.mxu1 %vm6750_vm0, %v6749_v0 }
 0x673   :  { %5807 = vmatprep.subr.mxu1 %v6749_v0 }
 0x674   :  { %5808 = vmatpush3.msra.mxu1 %v6986_v14 }
 0x675   :  { %5809 = vmatprep.subr.mxu1 %v6749_v0 }
 0x676   :  { %5810 = vmatpush3.msra.mxu1 %v6995_v15 }
 0x677   :  { %5811 = vmatprep.subr.mxu1 %v6749_v0 }
 0x678   :  { %5812 = vmatpush3.msra.mxu1 %v7001_v16 }
 0x679   :  { %5813 = vmatprep.subr.mxu1 %v6749_v0 }
 0x67a   :  { %5814 = vmatpush3.msra.mxu1 %v7009_v17 }
 0x67b   :  { %5825 = vmatprep.subr.mxu1 %v6749_v0 }
 0x731   :  { %v834_v33 = vpop.f32.mrf.mxu1 }
 0x732   :  { %v835_v34 = vadd.f32 %v7196_v32, %v834_v33 }
 0x733   :  { %v5782_v35 = vpop.f32.mrf.mxu1 }
 0x734   :  { %v5345_v36 = vmul.f32 -1.442695, %v835_v34 }
 0x736   :  { %6322 = vpow2.f32 %v5345_v36 }
 0x743   :  { %v6323_v37 = vpop.eup %6322 }
 0x744   :  { %v841_v39 = vadd.f32 1.0, %v6323_v37 }
 0x746   :  { %6324 = vrcp.f32 %v841_v39 }
 0x753   :  { %v6325_v40 = vpop.eup %6324 }
 0x754   :  { %v847_v42 = vmul.f32 %v6325_v40, %v845_v41  ;;  %v936_v63 = vsub.f32 1.0, %v6325_v40  ;;  %v935_v2 = vmul.f32 %v6325_v40, %v6966_v10 }
 0x756   :  { %855 = vrot.lane.b32.xlu1 %v847_v42, %s6755_s12 }
 0x7c8   :  { %v856_v43 = vpop.permute.xlu1 %855 }
 0x7c9   :  { %5792 = vmatmul.mubr.msk.f32.vlgmr.msra.gmra.mxu0 %vm309_vm3, %v856_v43 }
 0x7ca   :  { %5795 = vmatpush3.msra.mxu0 %v6938_v4  ;;  %5802 = vmatprep.mubr.msk.f32.mxu0 %vm6750_vm0, %v6749_v0 }
 0x7cb   :  { %5796 = vmatprep.subr.mxu0 %v6749_v0 }
 0x7cc   :  { %5797 = vmatpush3.msra.mxu0 %v6944_v5 }
 0x7cd   :  { %5798 = vmatprep.subr.mxu0 %v6749_v0 }
 0x7ce   :  { %5799 = vmatpush3.msra.mxu0 %v6955_v6 }
 0x7cf   :  { %5800 = vmatprep.subr.mxu0 %v6749_v0 }
 0x7d0   :  { %5801 = vmatpush3.msra.mxu0 %v6962_v7 }
 0x7d1   :  { %5818 = vmatprep.subr.mxu0 %v6749_v0 }
 0x889   :  { %v925_v49 = vpop.f32.mrf.mxu0 }
 0x88a   :  { %v926_v50 = vadd.f32 %v7211_v48, %v925_v49 }
 0x88b   :  { %v5793_v51 = vpop.f32.mrf.mxu0 }
 0x88c   :  { %930 = vrot.lane.b32.xlu0 %v926_v50, %s6757_s30 }
 0x8fe   :  { %v931_v52 = vpop.permute.xlu0 %930 }
 0x8ff   :  { %v933_v53 = vadd.f32 %v931_v52, %v835_v34 }
 0x901   :  { %6326 = vtanh.f32 %v933_v53 }
 0x90e   :  { %v6327_v62 = vpop.eup %6326 }
 0x90f   :  { %938 = vrot.lane.b32.xlu1 %v6327_v62, %s6757_s30 }
 0x913   :  { %1034 = vrot.lane.b32.xlu1 %v7078_v54, %s6752_s9 }
 0x981   :  { %v939_v1 = vpop.permute.xlu1 %938 }
 0x982   :  { %v941_v3 = vmul.f32 %v939_v1, %v936_v63 }
 0x984   :  { %v942_v8 = vadd.f32 %v941_v3, %v935_v2 }
 0x985   :  { %v1035_v19 = vpop.permute.xlu1 %1034 }
 0x986   :  { %v7219_v9 = vclamps-f32 %v942_v8, 5.0 }
 0x988   :  { %1018 = vst.msk [vmem:[#allocation18] sm:$0x3] %vm300_vm4, %v7219_v9  ;;  %5803 = vmatmul.mubr.msk.f32.vlgmr.msra.gmra.mxu0 %vm309_vm3, %v7219_v9 }
 0x989   :  { %5819 = vmatpush3.msra.mxu0 %v7021_v25  ;;  %5822 = vmatprep.mubr.msk.f32.mxu0 %vm6750_vm0, %v6749_v0 }
 0x98a   :  { %5820 = vmatprep.subr.mxu0 %v6749_v0 }
 0x98b   :  { %5821 = vmatpush3.msra.mxu0 %v7023_v26 }
 0x98c   :  { %5832 = vmatprep.subr.mxu0 %v6749_v0 }
 0xa48   :  { %v1014_v10 = vpop.f32.mrf.mxu0 }
 0xa49   :  { %1027 = vst.msk [vmem:[#allocation21] sm:$0x3] %vm1026_vm15, %v1014_v10  ;;  %1031 = vrot.lane.b32.xlu0 %v1014_v10, %s6751_s8 }
 0xa4a   :  { %v5804_v11 = vpop.f32.mrf.mxu0 }
 0xa4d   :  { %1118 = vrot.lane.b32.xlu0 %v7078_v54, %s6751_s8 }
 0xabb   :  { %v1032_v18 = vpop.permute.xlu0 %1031 }
 0xabc   :  { %v1037_v20 = vsel %vm391_vm5, %v1029_v12, %v1032_v18 }
 0xabd   :  { %v1038_v21 = vsel %vm393_vm6, %v1037_v20, %v1035_v19  ;;  %v5356_v20 = vld [vmem:[%s8298_s6 + $0x2] sm:$0x3] }
 0xabe   :  { %5816 = vmatmul.mubr.msk.f32.vlgmr.msra.gmra.mxu1 %vm401_vm7, %v1038_v21 }
 0xabf   :  { %5826 = vmatpush3.msra.mxu1 %v7054_v45  ;;  %5829 = vmatprep.mubr.msk.f32.mxu1 %vm6750_vm0, %v6749_v0  ;;  %v1119_v37 = vpop.permute.xlu0 %1118 }
 0xac0   :  { %5827 = vmatprep.subr.mxu1 %v6749_v0 }
 0xac1   :  { %5828 = vmatpush3.msra.mxu1 %v7068_v47 }
 0xac2   :  { %5839 = vmatprep.subr.mxu1 %v6749_v0 }
 0xb7e   :  { %v1108_v22 = vpop.f32.mrf.mxu1 }
 0xb7f   :  { %v1109_v23 = vadd.f32 %v7029_v27, %v1108_v22 }
 0xb80   :  { %v5817_v24 = vpop.f32.mrf.mxu1 }
 0xb81   :  { %v5351_v33 = vmul.f32 -1.442695, %v1109_v23 }
 0xb83   :  { %6328 = vpow2.f32 %v5351_v33 }
 0xb90   :  { %v6329_v34 = vpop.eup %6328 }
 0xb91   :  { %v1115_v35 = vadd.f32 1.0, %v6329_v34 }
 0xb93   :  { %6330 = vrcp.f32 %v1115_v35 }
 0xba0   :  { %v6331_v36 = vpop.eup %6330 }
 0xba1   :  { %v1121_v39 = vmul.f32 %v6331_v36, %v1119_v37  ;;  %v1204_v52 = vsub.f32 1.0, %v6331_v36  ;;  %v1203_v62 = vmul.f32 %v6331_v36, %v7078_v54 }
 0xba3   :  { %1123 = vrot.lane.b32.xlu1 %v1121_v39, %s6753_s7 }
 0xc15   :  { %v1124_v40 = vpop.permute.xlu1 %1123 }
 0xc16   :  { %5823 = vmatmul.mubr.msk.f32.vlgmr.msra.gmra.mxu0 %vm391_vm5, %v1124_v40 }
 0xc17   :  { %5833 = vmatpush3.msra.mxu0 %v7049_v44  ;;  %5836 = vmatprep.mubr.msk.f32.mxu0 %vm6750_vm0, %v6749_v0 }
 0xc18   :  { %5834 = vmatprep.subr.mxu0 %v6749_v0 }
 0xc19   :  { %5835 = vmatpush3.msra.mxu0 %v7063_v46 }
 0xc1a   :  { %5852 = vmatprep.subr.mxu0 %v6749_v0 }
 0xcd6   :  { %v1193_v41 = vpop.f32.mrf.mxu0 }
 0xcd7   :  { %v1194_v42 = vadd.f32 %v7039_v38, %v1193_v41 }
 0xcd8   :  { %v5824_v43 = vpop.f32.mrf.mxu0 }
 0xcd9   :  { %1198 = vrot.lane.b32.xlu0 %v1194_v42, %s8296_s5 }
 0xcdd   :  { %1364 = vrot.lane.b32.xlu0 %v1029_v12, %s6754_s11 }
 0xce1   :  { %1451 = vrot.lane.b32.xlu0 %v7219_v9, %s8296_s5 }
 0xd4b   :  { %v1199_v49 = vpop.permute.xlu0 %1198 }
 0xd4c   :  { %v1201_v50 = vadd.f32 %v1199_v49, %v1109_v23 }
 0xd4e   :  { %6332 = vtanh.f32 %v1201_v50 }
 0xd4f   :  { %v1365_v24 = vpop.permute.xlu0 %1364 }
 0xd53   :  { %v1452_v49 = vpop.permute.xlu0 %1451 }
 0xd5b   :  { %v6333_v51 = vpop.eup %6332 }
 0xd5c   :  { %1206 = vrot.lane.b32.xlu1 %v6333_v51, %s6755_s12 }
 0xd60   :  { %1368 = vrot.lane.b32.xlu1 %v7219_v9, %s6756_s28 }
 0xdce   :  { %v1207_v53 = vpop.permute.xlu1 %1206 }
 0xdcf   :  { %v1209_v63 = vmul.f32 %v1207_v53, %v1204_v52 }
 0xdd1   :  { %v1210_v1 = vadd.f32 %v1209_v63, %v1203_v62 }
 0xdd2   :  { %v1369_v33 = vpop.permute.xlu1 %1368 }
 0xdd3   :  { %v7262_v2 = vclamps-f32 %v1210_v1, 5.0 }
 0xdd5   :  { %1622 = vst.msk [vmem:[#allocation20 + $0x2] sm:$0x3] %vm1019_vm8, %v7262_v2  ;;  %5830 = vmatmul.mubr.msk.f32.vlgmr.msra.gmra.mxu1 %vm391_vm5, %v7262_v2  ;;  %5837 = vmatmul.mubr.msk.f32.vlgmr.msra.gmra.mxu0 %vm391_vm5, %v7262_v2 }
 0xdd6   :  { %5840 = vmatpush3.msk.msra.mxu1 %vm764_vm9, %v7093_v55  ;;  %5849 = vmatprep.mubr.msk.f32.mxu1 %vm6750_vm0, %v6749_v0 }
 0xdd7   :  { %5841 = vmatprep.subr.mxu1 %v6749_v0  ;;  %5853 = vmatpush3.msra.mxu0 %v7171_v28 }
 0xdd8   :  { %5842 = vmatpush3.msra.mxu1 %v7101_v56  ;;  %5854 = vmatprep.subr.mxu0 %v6749_v0 }
 0xdd9   :  { %5843 = vmatprep.subr.mxu1 %v6749_v0  ;;  %5855 = vmatpush3.msra.mxu0 %v7176_v29 }
 0xdda   :  { %5844 = vmatpush3.msra.mxu1 %v7108_v57  ;;  %5856 = vmatprep.subr.mxu0 %v6749_v0 }
 0xddb   :  { %5845 = vmatprep.subr.mxu1 %v6749_v0  ;;  %5857 = vmatpush3.msra.mxu0 %v7183_v30 }
 0xddc   :  { %5846 = vmatpush3.msra.mxu1 %v7113_v58  ;;  %5858 = vmatprep.subr.mxu0 %v6749_v0 }
 0xddd   :  { %5847 = vmatprep.subr.mxu1 %v6749_v0  ;;  %5859 = vmatpush3.msra.mxu0 %v7190_v31 }
 0xdde   :  { %5848 = vmatpush3.msra.mxu1 %v7120_v59  ;;  %5860 = vmatprep.mubr.msk.f32.mxu0 %vm6750_vm0, %v6749_v0 }
 0xddf   :  { %5863 = vmatprep.subr.mxu0 %v6749_v0  ;;  %5874 = vmatprep.subr.mxu1 %v6749_v0 }
 0xe95   :  { %v1282_v54 = vpop.f32.mrf.mxu1  ;;  %v1352_v3 = vpop.f32.mrf.mxu0 }
 0xe96   :  { %v1283_v8 = vadd.f32 %v7129_v60, %v1282_v54  ;;  %v1353_v10 = vadd.f32 %v7134_v61, %v1352_v3 }
 0xe97   :  { %v5831_v11 = vpop.f32.mrf.mxu1  ;;  %v5838_v12 = vpop.f32.mrf.mxu0 }
 0xe98   :  { %5363 = vst.msk [vmem:[%s8268_s22 + $0x2] sm:$0x3] %vm1021_vm10, %v1283_v8  ;;  %v1356_v18 = vmul.f32 0.5, %v1353_v10 }
 0xe9a   :  { %v1357_v19 = vmul.f32 1.442695, %v1356_v18  ;;  %v1632_v18 = vld [vmem:[#allocation5 + $0x4] sm:$0x3] }
 0xe9c   :  { %6334 = vpow2.f32 %v1357_v19 }
 0xea9   :  { %v6335_v21 = vpop.eup %6334 }
 0xeaa   :  { %5364 = vst.msk [vmem:[%s8269_s23 + $0x2] sm:$0x3] %vm1021_vm10, %v6335_v21  ;;  %v1361_v22 = vmul.f32 %v6335_v21, %v5356_v20 }
 0xeac   :  { %v1362_v23 = vadd.f32 %v1361_v22, %v1283_v8 }
 0xeae   :  { %v1367_v34 = vsel %vm747_vm11, %v1362_v23, %v1365_v24 }
 0xeaf   :  { %v1371_v35 = vsel %vm752_vm12, %v1367_v34, %v1369_v33  ;;  %5365 = vst.msk [vmem:[%s8270_s24 + $0x2] sm:$0x3] %vm1024_vm13, %v1367_v34 }
 0xeb0   :  { %5850 = vmatmul.mubr.msk.f32.vlgmr.msra.gmra.mxu1 %vm760_vm14, %v1371_v35 }
 0xeb1   :  { %5875 = vmatpush3.msra.mxu1 %v6981_v13  ;;  %5884 = vmatprep.mubr.msk.f32.mxu1 %vm6750_vm0, %v6749_v0 }
 0xeb2   :  { %5876 = vmatprep.subr.mxu1 %v6749_v0 }
 0xeb3   :  { %5877 = vmatpush3.msra.mxu1 %v6986_v14 }
 0xeb4   :  { %5878 = vmatprep.subr.mxu1 %v6749_v0 }
 0xeb5   :  { %5879 = vmatpush3.msra.mxu1 %v6995_v15 }
 0xeb6   :  { %5880 = vmatprep.subr.mxu1 %v6749_v0 }
 0xeb7   :  { %5881 = vmatpush3.msra.mxu1 %v7001_v16 }
 0xeb8   :  { %5882 = vmatprep.subr.mxu1 %v6749_v0 }
 0xeb9   :  { %5883 = vmatpush3.msra.mxu1 %v7009_v17 }
 0xeba   :  { %5894 = vmatprep.subr.mxu1 %v6749_v0 }
 0xf70   :  { %v1441_v36 = vpop.f32.mrf.mxu1 }
 0xf71   :  { %v1442_v37 = vadd.f32 %v7196_v32, %v1441_v36 }
 0xf72   :  { %v5851_v39 = vpop.f32.mrf.mxu1 }
 0xf73   :  { %v5359_v40 = vmul.f32 -1.442695, %v1442_v37 }
 0xf75   :  { %6336 = vpow2.f32 %v5359_v40 }
 0xf82   :  { %v6337_v41 = vpop.eup %6336 }
 0xf83   :  { %v1448_v42 = vadd.f32 1.0, %v6337_v41 }
 0xf85   :  { %6338 = vrcp.f32 %v1448_v42 }
 0xf92   :  { %v6339_v43 = vpop.eup %6338 }
 0xf93   :  { %v1454_v50 = vmul.f32 %v6339_v43, %v1452_v49  ;;  %v1537_v1 = vsub.f32 1.0, %v6339_v43  ;;  %v1536_v3 = vmul.f32 %v6339_v43, %v7219_v9 }
 0xf95   :  { %1456 = vrot.lane.b32.xlu1 %v1454_v50, %s6755_s12 }
0x1007   :  { %v1457_v51 = vpop.permute.xlu1 %1456 }
0x1008   :  { %5861 = vmatmul.mubr.msk.f32.vlgmr.msra.gmra.mxu0 %vm309_vm3, %v1457_v51 }
0x1009   :  { %5864 = vmatpush3.msra.mxu0 %v6938_v4  ;;  %5871 = vmatprep.mubr.msk.f32.mxu0 %vm6750_vm0, %v6749_v0 }
0x100a   :  { %5865 = vmatprep.subr.mxu0 %v6749_v0 }
0x100b   :  { %5866 = vmatpush3.msra.mxu0 %v6944_v5 }
0x100c   :  { %5867 = vmatprep.subr.mxu0 %v6749_v0 }
0x100d   :  { %5868 = vmatpush3.msra.mxu0 %v6955_v6 }
0x100e   :  { %5869 = vmatprep.subr.mxu0 %v6749_v0 }
0x100f   :  { %5870 = vmatpush3.msra.mxu0 %v6962_v7 }
0x1010   :  { %5887 = vmatprep.subr.mxu0 %v6749_v0 }
0x10c8   :  { %v1526_v52 = vpop.f32.mrf.mxu0 }
0x10c9   :  { %v1527_v4 = vadd.f32 %v7211_v48, %v1526_v52 }
0x10ca   :  { %v5862_v53 = vpop.f32.mrf.mxu0 }
0x10cb   :  { %1531 = vrot.lane.b32.xlu0 %v1527_v4, %s6757_s30 }
0x113d   :  { %v1532_v62 = vpop.permute.xlu0 %1531 }
0x113e   :  { %v1534_v63 = vadd.f32 %v1532_v62, %v1442_v37 }
0x1140   :  { %6340 = vtanh.f32 %v1534_v63 }
0x114d   :  { %v6341_v5 = vpop.eup %6340 }
0x114e   :  { %1539 = vrot.lane.b32.xlu1 %v6341_v5, %s6757_s30 }
0x1152   :  { %1637 = vrot.lane.b32.xlu1 %v7262_v2, %s6752_s9 }
0x11c0   :  { %v1540_v54 = vpop.permute.xlu1 %1539 }
0x11c1   :  { %v1542_v8 = vmul.f32 %v1540_v54, %v1537_v1 }
0x11c3   :  { %v1543_v10 = vadd.f32 %v1542_v8, %v1536_v3 }
0x11c4   :  { %v1638_v20 = vpop.permute.xlu1 %1637 }
0x11c5   :  { %v7344_v11 = vclamps-f32 %v1543_v10, 5.0 }
0x11c7   :  { %1620 = vst.msk [vmem:[#allocation18 + $0x2] sm:$0x3] %vm300_vm4, %v7344_v11  ;;  %5872 = vmatmul.mubr.msk.f32.vlgmr.msra.gmra.mxu0 %vm309_vm3, %v7344_v11 }
0x11c8   :  { %5888 = vmatpush3.msra.mxu0 %v7021_v25  ;;  %5891 = vmatprep.mubr.msk.f32.mxu0 %vm6750_vm0, %v6749_v0 }
0x11c9   :  { %5889 = vmatprep.subr.mxu0 %v6749_v0 }
0x11ca   :  { %5890 = vmatpush3.msra.mxu0 %v7023_v26 }
0x11cb   :  { %5901 = vmatprep.subr.mxu0 %v6749_v0 }
0x1287   :  { %v1615_v9 = vpop.f32.mrf.mxu0 }
0x1288   :  { %1630 = vst.msk [vmem:[#allocation21 + $0x2] sm:$0x3] %vm1026_vm15, %v1615_v9  ;;  %1634 = vrot.lane.b32.xlu0 %v1615_v9, %s6751_s8 }
0x1289   :  { %v5873_v12 = vpop.f32.mrf.mxu0 }
0x128c   :  { %1721 = vrot.lane.b32.xlu0 %v7262_v2, %s6751_s8 }
0x12fa   :  { %v1635_v19 = vpop.permute.xlu0 %1634 }
0x12fb   :  { %v1640_v21 = vsel %vm391_vm5, %v1632_v18, %v1635_v19  ;;  %v5372_v19 = vld [vmem:[%s8298_s6 + $0x4] sm:$0x3] }
0x12fc   :  { %v1641_v22 = vsel %vm393_vm6, %v1640_v21, %v1638_v20 }
0x12fd   :  { %5885 = vmatmul.mubr.msk.f32.vlgmr.msra.gmra.mxu1 %vm401_vm7, %v1641_v22 }
0x12fe   :  { %5895 = vmatpush3.msra.mxu1 %v7054_v45  ;;  %5898 = vmatprep.mubr.msk.f32.mxu1 %vm6750_vm0, %v6749_v0  ;;  %v1722_v39 = vpop.permute.xlu0 %1721 }
0x12ff   :  { %5896 = vmatprep.subr.mxu1 %v6749_v0 }
0x1300   :  { %5897 = vmatpush3.msra.mxu1 %v7068_v47 }
0x1301   :  { %5908 = vmatprep.subr.mxu1 %v6749_v0 }
0x13bd   :  { %v1711_v23 = vpop.f32.mrf.mxu1 }
0x13be   :  { %v1712_v24 = vadd.f32 %v7029_v27, %v1711_v23 }
0x13bf   :  { %v5886_v33 = vpop.f32.mrf.mxu1 }
0x13c0   :  { %v5367_v34 = vmul.f32 -1.442695, %v1712_v24 }
0x13c2   :  { %6342 = vpow2.f32 %v5367_v34 }
0x13cf   :  { %v6343_v35 = vpop.eup %6342 }
0x13d0   :  { %v1718_v36 = vadd.f32 1.0, %v6343_v35 }
0x13d2   :  { %6344 = vrcp.f32 %v1718_v36 }
0x13df   :  { %v6345_v37 = vpop.eup %6344 }
0x13e0   :  { %v1724_v40 = vmul.f32 %v6345_v37, %v1722_v39  ;;  %v1807_v4 = vsub.f32 1.0, %v6345_v37  ;;  %v1806_v62 = vmul.f32 %v6345_v37, %v7262_v2 }
0x13e2   :  { %1726 = vrot.lane.b32.xlu1 %v1724_v40, %s6753_s7 }
0x1454   :  { %v1727_v41 = vpop.permute.xlu1 %1726 }
0x1455   :  { %5892 = vmatmul.mubr.msk.f32.vlgmr.msra.gmra.mxu0 %vm391_vm5, %v1727_v41 }
0x1456   :  { %5902 = vmatpush3.msra.mxu0 %v7049_v44  ;;  %5905 = vmatprep.mubr.msk.f32.mxu0 %vm6750_vm0, %v6749_v0 }
0x1457   :  { %5903 = vmatprep.subr.mxu0 %v6749_v0 }
0x1458   :  { %5904 = vmatpush3.msra.mxu0 %v7063_v46 }
0x1459   :  { %5921 = vmatprep.subr.mxu0 %v6749_v0 }
0x1515   :  { %v1796_v42 = vpop.f32.mrf.mxu0 }
0x1516   :  { %v1797_v43 = vadd.f32 %v7039_v38, %v1796_v42  ;;  %v7465_v42 = vld [vmem:[%s8264_s18 + $0x10] sm:$0xff] }
0x1517   :  { %v5893_v49 = vpop.f32.mrf.mxu0 }
0x1518   :  { %1801 = vrot.lane.b32.xlu0 %v1797_v43, %s8296_s5 }
0x151c   :  { %1967 = vrot.lane.b32.xlu0 %v1632_v18, %s6754_s11 }
0x1520   :  { %2054 = vrot.lane.b32.xlu0 %v7344_v11, %s8296_s5 }
0x158a   :  { %v1802_v50 = vpop.permute.xlu0 %1801 }
0x158b   :  { %v1804_v51 = vadd.f32 %v1802_v50, %v1712_v24 }
0x158d   :  { %6346 = vtanh.f32 %v1804_v51 }
0x158e   :  { %v1968_v23 = vpop.permute.xlu0 %1967 }
0x1592   :  { %v2055_v40 = vpop.permute.xlu0 %2054 }
0x159a   :  { %v6347_v52 = vpop.eup %6346 }
0x159b   :  { %1809 = vrot.lane.b32.xlu1 %v6347_v52, %s6755_s12 }
0x159f   :  { %1971 = vrot.lane.b32.xlu1 %v7344_v11, %s6756_s28 }
0x160d   :  { %v1810_v53 = vpop.permute.xlu1 %1809 }
0x160e   :  { %v1812_v63 = vmul.f32 %v1810_v53, %v1807_v4 }
0x1610   :  { %v1813_v5 = vadd.f32 %v1812_v63, %v1806_v62 }
0x1611   :  { %v1972_v24 = vpop.permute.xlu1 %1971 }
0x1612   :  { %v7387_v1 = vclamps-f32 %v1813_v5, 5.0 }
0x1614   :  { %2225 = vst.msk [vmem:[#allocation20 + $0x4] sm:$0x3] %vm1019_vm8, %v7387_v1  ;;  %5899 = vmatmul.mubr.msk.f32.vlgmr.msra.gmra.mxu1 %vm391_vm5, %v7387_v1  ;;  %5906 = vmatmul.mubr.msk.f32.vlgmr.msra.gmra.mxu0 %vm391_vm5, %v7387_v1 }
0x1615   :  { %5909 = vmatpush3.msk.msra.mxu1 %vm764_vm9, %v7093_v55  ;;  %5918 = vmatprep.mubr.msk.f32.mxu1 %vm6750_vm0, %v6749_v0 }
0x1616   :  { %5910 = vmatprep.subr.mxu1 %v6749_v0  ;;  %5922 = vmatpush3.msra.mxu0 %v7171_v28 }
0x1617   :  { %5911 = vmatpush3.msra.mxu1 %v7101_v56  ;;  %5923 = vmatprep.subr.mxu0 %v6749_v0 }
0x1618   :  { %5912 = vmatprep.subr.mxu1 %v6749_v0  ;;  %5924 = vmatpush3.msra.mxu0 %v7176_v29 }
0x1619   :  { %5913 = vmatpush3.msra.mxu1 %v7108_v57  ;;  %5925 = vmatprep.subr.mxu0 %v6749_v0 }
0x161a   :  { %5914 = vmatprep.subr.mxu1 %v6749_v0  ;;  %5926 = vmatpush3.msra.mxu0 %v7183_v30 }
0x161b   :  { %5915 = vmatpush3.msra.mxu1 %v7113_v58  ;;  %5927 = vmatprep.subr.mxu0 %v6749_v0 }
0x161c   :  { %5916 = vmatprep.subr.mxu1 %v6749_v0  ;;  %5928 = vmatpush3.msra.mxu0 %v7190_v31 }
0x161d   :  { %5917 = vmatpush3.msra.mxu1 %v7120_v59  ;;  %5929 = vmatprep.mubr.msk.f32.mxu0 %vm6750_vm0, %v6749_v0 }
0x161e   :  { %5932 = vmatprep.subr.mxu0 %v6749_v0  ;;  %5943 = vmatprep.subr.mxu1 %v6749_v0 }
0x16d4   :  { %v1885_v2 = vpop.f32.mrf.mxu1  ;;  %v1955_v54 = vpop.f32.mrf.mxu0 }
0x16d5   :  { %v1886_v3 = vadd.f32 %v7129_v60, %v1885_v2  ;;  %v1956_v8 = vadd.f32 %v7134_v61, %v1955_v54  ;;  %v2235_v54 = vld [vmem:[#allocation5 + $0x6] sm:$0x3] }
0x16d6   :  { %v5900_v10 = vpop.f32.mrf.mxu1  ;;  %v5907_v9 = vpop.f32.mrf.mxu0 }
0x16d7   :  { %5379 = vst.msk [vmem:[%s8268_s22 + $0x4] sm:$0x3] %vm1021_vm10, %v1886_v3  ;;  %v1959_v12 = vmul.f32 0.5, %v1956_v8 }
0x16d9   :  { %v1960_v18 = vmul.f32 1.442695, %v1959_v12 }
0x16db   :  { %6348 = vpow2.f32 %v1960_v18 }
0x16e8   :  { %v6349_v20 = vpop.eup %6348 }
0x16e9   :  { %5380 = vst.msk [vmem:[%s8269_s23 + $0x4] sm:$0x3] %vm1021_vm10, %v6349_v20  ;;  %v1964_v21 = vmul.f32 %v6349_v20, %v5372_v19 }
0x16eb   :  { %v1965_v22 = vadd.f32 %v1964_v21, %v1886_v3 }
0x16ed   :  { %v1970_v33 = vsel %vm747_vm11, %v1965_v22, %v1968_v23 }
0x16ee   :  { %v1974_v34 = vsel %vm752_vm12, %v1970_v33, %v1972_v24  ;;  %5381 = vst.msk [vmem:[%s8270_s24 + $0x4] sm:$0x3] %vm1024_vm13, %v1970_v33 }
0x16ef   :  { %5919 = vmatmul.mubr.msk.f32.vlgmr.msra.gmra.mxu1 %vm760_vm14, %v1974_v34 }
0x16f0   :  { %5944 = vmatpush3.msra.mxu1 %v6981_v13  ;;  %5953 = vmatprep.mubr.msk.f32.mxu1 %vm6750_vm0, %v6749_v0 }
0x16f1   :  { %5945 = vmatprep.subr.mxu1 %v6749_v0 }
0x16f2   :  { %5946 = vmatpush3.msra.mxu1 %v6986_v14 }
0x16f3   :  { %5947 = vmatprep.subr.mxu1 %v6749_v0 }
0x16f4   :  { %5948 = vmatpush3.msra.mxu1 %v6995_v15 }
0x16f5   :  { %5949 = vmatprep.subr.mxu1 %v6749_v0 }
0x16f6   :  { %5950 = vmatpush3.msra.mxu1 %v7001_v16 }
0x16f7   :  { %5951 = vmatprep.subr.mxu1 %v6749_v0 }
0x16f8   :  { %5952 = vmatpush3.msra.mxu1 %v7009_v17  ;;  %v7456_v17 = vld [vmem:[%s8264_s18 + $0x18] sm:$0xff] }
0x16f9   :  { %5963 = vmatprep.subr.mxu1 %v6749_v0 }
0x17af   :  { %v2044_v13 = vpop.f32.mrf.mxu1 }
0x17b0   :  { %v2045_v35 = vadd.f32 %v7196_v32, %v2044_v13 }
0x17b1   :  { %v5920_v36 = vpop.f32.mrf.mxu1 }
0x17b2   :  { %v5375_v37 = vmul.f32 -1.442695, %v2045_v35 }
0x17b4   :  { %6350 = vpow2.f32 %v5375_v37 }
0x17c1   :  { %v6351_v14 = vpop.eup %6350 }
0x17c2   :  { %v2051_v39 = vadd.f32 1.0, %v6351_v14 }
0x17c4   :  { %6352 = vrcp.f32 %v2051_v39 }
0x17d1   :  { %v6353_v15 = vpop.eup %6352 }
0x17d2   :  { %v2057_v41 = vmul.f32 %v6353_v15, %v2055_v40 }
0x17d4   :  { %2059 = vrot.lane.b32.xlu1 %v2057_v41, %s6755_s12  ;;  %v7576_v41 = vld [vmem:[%s8256_s10 + $0x20] sm:$0xff] }
0x1846   :  { %v2060_v16 = vpop.permute.xlu1 %2059 }
0x1847   :  { %5930 = vmatmul.mubr.msk.f32.vlgmr.msra.gmra.mxu0 %vm309_vm3, %v2060_v16  ;;  %v7585_v16 = vld [vmem:[%s8256_s10 + $0x18] sm:$0xff] }
0x1848   :  { %5933 = vmatpush3.msra.mxu0 %v7456_v17  ;;  %5940 = vmatprep.mubr.msk.f32.mxu0 %vm6750_vm0, %v6749_v0 }
0x1849   :  { %5934 = vmatprep.subr.mxu0 %v6749_v0 }
0x184a   :  { %5935 = vmatpush3.msra.mxu0 %v7465_v42 }
0x184b   :  { %5936 = vmatprep.subr.mxu0 %v6749_v0 }
0x184c   :  { %5937 = vmatpush3.msra.mxu0 %v6955_v6  ;;  %v2140_v6 = vsub.f32 1.0, %v6353_v15 }
0x184d   :  { %5938 = vmatprep.subr.mxu0 %v6749_v0 }
0x184e   :  { %5939 = vmatpush3.msra.mxu0 %v6962_v7  ;;  %v2139_v7 = vmul.f32 %v6353_v15, %v7344_v11 }
0x184f   :  { %5956 = vmatprep.subr.mxu0 %v6749_v0 }
0x1907   :  { %v2129_v43 = vpop.f32.mrf.mxu0 }
0x1908   :  { %v2130_v49 = vadd.f32 %v7211_v48, %v2129_v43  ;;  %v7592_v43 = vld [vmem:[%s8256_s10 + $0x10] sm:$0xff] }
0x1909   :  { %v5931_v50 = vpop.f32.mrf.mxu0 }
0x190a   :  { %2134 = vrot.lane.b32.xlu0 %v2130_v49, %s6757_s30  ;;  %v7599_v49 = vld [vmem:[%s8256_s10 + $0x8] sm:$0xff]  ;;  %v7606_v50 = vld [vmem:[%s8256_s10] sm:$0xff] }
0x197c   :  { %v2135_v51 = vpop.permute.xlu0 %2134 }
0x197d   :  { %v2137_v52 = vadd.f32 %v2135_v51, %v2045_v35 }
0x197f   :  { %6354 = vtanh.f32 %v2137_v52 }
0x198c   :  { %v6355_v4 = vpop.eup %6354 }
0x198d   :  { %2142 = vrot.lane.b32.xlu1 %v6355_v4, %s6757_s30 }
0x1991   :  { %2240 = vrot.lane.b32.xlu1 %v7387_v1, %s6752_s9 }
0x19ff   :  { %v2143_v53 = vpop.permute.xlu1 %2142 }
0x1a00   :  { %v2145_v62 = vmul.f32 %v2143_v53, %v2140_v6 }
0x1a02   :  { %v2146_v63 = vadd.f32 %v2145_v62, %v2139_v7 }
0x1a03   :  { %v2241_v3 = vpop.permute.xlu1 %2240 }
0x1a04   :  { %v7479_v5 = vclamps-f32 %v2146_v63, 5.0 }
0x1a06   :  { %2223 = vst.msk [vmem:[#allocation18 + $0x4] sm:$0x3] %vm300_vm4, %v7479_v5  ;;  %5941 = vmatmul.mubr.msk.f32.vlgmr.msra.gmra.mxu0 %vm309_vm3, %v7479_v5 }
0x1a07   :  { %5957 = vmatpush3.msra.mxu0 %v7021_v25  ;;  %5960 = vmatprep.mubr.msk.f32.mxu0 %vm6750_vm0, %v6749_v0 }
0x1a08   :  { %5958 = vmatprep.subr.mxu0 %v6749_v0 }
0x1a09   :  { %5959 = vmatpush3.msra.mxu0 %v7023_v26 }
0x1a0a   :  { %5970 = vmatprep.subr.mxu0 %v6749_v0 }
0x1ac6   :  { %v2218_v11 = vpop.f32.mrf.mxu0 }
0x1ac7   :  { %2233 = vst.msk [vmem:[#allocation21 + $0x4] sm:$0x3] %vm1026_vm15, %v2218_v11  ;;  %2237 = vrot.lane.b32.xlu0 %v2218_v11, %s6751_s8 }
0x1ac8   :  { %v5942_v2 = vpop.f32.mrf.mxu0 }
0x1acb   :  { %2324 = vrot.lane.b32.xlu0 %v7387_v1, %s6751_s8 }
0x1b39   :  { %v2238_v25 = vpop.permute.xlu0 %2237 }
0x1b3a   :  { %v2243_v8 = vsel %vm391_vm5, %v2235_v54, %v2238_v25 }
0x1b3b   :  { %v2244_v10 = vsel %vm393_vm6, %v2243_v8, %v2241_v3 }
0x1b3c   :  { %5954 = vmatmul.mubr.msk.f32.vlgmr.msra.gmra.mxu1 %vm401_vm7, %v2244_v10 }
0x1b3d   :  { %5964 = vmatpush3.msra.mxu1 %v7054_v45  ;;  %5967 = vmatprep.mubr.msk.f32.mxu1 %vm6750_vm0, %v6749_v0  ;;  %v2325_v45 = vpop.permute.xlu0 %2324 }
0x1b3e   :  { %5965 = vmatprep.subr.mxu1 %v6749_v0 }
0x1b3f   :  { %5966 = vmatpush3.msra.mxu1 %v7068_v47 }
0x1b40   :  { %5977 = vmatprep.subr.mxu1 %v6749_v0 }
0x1bfc   :  { %v2314_v26 = vpop.f32.mrf.mxu1 }
0x1bfd   :  { %v2315_v9 = vadd.f32 %v7029_v27, %v2314_v26 }
0x1bfe   :  { %v5955_v12 = vpop.f32.mrf.mxu1 }
0x1bff   :  { %v5383_v18 = vmul.f32 -1.442695, %v2315_v9 }
0x1c01   :  { %6356 = vpow2.f32 %v5383_v18 }
0x1c0e   :  { %v6357_v19 = vpop.eup %6356 }
0x1c0f   :  { %v2321_v20 = vadd.f32 1.0, %v6357_v19 }
0x1c11   :  { %6358 = vrcp.f32 %v2321_v20 }
0x1c1e   :  { %v6359_v21 = vpop.eup %6358 }
0x1c1f   :  { %v2327_v22 = vmul.f32 %v6359_v21, %v2325_v45 }
0x1c21   :  { %2329 = vrot.lane.b32.xlu1 %v2327_v22, %s6753_s7 }
0x1c93   :  { %v2330_v23 = vpop.permute.xlu1 %2329 }
0x1c94   :  { %5961 = vmatmul.mubr.msk.f32.vlgmr.msra.gmra.mxu0 %vm391_vm5, %v2330_v23 }
0x1c95   :  { %5971 = vmatpush3.msra.mxu0 %v7049_v44  ;;  %5974 = vmatprep.mubr.msk.f32.mxu0 %vm6750_vm0, %v6749_v0 }
0x1c96   :  { %5972 = vmatprep.subr.mxu0 %v6749_v0 }
0x1c97   :  { %5973 = vmatpush3.msra.mxu0 %v7063_v46  ;;  %v2410_v46 = vsub.f32 1.0, %v6359_v21 }
0x1c98   :  { %5990 = vmatprep.subr.mxu0 %v6749_v0 }
0x1d54   :  { %v2399_v27 = vpop.f32.mrf.mxu0 }
0x1d55   :  { %v2400_v47 = vadd.f32 %v7039_v38, %v2399_v27  ;;  %v2409_v38 = vmul.f32 %v6359_v21, %v7387_v1  ;;  %v2838_v27 = vld [vmem:[#allocation5 + $0x8] sm:$0x3] }
0x1d56   :  { %v5962_v24 = vpop.f32.mrf.mxu0 }
0x1d57   :  { %2404 = vrot.lane.b32.xlu0 %v2400_v47, %s8296_s5 }
0x1d5b   :  { %2570 = vrot.lane.b32.xlu0 %v2235_v54, %s6754_s11  ;;  %v7629_v54 = vld [vmem:[%s8264_s18] sm:$0xff] }
0x1d5f   :  { %2657 = vrot.lane.b32.xlu0 %v7479_v5, %s8296_s5 }
0x1dc9   :  { %v2405_v44 = vpop.permute.xlu0 %2404 }
0x1dca   :  { %v2407_v33 = vadd.f32 %v2405_v44, %v2315_v9 }
0x1dcc   :  { %6360 = vtanh.f32 %v2407_v33 }
0x1dcd   :  { %v2571_v14 = vpop.permute.xlu0 %2570 }
0x1dd1   :  { %v2658_v63 = vpop.permute.xlu0 %2657 }
0x1dd9   :  { %v6361_v34 = vpop.eup %6360 }
0x1dda   :  { %2412 = vrot.lane.b32.xlu1 %v6361_v34, %s6755_s12  ;;  %v7665_v34 = vld [vmem:[%s8260_s14 + $0x8] sm:$0xff] }
0x1dde   :  { %2574 = vrot.lane.b32.xlu1 %v7479_v5, %s6756_s28 }
0x1e4c   :  { %v2413_v13 = vpop.permute.xlu1 %2412 }
0x1e4d   :  { %v2415_v35 = vmul.f32 %v2413_v13, %v2410_v46  ;;  %v7674_v46 = vld [vmem:[%s8260_s14] sm:$0xff] }
0x1e4f   :  { %v2416_v36 = vadd.f32 %v2415_v35, %v2409_v38  ;;  %v7678_v38 = vld [vmem:[#allocation14] ss:$0 sm:$0xff] }
0x1e50   :  { %v2575_v39 = vpop.permute.xlu1 %2574 }
0x1e51   :  { %v7522_v37 = vclamps-f32 %v2416_v36, 5.0 }
0x1e53   :  { %2828 = vst.msk [vmem:[#allocation20 + $0x6] sm:$0x3] %vm1019_vm8, %v7522_v37  ;;  %5968 = vmatmul.mubr.msk.f32.vlgmr.msra.gmra.mxu1 %vm391_vm5, %v7522_v37  ;;  %5975 = vmatmul.mubr.msk.f32.vlgmr.msra.gmra.mxu0 %vm391_vm5, %v7522_v37 }
0x1e54   :  { %5978 = vmatpush3.msk.msra.mxu1 %vm764_vm9, %v7093_v55  ;;  %5987 = vmatprep.mubr.msk.f32.mxu1 %vm6750_vm0, %v6749_v0 }
0x1e55   :  { %5979 = vmatprep.subr.mxu1 %v6749_v0  ;;  %5991 = vmatpush3.msra.mxu0 %v7171_v28 }
0x1e56   :  { %5980 = vmatpush3.msra.mxu1 %v7101_v56  ;;  %5992 = vmatprep.subr.mxu0 %v6749_v0 }
0x1e57   :  { %5981 = vmatprep.subr.mxu1 %v6749_v0  ;;  %5993 = vmatpush3.msra.mxu0 %v7176_v29 }
0x1e58   :  { %5982 = vmatpush3.msra.mxu1 %v7108_v57  ;;  %5994 = vmatprep.subr.mxu0 %v6749_v0 }
0x1e59   :  { %5983 = vmatprep.subr.mxu1 %v6749_v0  ;;  %5995 = vmatpush3.msra.mxu0 %v7183_v30 }
0x1e5a   :  { %5984 = vmatpush3.msra.mxu1 %v7113_v58  ;;  %5996 = vmatprep.subr.mxu0 %v6749_v0 }
0x1e5b   :  { %5985 = vmatprep.subr.mxu1 %v6749_v0  ;;  %5997 = vmatpush3.msra.mxu0 %v7190_v31  ;;  %v5388_v31 = vld [vmem:[%s8298_s6 + $0x6] sm:$0x3] }
0x1e5c   :  { %5986 = vmatpush3.msra.mxu1 %v7120_v59  ;;  %5998 = vmatprep.mubr.msk.f32.mxu0 %vm6750_vm0, %v6749_v0 }
0x1e5d   :  { %6001 = vmatprep.subr.mxu0 %v6749_v0  ;;  %6012 = vmatprep.subr.mxu1 %v6749_v0 }
0x1f13   :  { %v2488_v55 = vpop.f32.mrf.mxu1  ;;  %v2558_v56 = vpop.f32.mrf.mxu0 }
0x1f14   :  { %v2489_v57 = vadd.f32 %v7129_v60, %v2488_v55  ;;  %v2559_v58 = vadd.f32 %v7134_v61, %v2558_v56 }
0x1f15   :  { %v5969_v28 = vpop.f32.mrf.mxu1  ;;  %v5976_v29 = vpop.f32.mrf.mxu0 }
0x1f16   :  { %5395 = vst.msk [vmem:[%s8268_s22 + $0x6] sm:$0x3] %vm1021_vm10, %v2489_v57  ;;  %v2562_v59 = vmul.f32 0.5, %v2559_v58 }
0x1f18   :  { %v2563_v30 = vmul.f32 1.442695, %v2562_v59 }
0x1f1a   :  { %6362 = vpow2.f32 %v2563_v30  ;;  %v7686_v30 = vld [vmem:[%s8262_s16 + $0x8] sm:$0xff] }
0x1f27   :  { %v6363_v1 = vpop.eup %6362 }
0x1f28   :  { %5396 = vst.msk [vmem:[%s8269_s23 + $0x6] sm:$0x3] %vm1021_vm10, %v6363_v1  ;;  %v2567_v60 = vmul.f32 %v6363_v1, %v5388_v31  ;;  %v7695_v31 = vld [vmem:[%s8262_s16] sm:$0xff] }
0x1f2a   :  { %v2568_v61 = vadd.f32 %v2567_v60, %v2489_v57  ;;  %v7702_v60 = vld [vmem:[%s8259_s13] ss:$0 sm:$0xff] }
0x1f2c   :  { %v2573_v15 = vsel %vm747_vm11, %v2568_v61, %v2571_v14 }
0x1f2d   :  { %v2577_v40 = vsel %vm752_vm12, %v2573_v15, %v2575_v39  ;;  %5397 = vst.msk [vmem:[%s8270_s24 + $0x6] sm:$0x3] %vm1024_vm13, %v2573_v15 }
0x1f2e   :  { %5988 = vmatmul.mubr.msk.f32.vlgmr.msra.gmra.mxu1 %vm760_vm14, %v2577_v40 }
0x1f2f   :  { %6013 = vmatpush3.msra.mxu1 %v7576_v41  ;;  %6022 = vmatprep.mubr.msk.f32.mxu1 %vm6750_vm0, %v6749_v0 }
0x1f30   :  { %6014 = vmatprep.subr.mxu1 %v6749_v0 }
0x1f31   :  { %6015 = vmatpush3.msra.mxu1 %v7585_v16 }
0x1f32   :  { %6016 = vmatprep.subr.mxu1 %v6749_v0 }
0x1f33   :  { %6017 = vmatpush3.msra.mxu1 %v7592_v43 }
0x1f34   :  { %6018 = vmatprep.subr.mxu1 %v6749_v0 }
0x1f35   :  { %6019 = vmatpush3.msra.mxu1 %v7599_v49 }
0x1f36   :  { %6020 = vmatprep.subr.mxu1 %v6749_v0 }
0x1f37   :  { %6021 = vmatpush3.msra.mxu1 %v7606_v50 }
0x1f38   :  { %6032 = vmatprep.subr.mxu1 %v6749_v0 }
0x1fee   :  { %v2647_v51 = vpop.f32.mrf.mxu1 }
0x1fef   :  { %v2648_v52 = vadd.f32 %v7196_v32, %v2647_v51  ;;  %v7622_v32 = vld [vmem:[%s8264_s18 + $0x8] sm:$0xff] }
0x1ff0   :  { %v5989_v4 = vpop.f32.mrf.mxu1 }
0x1ff1   :  { %v5391_v6 = vmul.f32 -1.442695, %v2648_v52 }
0x1ff3   :  { %6364 = vpow2.f32 %v5391_v6 }
0x2000   :  { %v6365_v53 = vpop.eup %6364 }
0x2001   :  { %v2654_v7 = vadd.f32 1.0, %v6365_v53 }
0x2003   :  { %6366 = vrcp.f32 %v2654_v7 }
0x2010   :  { %v6367_v62 = vpop.eup %6366 }
0x2011   :  { %v2660_v11 = vmul.f32 %v6367_v62, %v2658_v63  ;;  %v2743_v12 = vsub.f32 1.0, %v6367_v62  ;;  %v2742_v19 = vmul.f32 %v6367_v62, %v7479_v5  ;;  %v7651_v5 = vld [vmem:[#allocation16] sm:$0xff]  ;;  %v7724_v62 = vld [vmem:[%s8297_s26 + $0x20] sm:$0x3f]  ;;  %v7740_v63 = vld [vmem:[%s8297_s26 + $0x18] sm:$0xff] }
0x2013   :  { %2662 = vrot.lane.b32.xlu1 %v2660_v11, %s6755_s12  ;;  %v7748_v11 = vld [vmem:[%s8299_s2 + $0x10] sm:$0xff] }
0x2085   :  { %v2663_v2 = vpop.permute.xlu1 %2662 }
0x2086   :  { %5999 = vmatmul.mubr.msk.f32.vlgmr.msra.gmra.mxu0 %vm309_vm3, %v2663_v2  ;;  %v7754_v2 = vld [vmem:[%s8297_s26 + $0x10] sm:$0xff] }
0x2087   :  { %6002 = vmatpush3.msra.mxu0 %v7456_v17  ;;  %6009 = vmatprep.mubr.msk.f32.mxu0 %vm6750_vm0, %v6749_v0 }
0x2088   :  { %6003 = vmatprep.subr.mxu0 %v6749_v0 }
0x2089   :  { %6004 = vmatpush3.msra.mxu0 %v7465_v42 }
0x208a   :  { %6005 = vmatprep.subr.mxu0 %v6749_v0 }
0x208b   :  { %6006 = vmatpush3.msra.mxu0 %v7622_v32 }
0x208c   :  { %6007 = vmatprep.subr.mxu0 %v6749_v0 }
0x208d   :  { %6008 = vmatpush3.msra.mxu0 %v7629_v54 }
0x208e   :  { %6025 = vmatprep.subr.mxu0 %v6749_v0 }
0x2146   :  { %v2732_v25 = vpop.f32.mrf.mxu0 }
0x2147   :  { %v2733_v3 = vadd.f32 %v7211_v48, %v2732_v25  ;;  %v7645_v48 = vld [vmem:[#allocation16 + $0x8] sm:$0xff]  ;;  %v7762_v25 = vld [vmem:[%s8299_s2 + $0x8] sm:$0xff] }
0x2148   :  { %v6000_v8 = vpop.f32.mrf.mxu0 }
0x2149   :  { %2737 = vrot.lane.b32.xlu0 %v2733_v3, %s6757_s30  ;;  %v7768_v3 = vld [vmem:[%s8297_s26 + $0x8] sm:$0xff]  ;;  %v7776_v8 = vld [vmem:[%s8299_s2] sm:$0xff] }
0x21bb   :  { %v2738_v10 = vpop.permute.xlu0 %2737 }
0x21bc   :  { %v2740_v26 = vadd.f32 %v2738_v10, %v2648_v52  ;;  %v7782_v10 = vld [vmem:[%s8297_s26] sm:$0xff] }
0x21be   :  { %6368 = vtanh.f32 %v2740_v26 }
0x21cb   :  { %v6369_v9 = vpop.eup %6368 }
0x21cc   :  { %2745 = vrot.lane.b32.xlu1 %v6369_v9, %s6757_s30 }
0x21d0   :  { %2843 = vrot.lane.b32.xlu1 %v7522_v37, %s6752_s9 }
0x223e   :  { %v2746_v18 = vpop.permute.xlu1 %2745 }
0x223f   :  { %v2748_v20 = vmul.f32 %v2746_v18, %v2743_v12  ;;  %v7792_v12 = vld [vmem:[%s8261_s15] ss:$0 sm:$0xff] }
0x2241   :  { %v2749_v21 = vadd.f32 %v2748_v20, %v2742_v19  ;;  %v7798_v19 = vld [vmem:[%s8263_s17] ss:$0 sm:$0xff]  ;;  %s5255_s17 = sshll.u32 %s6759_s4, 4  ;;  %s5256_s17 = int_to_ptr.vmem [resolvable:$true] %s5255_s17 }
0x2242   :  { %v2844_v24 = vpop.permute.xlu1 %2843 }
0x2243   :  { %v7639_v45 = vclamps-f32 %v2749_v21, 5.0 }
0x2245   :  { %2826 = vst.msk [vmem:[#allocation18 + $0x6] sm:$0x3] %vm300_vm4, %v7639_v45  ;;  %6010 = vmatmul.mubr.msk.f32.vlgmr.msra.gmra.mxu0 %vm309_vm3, %v7639_v45 }
0x2246   :  { %6026 = vmatpush3.msra.mxu0 %v7645_v48  ;;  %6029 = vmatprep.mubr.msk.f32.mxu0 %vm6750_vm0, %v6749_v0 }
0x2247   :  { %6027 = vmatprep.subr.mxu0 %v6749_v0 }
0x2248   :  { %6028 = vmatpush3.msra.mxu0 %v7651_v5 }
0x2249   :  { %6039 = vmatprep.subr.mxu0 %v6749_v0 }
0x2305   :  { %v2821_v22 = vpop.f32.mrf.mxu0 }
0x2306   :  { %2836 = vst.msk [vmem:[#allocation21 + $0x6] sm:$0x3] %vm1026_vm15, %v2821_v22  ;;  %2840 = vrot.lane.b32.xlu0 %v2821_v22, %s6751_s8 }
0x2307   :  { %v6011_v23 = vpop.f32.mrf.mxu0 }
0x230a   :  { %2927 = vrot.lane.b32.xlu0 %v7522_v37, %s6751_s8 }
0x2378   :  { %v2841_v47 = vpop.permute.xlu0 %2840 }
0x2379   :  { %v2846_v44 = vsel %vm391_vm5, %v2838_v27, %v2841_v47  ;;  %v5404_v47 = vld [vmem:[%s8298_s6 + $0x8] sm:$0x3] }
0x237a   :  { %v2847_v33 = vsel %vm393_vm6, %v2846_v44, %v2844_v24 }
0x237b   :  { %6023 = vmatmul.mubr.msk.f32.vlgmr.msra.gmra.mxu1 %vm401_vm7, %v2847_v33 }
0x237c   :  { %6033 = vmatpush3.msra.mxu1 %v7665_v34  ;;  %6036 = vmatprep.mubr.msk.f32.mxu1 %vm6750_vm0, %v6749_v0  ;;  %v2928_v28 = vpop.permute.xlu0 %2927 }
0x237d   :  { %6034 = vmatprep.subr.mxu1 %v6749_v0 }
0x237e   :  { %6035 = vmatpush3.msra.mxu1 %v7674_v46 }
0x237f   :  { %6046 = vmatprep.subr.mxu1 %v6749_v0 }
0x243b   :  { %v2917_v13 = vpop.f32.mrf.mxu1 }
0x243c   :  { %v2918_v35 = vadd.f32 %v7678_v38, %v2917_v13 }
0x243d   :  { %v6024_v36 = vpop.f32.mrf.mxu1 }
0x243e   :  { %v5399_v55 = vmul.f32 -1.442695, %v2918_v35 }
0x2440   :  { %6370 = vpow2.f32 %v5399_v55 }
0x244d   :  { %v6371_v56 = vpop.eup %6370 }
0x244e   :  { %v2924_v57 = vadd.f32 1.0, %v6371_v56 }
0x2450   :  { %6372 = vrcp.f32 %v2924_v57  ;;  %v7831_v57 = vld [vmem:[#allocation11] ss:$0 sm:$0xff] }
0x245d   :  { %v6373_v58 = vpop.eup %6372 }
0x245e   :  { %v2930_v29 = vmul.f32 %v6373_v58, %v2928_v28  ;;  %v3013_v51 = vsub.f32 1.0, %v6373_v58  ;;  %v3012_v4 = vmul.f32 %v6373_v58, %v7522_v37  ;;  %v7734_v37 = vld [vmem:[%s8299_s2 + $0x18] sm:$0xff] }
0x2460   :  { %2932 = vrot.lane.b32.xlu1 %v2930_v29, %s6753_s7 }
0x24d2   :  { %v2933_v59 = vpop.permute.xlu1 %2932 }
0x24d3   :  { %6030 = vmatmul.mubr.msk.f32.vlgmr.msra.gmra.mxu0 %vm391_vm5, %v2933_v59 }
0x24d4   :  { %6040 = vmatpush3.msra.mxu0 %v7686_v30  ;;  %6043 = vmatprep.mubr.msk.f32.mxu0 %vm6750_vm0, %v6749_v0 }
0x24d5   :  { %6041 = vmatprep.subr.mxu0 %v6749_v0 }
0x24d6   :  { %6042 = vmatpush3.msra.mxu0 %v7695_v31 }
0x24d7   :  { %6059 = vmatprep.subr.mxu0 %v6749_v0 }
0x2593   :  { %v3002_v1 = vpop.f32.mrf.mxu0 }
0x2594   :  { %v3003_v61 = vadd.f32 %v7702_v60, %v3002_v1 }
0x2595   :  { %v6031_v14 = vpop.f32.mrf.mxu0 }
0x2596   :  { %3007 = vrot.lane.b32.xlu0 %v3003_v61, %s8296_s5 }
0x259a   :  { %3173 = vrot.lane.b32.xlu0 %v2838_v27, %s6754_s11 }
0x259e   :  { %3260 = vrot.lane.b32.xlu0 %v7639_v45, %s8296_s5 }
0x2608   :  { %v3008_v39 = vpop.permute.xlu0 %3007 }
0x2609   :  { %v3010_v15 = vadd.f32 %v3008_v39, %v2918_v35 }
0x260b   :  { %6374 = vtanh.f32 %v3010_v15 }
0x260c   :  { %v3174_v13 = vpop.permute.xlu0 %3173 }
0x2610   :  { %v3261_v14 = vpop.permute.xlu0 %3260 }
0x2618   :  { %v6375_v40 = vpop.eup %6374 }
0x2619   :  { %3015 = vrot.lane.b32.xlu1 %v6375_v40, %s6755_s12 }
0x261d   :  { %3177 = vrot.lane.b32.xlu1 %v7639_v45, %s6756_s28 }
0x268b   :  { %v3016_v52 = vpop.permute.xlu1 %3015 }
0x268c   :  { %v3018_v6 = vmul.f32 %v3016_v52, %v3013_v51  ;;  %v7846_v51 = vld [vmem:[#allocation13] ss:$0 sm:$0xff] }
0x268e   :  { %v3019_v53 = vadd.f32 %v3018_v6, %v3012_v4 }
0x268f   :  { %v3178_v35 = vpop.permute.xlu1 %3177 }
0x2690   :  { %v7713_v7 = vclamps-f32 %v3019_v53, 5.0 }
0x2692   :  { %3431 = vst.msk [vmem:[#allocation20 + $0x8] sm:$0x3] %vm1019_vm8, %v7713_v7  ;;  %6037 = vmatmul.mubr.msk.f32.vlgmr.msra.gmra.mxu1 %vm391_vm5, %v7713_v7  ;;  %6044 = vmatmul.mubr.msk.f32.vlgmr.msra.gmra.mxu0 %vm391_vm5, %v7713_v7 }
0x2693   :  { %6047 = vmatpush3.msk.msra.mxu1 %vm764_vm9, %v7724_v62  ;;  %6056 = vmatprep.mubr.msk.f32.mxu1 %vm6750_vm0, %v6749_v0 }
0x2694   :  { %6048 = vmatprep.subr.mxu1 %v6749_v0  ;;  %6060 = vmatpush3.msra.mxu0 %v7734_v37 }
0x2695   :  { %6049 = vmatpush3.msra.mxu1 %v7740_v63  ;;  %6061 = vmatprep.subr.mxu0 %v6749_v0 }
0x2696   :  { %6050 = vmatprep.subr.mxu1 %v6749_v0  ;;  %6062 = vmatpush3.msra.mxu0 %v7748_v11 }
0x2697   :  { %6051 = vmatpush3.msra.mxu1 %v7754_v2  ;;  %6063 = vmatprep.subr.mxu0 %v6749_v0 }
0x2698   :  { %6052 = vmatprep.subr.mxu1 %v6749_v0  ;;  %6064 = vmatpush3.msra.mxu0 %v7762_v25 }
0x2699   :  { %6053 = vmatpush3.msra.mxu1 %v7768_v3  ;;  %6065 = vmatprep.subr.mxu0 %v6749_v0 }
0x269a   :  { %6054 = vmatprep.subr.mxu1 %v6749_v0  ;;  %6066 = vmatpush3.msra.mxu0 %v7776_v8 }
0x269b   :  { %6055 = vmatpush3.msra.mxu1 %v7782_v10  ;;  %6067 = vmatprep.mubr.msk.f32.mxu0 %vm6750_vm0, %v6749_v0 }
0x269c   :  { %6070 = vmatprep.subr.mxu0 %v6749_v0  ;;  %6081 = vmatprep.subr.mxu1 %v6749_v0 }
0x2752   :  { %v3091_v26 = vpop.f32.mrf.mxu1  ;;  %v3161_v9 = vpop.f32.mrf.mxu0 }
0x2753   :  { %v3092_v18 = vadd.f32 %v7792_v12, %v3091_v26  ;;  %v3162_v20 = vadd.f32 %v7798_v19, %v3161_v9 }
0x2754   :  { %v6038_v21 = vpop.f32.mrf.mxu1  ;;  %v6045_v22 = vpop.f32.mrf.mxu0 }
0x2755   :  { %5411 = vst.msk [vmem:[%s8268_s22 + $0x8] sm:$0x3] %vm1021_vm10, %v3092_v18  ;;  %v3165_v23 = vmul.f32 0.5, %v3162_v20 }
0x2757   :  { %v3166_v27 = vmul.f32 1.442695, %v3165_v23 }
0x2759   :  { %6376 = vpow2.f32 %v3166_v27 }
0x2766   :  { %v6377_v24 = vpop.eup %6376 }
0x2767   :  { %5412 = vst.msk [vmem:[%s8269_s23 + $0x8] sm:$0x3] %vm1021_vm10, %v6377_v24  ;;  %v3170_v44 = vmul.f32 %v6377_v24, %v5404_v47  ;;  %v3441_v47 = vld [vmem:[#allocation5 + $0xa] sm:$0x3] }
0x2769   :  { %v3171_v33 = vadd.f32 %v3170_v44, %v3092_v18 }
0x276b   :  { %v3176_v36 = vsel %vm747_vm11, %v3171_v33, %v3174_v13 }
0x276c   :  { %v3180_v55 = vsel %vm752_vm12, %v3176_v36, %v3178_v35  ;;  %5413 = vst.msk [vmem:[%s8270_s24 + $0x8] sm:$0x3] %vm1024_vm13, %v3176_v36 }
0x276d   :  { %6057 = vmatmul.mubr.msk.f32.vlgmr.msra.gmra.mxu1 %vm760_vm14, %v3180_v55 }
0x276e   :  { %6082 = vmatpush3.msra.mxu1 %v7576_v41  ;;  %6091 = vmatprep.mubr.msk.f32.mxu1 %vm6750_vm0, %v6749_v0 }
0x276f   :  { %6083 = vmatprep.subr.mxu1 %v6749_v0 }
0x2770   :  { %6084 = vmatpush3.msra.mxu1 %v7585_v16 }
0x2771   :  { %6085 = vmatprep.subr.mxu1 %v6749_v0 }
0x2772   :  { %6086 = vmatpush3.msra.mxu1 %v7592_v43 }
0x2773   :  { %6087 = vmatprep.subr.mxu1 %v6749_v0 }
0x2774   :  { %6088 = vmatpush3.msra.mxu1 %v7599_v49 }
0x2775   :  { %6089 = vmatprep.subr.mxu1 %v6749_v0 }
0x2776   :  { %6090 = vmatpush3.msra.mxu1 %v7606_v50 }
0x2777   :  { %6101 = vmatprep.subr.mxu1 %v6749_v0 }
0x282d   :  { %v3250_v56 = vpop.f32.mrf.mxu1 }
0x282e   :  { %v3251_v58 = vadd.f32 %v7831_v57, %v3250_v56 }
0x282f   :  { %v6058_v28 = vpop.f32.mrf.mxu1 }
0x2830   :  { %v5407_v29 = vmul.f32 -1.442695, %v3251_v58 }
0x2832   :  { %6378 = vpow2.f32 %v5407_v29 }
0x283f   :  { %v6379_v59 = vpop.eup %6378 }
0x2840   :  { %v3257_v1 = vadd.f32 1.0, %v6379_v59 }
0x2842   :  { %6380 = vrcp.f32 %v3257_v1 }
0x284f   :  { %v6381_v61 = vpop.eup %6380 }
0x2850   :  { %v3263_v39 = vmul.f32 %v6381_v61, %v3261_v14  ;;  %v3346_v9 = vsub.f32 1.0, %v6381_v61  ;;  %v3345_v20 = vmul.f32 %v6381_v61, %v7639_v45 }
0x2852   :  { %3265 = vrot.lane.b32.xlu1 %v3263_v39, %s6755_s12 }
0x28c4   :  { %v3266_v15 = vpop.permute.xlu1 %3265 }
0x28c5   :  { %6068 = vmatmul.mubr.msk.f32.vlgmr.msra.gmra.mxu0 %vm309_vm3, %v3266_v15 }
0x28c6   :  { %6071 = vmatpush3.msra.mxu0 %v7456_v17  ;;  %6078 = vmatprep.mubr.msk.f32.mxu0 %vm6750_vm0, %v6749_v0 }
0x28c7   :  { %6072 = vmatprep.subr.mxu0 %v6749_v0 }
0x28c8   :  { %6073 = vmatpush3.msra.mxu0 %v7465_v42 }
0x28c9   :  { %6074 = vmatprep.subr.mxu0 %v6749_v0 }
0x28ca   :  { %6075 = vmatpush3.msra.mxu0 %v7622_v32 }
0x28cb   :  { %6076 = vmatprep.subr.mxu0 %v6749_v0 }
0x28cc   :  { %6077 = vmatpush3.msra.mxu0 %v7629_v54 }
0x28cd   :  { %6094 = vmatprep.subr.mxu0 %v6749_v0 }
0x2985   :  { %v3335_v40 = vpop.f32.mrf.mxu0 }
0x2986   :  { %v3336_v52 = vadd.f32 %v7846_v51, %v3335_v40 }
0x2987   :  { %v6069_v4 = vpop.f32.mrf.mxu0 }
0x2988   :  { %3340 = vrot.lane.b32.xlu0 %v3336_v52, %s6757_s30 }
0x29fa   :  { %v3341_v6 = vpop.permute.xlu0 %3340 }
0x29fb   :  { %v3343_v53 = vadd.f32 %v3341_v6, %v3251_v58 }
0x29fd   :  { %6382 = vtanh.f32 %v3343_v53 }
0x2a0a   :  { %v6383_v26 = vpop.eup %6382 }
0x2a0b   :  { %3348 = vrot.lane.b32.xlu1 %v6383_v26, %s6757_s30 }
0x2a0f   :  { %3446 = vrot.lane.b32.xlu1 %v7713_v7, %s6752_s9 }
0x2a7d   :  { %v3349_v18 = vpop.permute.xlu1 %3348 }
0x2a7e   :  { %v3351_v21 = vmul.f32 %v3349_v18, %v3346_v9 }
0x2a80   :  { %v3352_v22 = vadd.f32 %v3351_v21, %v3345_v20 }
0x2a81   :  { %v3447_v44 = vpop.permute.xlu1 %3446 }
0x2a82   :  { %v7854_v23 = vclamps-f32 %v3352_v22, 5.0 }
0x2a84   :  { %3429 = vst.msk [vmem:[#allocation18 + $0x8] sm:$0x3] %vm300_vm4, %v7854_v23  ;;  %6079 = vmatmul.mubr.msk.f32.vlgmr.msra.gmra.mxu0 %vm309_vm3, %v7854_v23 }
0x2a85   :  { %6095 = vmatpush3.msra.mxu0 %v7645_v48  ;;  %6098 = vmatprep.mubr.msk.f32.mxu0 %vm6750_vm0, %v6749_v0 }
0x2a86   :  { %6096 = vmatprep.subr.mxu0 %v6749_v0 }
0x2a87   :  { %6097 = vmatpush3.msra.mxu0 %v7651_v5 }
0x2a88   :  { %6108 = vmatprep.subr.mxu0 %v6749_v0 }
0x2b44   :  { %v3424_v45 = vpop.f32.mrf.mxu0 }
0x2b45   :  { %3439 = vst.msk [vmem:[#allocation21 + $0x8] sm:$0x3] %vm1026_vm15, %v3424_v45  ;;  %3443 = vrot.lane.b32.xlu0 %v3424_v45, %s6751_s8 }
0x2b46   :  { %v6080_v27 = vpop.f32.mrf.mxu0 }
0x2b49   :  { %3530 = vrot.lane.b32.xlu0 %v7713_v7, %s6751_s8 }
0x2bb7   :  { %v3444_v24 = vpop.permute.xlu0 %3443 }
0x2bb8   :  { %v3449_v33 = vsel %vm391_vm5, %v3441_v47, %v3444_v24 }
0x2bb9   :  { %v3450_v13 = vsel %vm393_vm6, %v3449_v33, %v3447_v44  ;;  %v5420_v33 = vld [vmem:[%s8298_s6 + $0xa] sm:$0x3] }
0x2bba   :  { %6092 = vmatmul.mubr.msk.f32.vlgmr.msra.gmra.mxu1 %vm401_vm7, %v3450_v13 }
0x2bbb   :  { %6102 = vmatpush3.msra.mxu1 %v7665_v34  ;;  %6105 = vmatprep.mubr.msk.f32.mxu1 %vm6750_vm0, %v6749_v0  ;;  %v3531_v59 = vpop.permute.xlu0 %3530 }
0x2bbc   :  { %6103 = vmatprep.subr.mxu1 %v6749_v0 }
0x2bbd   :  { %6104 = vmatpush3.msra.mxu1 %v7674_v46 }
0x2bbe   :  { %6115 = vmatprep.subr.mxu1 %v6749_v0 }
0x2c7a   :  { %v3520_v35 = vpop.f32.mrf.mxu1 }
0x2c7b   :  { %v3521_v36 = vadd.f32 %v7678_v38, %v3520_v35 }
0x2c7c   :  { %v6093_v55 = vpop.f32.mrf.mxu1 }
0x2c7d   :  { %v5415_v56 = vmul.f32 -1.442695, %v3521_v36 }
0x2c7f   :  { %6384 = vpow2.f32 %v5415_v56 }
0x2c8c   :  { %v6385_v58 = vpop.eup %6384 }
0x2c8d   :  { %v3527_v28 = vadd.f32 1.0, %v6385_v58 }
0x2c8f   :  { %6386 = vrcp.f32 %v3527_v28 }
0x2c9c   :  { %v6387_v29 = vpop.eup %6386 }
0x2c9d   :  { %v3533_v1 = vmul.f32 %v6387_v29, %v3531_v59  ;;  %v3616_v6 = vsub.f32 1.0, %v6387_v29  ;;  %v3615_v26 = vmul.f32 %v6387_v29, %v7713_v7 }
0x2c9f   :  { %3535 = vrot.lane.b32.xlu1 %v3533_v1, %s6753_s7 }
0x2d11   :  { %v3536_v61 = vpop.permute.xlu1 %3535 }
0x2d12   :  { %6099 = vmatmul.mubr.msk.f32.vlgmr.msra.gmra.mxu0 %vm391_vm5, %v3536_v61 }
0x2d13   :  { %6109 = vmatpush3.msra.mxu0 %v7686_v30  ;;  %6112 = vmatprep.mubr.msk.f32.mxu0 %vm6750_vm0, %v6749_v0 }
0x2d14   :  { %6110 = vmatprep.subr.mxu0 %v6749_v0 }
0x2d15   :  { %6111 = vmatpush3.msra.mxu0 %v7695_v31 }
0x2d16   :  { %6128 = vmatprep.subr.mxu0 %v6749_v0 }
0x2dd2   :  { %v3605_v14 = vpop.f32.mrf.mxu0 }
0x2dd3   :  { %v3606_v39 = vadd.f32 %v7702_v60, %v3605_v14 }
0x2dd4   :  { %v6100_v15 = vpop.f32.mrf.mxu0 }
0x2dd5   :  { %3610 = vrot.lane.b32.xlu0 %v3606_v39, %s8296_s5 }
0x2dd9   :  { %3776 = vrot.lane.b32.xlu0 %v3441_v47, %s6754_s11 }
0x2ddd   :  { %3863 = vrot.lane.b32.xlu0 %v7854_v23, %s8296_s5 }
0x2e47   :  { %v3611_v40 = vpop.permute.xlu0 %3610 }
0x2e48   :  { %v3613_v52 = vadd.f32 %v3611_v40, %v3521_v36 }
0x2e4a   :  { %6388 = vtanh.f32 %v3613_v52 }
0x2e4b   :  { %v3777_v55 = vpop.permute.xlu0 %3776 }
0x2e4f   :  { %v3864_v40 = vpop.permute.xlu0 %3863 }
0x2e57   :  { %v6389_v4 = vpop.eup %6388 }
0x2e58   :  { %3618 = vrot.lane.b32.xlu1 %v6389_v4, %s6755_s12 }
0x2e5c   :  { %3780 = vrot.lane.b32.xlu1 %v7854_v23, %s6756_s28 }
0x2eca   :  { %v3619_v53 = vpop.permute.xlu1 %3618 }
0x2ecb   :  { %v3621_v9 = vmul.f32 %v3619_v53, %v3616_v6 }
0x2ecd   :  { %v3622_v18 = vadd.f32 %v3621_v9, %v3615_v26 }
0x2ece   :  { %v3781_v56 = vpop.permute.xlu1 %3780 }
0x2ecf   :  { %v7897_v20 = vclamps-f32 %v3622_v18, 5.0 }
0x2ed1   :  { %4034 = vst.msk [vmem:[#allocation20 + $0xa] sm:$0x3] %vm1019_vm8, %v7897_v20  ;;  %6106 = vmatmul.mubr.msk.f32.vlgmr.msra.gmra.mxu1 %vm391_vm5, %v7897_v20  ;;  %6113 = vmatmul.mubr.msk.f32.vlgmr.msra.gmra.mxu0 %vm391_vm5, %v7897_v20 }
0x2ed2   :  { %6116 = vmatpush3.msk.msra.mxu1 %vm764_vm9, %v7724_v62  ;;  %6125 = vmatprep.mubr.msk.f32.mxu1 %vm6750_vm0, %v6749_v0 }
0x2ed3   :  { %6117 = vmatprep.subr.mxu1 %v6749_v0  ;;  %6129 = vmatpush3.msra.mxu0 %v7734_v37 }
0x2ed4   :  { %6118 = vmatpush3.msra.mxu1 %v7740_v63  ;;  %6130 = vmatprep.subr.mxu0 %v6749_v0 }
0x2ed5   :  { %6119 = vmatprep.subr.mxu1 %v6749_v0  ;;  %6131 = vmatpush3.msra.mxu0 %v7748_v11 }
0x2ed6   :  { %6120 = vmatpush3.msra.mxu1 %v7754_v2  ;;  %6132 = vmatprep.subr.mxu0 %v6749_v0 }
0x2ed7   :  { %6121 = vmatprep.subr.mxu1 %v6749_v0  ;;  %6133 = vmatpush3.msra.mxu0 %v7762_v25 }
0x2ed8   :  { %6122 = vmatpush3.msra.mxu1 %v7768_v3  ;;  %6134 = vmatprep.subr.mxu0 %v6749_v0 }
0x2ed9   :  { %6123 = vmatprep.subr.mxu1 %v6749_v0  ;;  %6135 = vmatpush3.msra.mxu0 %v7776_v8 }
0x2eda   :  { %6124 = vmatpush3.msra.mxu1 %v7782_v10  ;;  %6136 = vmatprep.mubr.msk.f32.mxu0 %vm6750_vm0, %v6749_v0 }
0x2edb   :  { %6139 = vmatprep.subr.mxu0 %v6749_v0  ;;  %6150 = vmatprep.subr.mxu1 %v6749_v0 }
0x2f91   :  { %v3694_v7 = vpop.f32.mrf.mxu1  ;;  %v3764_v21 = vpop.f32.mrf.mxu0 }
0x2f92   :  { %v3695_v22 = vadd.f32 %v7792_v12, %v3694_v7  ;;  %v3765_v45 = vadd.f32 %v7798_v19, %v3764_v21 }
0x2f93   :  { %v6107_v27 = vpop.f32.mrf.mxu1  ;;  %v6114_v47 = vpop.f32.mrf.mxu0 }
0x2f94   :  { %5427 = vst.msk [vmem:[%s8268_s22 + $0xa] sm:$0x3] %vm1021_vm10, %v3695_v22  ;;  %v3768_v24 = vmul.f32 0.5, %v3765_v45 }
0x2f96   :  { %v3769_v44 = vmul.f32 1.442695, %v3768_v24  ;;  %v4044_v24 = vld [vmem:[#allocation5 + $0xc] sm:$0x3] }
0x2f98   :  { %6390 = vpow2.f32 %v3769_v44 }
0x2fa5   :  { %v6391_v13 = vpop.eup %6390 }
0x2fa6   :  { %5428 = vst.msk [vmem:[%s8269_s23 + $0xa] sm:$0x3] %vm1021_vm10, %v6391_v13  ;;  %v3773_v35 = vmul.f32 %v6391_v13, %v5420_v33 }
0x2fa8   :  { %v3774_v36 = vadd.f32 %v3773_v35, %v3695_v22 }
0x2faa   :  { %v3779_v58 = vsel %vm747_vm11, %v3774_v36, %v3777_v55 }
0x2fab   :  { %v3783_v28 = vsel %vm752_vm12, %v3779_v58, %v3781_v56  ;;  %5429 = vst.msk [vmem:[%s8270_s24 + $0xa] sm:$0x3] %vm1024_vm13, %v3779_v58 }
0x2fac   :  { %6126 = vmatmul.mubr.msk.f32.vlgmr.msra.gmra.mxu1 %vm760_vm14, %v3783_v28 }
0x2fad   :  { %6151 = vmatpush3.msra.mxu1 %v7576_v41  ;;  %6160 = vmatprep.mubr.msk.f32.mxu1 %vm6750_vm0, %v6749_v0 }
0x2fae   :  { %6152 = vmatprep.subr.mxu1 %v6749_v0 }
0x2faf   :  { %6153 = vmatpush3.msra.mxu1 %v7585_v16 }
0x2fb0   :  { %6154 = vmatprep.subr.mxu1 %v6749_v0 }
0x2fb1   :  { %6155 = vmatpush3.msra.mxu1 %v7592_v43 }
0x2fb2   :  { %6156 = vmatprep.subr.mxu1 %v6749_v0 }
0x2fb3   :  { %6157 = vmatpush3.msra.mxu1 %v7599_v49 }
0x2fb4   :  { %6158 = vmatprep.subr.mxu1 %v6749_v0 }
0x2fb5   :  { %6159 = vmatpush3.msra.mxu1 %v7606_v50 }
0x2fb6   :  { %6170 = vmatprep.subr.mxu1 %v6749_v0 }
0x306c   :  { %v3853_v29 = vpop.f32.mrf.mxu1 }
0x306d   :  { %v3854_v59 = vadd.f32 %v7831_v57, %v3853_v29 }
0x306e   :  { %v6127_v1 = vpop.f32.mrf.mxu1 }
0x306f   :  { %v5423_v61 = vmul.f32 -1.442695, %v3854_v59 }
0x3071   :  { %6392 = vpow2.f32 %v5423_v61 }
0x307e   :  { %v6393_v14 = vpop.eup %6392 }
0x307f   :  { %v3860_v39 = vadd.f32 1.0, %v6393_v14 }
0x3081   :  { %6394 = vrcp.f32 %v3860_v39 }
0x308e   :  { %v6395_v15 = vpop.eup %6394 }
0x308f   :  { %v3866_v52 = vmul.f32 %v6395_v15, %v3864_v40  ;;  %v3949_v18 = vsub.f32 1.0, %v6395_v15  ;;  %v3948_v21 = vmul.f32 %v6395_v15, %v7854_v23 }
0x3091   :  { %3868 = vrot.lane.b32.xlu1 %v3866_v52, %s6755_s12 }
0x3103   :  { %v3869_v4 = vpop.permute.xlu1 %3868 }
0x3104   :  { %6137 = vmatmul.mubr.msk.f32.vlgmr.msra.gmra.mxu0 %vm309_vm3, %v3869_v4 }
0x3105   :  { %6140 = vmatpush3.msra.mxu0 %v7456_v17  ;;  %6147 = vmatprep.mubr.msk.f32.mxu0 %vm6750_vm0, %v6749_v0 }
0x3106   :  { %6141 = vmatprep.subr.mxu0 %v6749_v0 }
0x3107   :  { %6142 = vmatpush3.msra.mxu0 %v7465_v42 }
0x3108   :  { %6143 = vmatprep.subr.mxu0 %v6749_v0 }
0x3109   :  { %6144 = vmatpush3.msra.mxu0 %v7622_v32 }
0x310a   :  { %6145 = vmatprep.subr.mxu0 %v6749_v0 }
0x310b   :  { %6146 = vmatpush3.msra.mxu0 %v7629_v54 }
0x310c   :  { %6163 = vmatprep.subr.mxu0 %v6749_v0 }
0x31c4   :  { %v3938_v6 = vpop.f32.mrf.mxu0 }
0x31c5   :  { %v3939_v17 = vadd.f32 %v7846_v51, %v3938_v6 }
0x31c6   :  { %v6138_v53 = vpop.f32.mrf.mxu0 }
0x31c7   :  { %3943 = vrot.lane.b32.xlu0 %v3939_v17, %s6757_s30 }
0x3239   :  { %v3944_v26 = vpop.permute.xlu0 %3943 }
0x323a   :  { %v3946_v9 = vadd.f32 %v3944_v26, %v3854_v59 }
0x323c   :  { %6396 = vtanh.f32 %v3946_v9 }
0x3249   :  { %v6397_v42 = vpop.eup %6396 }
0x324a   :  { %3951 = vrot.lane.b32.xlu1 %v6397_v42, %s6757_s30 }
0x324e   :  { %4049 = vrot.lane.b32.xlu1 %v7897_v20, %s6752_s9 }
0x32bc   :  { %v3952_v7 = vpop.permute.xlu1 %3951 }
0x32bd   :  { %v3954_v22 = vmul.f32 %v3952_v7, %v3949_v18 }
0x32bf   :  { %v3955_v45 = vadd.f32 %v3954_v22, %v3948_v21 }
0x32c0   :  { %v4050_v33 = vpop.permute.xlu1 %4049 }
0x32c1   :  { %v7979_v27 = vclamps-f32 %v3955_v45, 5.0 }
0x32c3   :  { %4032 = vst.msk [vmem:[#allocation18 + $0xa] sm:$0x3] %vm300_vm4, %v7979_v27  ;;  %6148 = vmatmul.mubr.msk.f32.vlgmr.msra.gmra.mxu0 %vm309_vm3, %v7979_v27 }
0x32c4   :  { %6164 = vmatpush3.msra.mxu0 %v7645_v48  ;;  %6167 = vmatprep.mubr.msk.f32.mxu0 %vm6750_vm0, %v6749_v0 }
0x32c5   :  { %6165 = vmatprep.subr.mxu0 %v6749_v0 }
0x32c6   :  { %6166 = vmatpush3.msra.mxu0 %v7651_v5 }
0x32c7   :  { %6177 = vmatprep.subr.mxu0 %v6749_v0 }
0x3383   :  { %v4027_v23 = vpop.f32.mrf.mxu0 }
0x3384   :  { %4042 = vst.msk [vmem:[#allocation21 + $0xa] sm:$0x3] %vm1026_vm15, %v4027_v23  ;;  %4046 = vrot.lane.b32.xlu0 %v4027_v23, %s6751_s8 }
0x3385   :  { %v6149_v47 = vpop.f32.mrf.mxu0 }
0x3388   :  { %4133 = vrot.lane.b32.xlu0 %v7897_v20, %s6751_s8 }
0x33f6   :  { %v4047_v44 = vpop.permute.xlu0 %4046 }
0x33f7   :  { %v4052_v13 = vsel %vm391_vm5, %v4044_v24, %v4047_v44  ;;  %v5436_v44 = vld [vmem:[%s8298_s6 + $0xc] sm:$0x3] }
0x33f8   :  { %v4053_v35 = vsel %vm393_vm6, %v4052_v13, %v4050_v33 }
0x33f9   :  { %6161 = vmatmul.mubr.msk.f32.vlgmr.msra.gmra.mxu1 %vm401_vm7, %v4053_v35 }
0x33fa   :  { %6171 = vmatpush3.msra.mxu1 %v7665_v34  ;;  %6174 = vmatprep.mubr.msk.f32.mxu1 %vm6750_vm0, %v6749_v0  ;;  %v4134_v1 = vpop.permute.xlu0 %4133 }
0x33fb   :  { %6172 = vmatprep.subr.mxu1 %v6749_v0 }
0x33fc   :  { %6173 = vmatpush3.msra.mxu1 %v7674_v46 }
0x33fd   :  { %6184 = vmatprep.subr.mxu1 %v6749_v0 }
0x34b9   :  { %v4123_v36 = vpop.f32.mrf.mxu1 }
0x34ba   :  { %v4124_v55 = vadd.f32 %v7678_v38, %v4123_v36 }
0x34bb   :  { %v6162_v56 = vpop.f32.mrf.mxu1 }
0x34bc   :  { %v5431_v58 = vmul.f32 -1.442695, %v4124_v55 }
0x34be   :  { %6398 = vpow2.f32 %v5431_v58 }
0x34cb   :  { %v6399_v28 = vpop.eup %6398 }
0x34cc   :  { %v4130_v29 = vadd.f32 1.0, %v6399_v28 }
0x34ce   :  { %6400 = vrcp.f32 %v4130_v29 }
0x34db   :  { %v6401_v59 = vpop.eup %6400 }
0x34dc   :  { %v4136_v61 = vmul.f32 %v6401_v59, %v4134_v1  ;;  %v4219_v17 = vsub.f32 1.0, %v6401_v59  ;;  %v4218_v26 = vmul.f32 %v6401_v59, %v7897_v20 }
0x34de   :  { %4138 = vrot.lane.b32.xlu1 %v4136_v61, %s6753_s7 }
0x3550   :  { %v4139_v14 = vpop.permute.xlu1 %4138 }
0x3551   :  { %6168 = vmatmul.mubr.msk.f32.vlgmr.msra.gmra.mxu0 %vm391_vm5, %v4139_v14 }
0x3552   :  { %6178 = vmatpush3.msra.mxu0 %v7686_v30  ;;  %6181 = vmatprep.mubr.msk.f32.mxu0 %vm6750_vm0, %v6749_v0 }
0x3553   :  { %6179 = vmatprep.subr.mxu0 %v6749_v0 }
0x3554   :  { %6180 = vmatpush3.msra.mxu0 %v7695_v31 }
0x3555   :  { %6197 = vmatprep.subr.mxu0 %v6749_v0 }
0x3611   :  { %v4208_v39 = vpop.f32.mrf.mxu0 }
0x3612   :  { %v4209_v15 = vadd.f32 %v7702_v60, %v4208_v39  ;;  %v8100_v39 = vld [vmem:[%s8264_s18 + $0x10] sm:$0xff] }
0x3613   :  { %v6169_v40 = vpop.f32.mrf.mxu0 }
0x3614   :  { %4213 = vrot.lane.b32.xlu0 %v4209_v15, %s8296_s5 }
0x3618   :  { %4379 = vrot.lane.b32.xlu0 %v4044_v24, %s6754_s11 }
0x361c   :  { %4466 = vrot.lane.b32.xlu0 %v7979_v27, %s8296_s5 }
0x3686   :  { %v4214_v52 = vpop.permute.xlu0 %4213 }
0x3687   :  { %v4216_v4 = vadd.f32 %v4214_v52, %v4124_v55 }
0x3689   :  { %6402 = vtanh.f32 %v4216_v4 }
0x368a   :  { %v4380_v36 = vpop.permute.xlu0 %4379 }
0x368e   :  { %v4467_v61 = vpop.permute.xlu0 %4466 }
0x3696   :  { %v6403_v6 = vpop.eup %6402 }
0x3697   :  { %4221 = vrot.lane.b32.xlu1 %v6403_v6, %s6755_s12 }
0x369b   :  { %4383 = vrot.lane.b32.xlu1 %v7979_v27, %s6756_s28 }
0x3709   :  { %v4222_v53 = vpop.permute.xlu1 %4221 }
0x370a   :  { %v4224_v9 = vmul.f32 %v4222_v53, %v4219_v17 }
0x370c   :  { %v4225_v42 = vadd.f32 %v4224_v9, %v4218_v26 }
0x370d   :  { %v4384_v55 = vpop.permute.xlu1 %4383 }
0x370e   :  { %v8022_v18 = vclamps-f32 %v4225_v42, 5.0 }
0x3710   :  { %4637 = vst.msk [vmem:[#allocation20 + $0xc] sm:$0x3] %vm1019_vm8, %v8022_v18  ;;  %6175 = vmatmul.mubr.msk.f32.vlgmr.msra.gmra.mxu1 %vm391_vm5, %v8022_v18  ;;  %6182 = vmatmul.mubr.msk.f32.vlgmr.msra.gmra.mxu0 %vm391_vm5, %v8022_v18 }
0x3711   :  { %6185 = vmatpush3.msk.msra.mxu1 %vm764_vm9, %v7724_v62  ;;  %6194 = vmatprep.mubr.msk.f32.mxu1 %vm6750_vm0, %v6749_v0 }
0x3712   :  { %6186 = vmatprep.subr.mxu1 %v6749_v0  ;;  %6198 = vmatpush3.msra.mxu0 %v7734_v37 }
0x3713   :  { %6187 = vmatpush3.msra.mxu1 %v7740_v63  ;;  %6199 = vmatprep.subr.mxu0 %v6749_v0 }
0x3714   :  { %6188 = vmatprep.subr.mxu1 %v6749_v0  ;;  %6200 = vmatpush3.msra.mxu0 %v7748_v11 }
0x3715   :  { %6189 = vmatpush3.msra.mxu1 %v7754_v2  ;;  %6201 = vmatprep.subr.mxu0 %v6749_v0 }
0x3716   :  { %6190 = vmatprep.subr.mxu1 %v6749_v0  ;;  %6202 = vmatpush3.msra.mxu0 %v7762_v25 }
0x3717   :  { %6191 = vmatpush3.msra.mxu1 %v7768_v3  ;;  %6203 = vmatprep.subr.mxu0 %v6749_v0 }
0x3718   :  { %6192 = vmatprep.subr.mxu1 %v6749_v0  ;;  %6204 = vmatpush3.msra.mxu0 %v7776_v8 }
0x3719   :  { %6193 = vmatpush3.msra.mxu1 %v7782_v10  ;;  %6205 = vmatprep.mubr.msk.f32.mxu0 %vm6750_vm0, %v6749_v0 }
0x371a   :  { %6208 = vmatprep.subr.mxu0 %v6749_v0  ;;  %6219 = vmatprep.subr.mxu1 %v6749_v0 }
0x37d0   :  { %v4297_v20 = vpop.f32.mrf.mxu1  ;;  %v4367_v7 = vpop.f32.mrf.mxu0 }
0x37d1   :  { %v4298_v21 = vadd.f32 %v7792_v12, %v4297_v20  ;;  %v4368_v22 = vadd.f32 %v7798_v19, %v4367_v7  ;;  %v4647_v7 = vld [vmem:[#allocation5 + $0xe] sm:$0x3] }
0x37d2   :  { %v6176_v45 = vpop.f32.mrf.mxu1  ;;  %v6183_v23 = vpop.f32.mrf.mxu0 }
0x37d3   :  { %5443 = vst.msk [vmem:[%s8268_s22 + $0xc] sm:$0x3] %vm1021_vm10, %v4298_v21  ;;  %v4371_v47 = vmul.f32 0.5, %v4368_v22 }
0x37d5   :  { %v4372_v24 = vmul.f32 1.442695, %v4371_v47 }
0x37d7   :  { %6404 = vpow2.f32 %v4372_v24 }
0x37e4   :  { %v6405_v33 = vpop.eup %6404 }
0x37e5   :  { %5444 = vst.msk [vmem:[%s8269_s23 + $0xc] sm:$0x3] %vm1021_vm10, %v6405_v33  ;;  %v4376_v13 = vmul.f32 %v6405_v33, %v5436_v44 }
0x37e7   :  { %v4377_v35 = vadd.f32 %v4376_v13, %v4298_v21 }
0x37e9   :  { %v4382_v56 = vsel %vm747_vm11, %v4377_v35, %v4380_v36 }
0x37ea   :  { %v4386_v58 = vsel %vm752_vm12, %v4382_v56, %v4384_v55  ;;  %5445 = vst.msk [vmem:[%s8270_s24 + $0xc] sm:$0x3] %vm1024_vm13, %v4382_v56 }
0x37eb   :  { %6195 = vmatmul.mubr.msk.f32.vlgmr.msra.gmra.mxu1 %vm760_vm14, %v4386_v58 }
0x37ec   :  { %6220 = vmatpush3.msra.mxu1 %v7576_v41  ;;  %6229 = vmatprep.mubr.msk.f32.mxu1 %vm6750_vm0, %v6749_v0 }
0x37ed   :  { %6221 = vmatprep.subr.mxu1 %v6749_v0 }
0x37ee   :  { %6222 = vmatpush3.msra.mxu1 %v7585_v16 }
0x37ef   :  { %6223 = vmatprep.subr.mxu1 %v6749_v0 }
0x37f0   :  { %6224 = vmatpush3.msra.mxu1 %v7592_v43 }
0x37f1   :  { %6225 = vmatprep.subr.mxu1 %v6749_v0 }
0x37f2   :  { %6226 = vmatpush3.msra.mxu1 %v7599_v49 }
0x37f3   :  { %6227 = vmatprep.subr.mxu1 %v6749_v0 }
0x37f4   :  { %6228 = vmatpush3.msra.mxu1 %v7606_v50  ;;  %v8091_v50 = vld [vmem:[%s8264_s18 + $0x18] sm:$0xff] }
0x37f5   :  { %6239 = vmatprep.subr.mxu1 %v6749_v0 }
0x38ab   :  { %v4456_v41 = vpop.f32.mrf.mxu1 }
0x38ac   :  { %v4457_v28 = vadd.f32 %v7831_v57, %v4456_v41 }
0x38ad   :  { %v6196_v29 = vpop.f32.mrf.mxu1 }
0x38ae   :  { %v5439_v59 = vmul.f32 -1.442695, %v4457_v28 }
0x38b0   :  { %6406 = vpow2.f32 %v5439_v59 }
0x38bd   :  { %v6407_v16 = vpop.eup %6406 }
0x38be   :  { %v4463_v1 = vadd.f32 1.0, %v6407_v16 }
0x38c0   :  { %6408 = vrcp.f32 %v4463_v1 }
0x38cd   :  { %v6409_v43 = vpop.eup %6408 }
0x38ce   :  { %v4469_v14 = vmul.f32 %v6409_v43, %v4467_v61 }
0x38d0   :  { %4471 = vrot.lane.b32.xlu1 %v4469_v14, %s6755_s12 }
0x3942   :  { %v4472_v49 = vpop.permute.xlu1 %4471 }
0x3943   :  { %6206 = vmatmul.mubr.msk.f32.vlgmr.msra.gmra.mxu0 %vm309_vm3, %v4472_v49 }
0x3944   :  { %6209 = vmatpush3.msra.mxu0 %v8091_v50  ;;  %6216 = vmatprep.mubr.msk.f32.mxu0 %vm6750_vm0, %v6749_v0 }
0x3945   :  { %6210 = vmatprep.subr.mxu0 %v6749_v0 }
0x3946   :  { %6211 = vmatpush3.msra.mxu0 %v8100_v39 }
0x3947   :  { %6212 = vmatprep.subr.mxu0 %v6749_v0 }
0x3948   :  { %6213 = vmatpush3.msra.mxu0 %v7622_v32  ;;  %v4552_v32 = vsub.f32 1.0, %v6409_v43 }
0x3949   :  { %6214 = vmatprep.subr.mxu0 %v6749_v0 }
0x394a   :  { %6215 = vmatpush3.msra.mxu0 %v7629_v54  ;;  %v4551_v54 = vmul.f32 %v6409_v43, %v7979_v27 }
0x394b   :  { %6232 = vmatprep.subr.mxu0 %v6749_v0 }
0x3a03   :  { %v4541_v15 = vpop.f32.mrf.mxu0 }
0x3a04   :  { %v4542_v40 = vadd.f32 %v7846_v51, %v4541_v15 }
0x3a05   :  { %v6207_v52 = vpop.f32.mrf.mxu0 }
0x3a06   :  { %4546 = vrot.lane.b32.xlu0 %v4542_v40, %s6757_s30 }
0x3a78   :  { %v4547_v4 = vpop.permute.xlu0 %4546 }
0x3a79   :  { %v4549_v6 = vadd.f32 %v4547_v4, %v4457_v28 }
0x3a7b   :  { %6410 = vtanh.f32 %v4549_v6 }
0x3a88   :  { %v6411_v17 = vpop.eup %6410 }
0x3a89   :  { %4554 = vrot.lane.b32.xlu1 %v6411_v17, %s6757_s30 }
0x3a8d   :  { %4652 = vrot.lane.b32.xlu1 %v8022_v18, %s6752_s9 }
0x3afb   :  { %v4555_v53 = vpop.permute.xlu1 %4554 }
0x3afc   :  { %v4557_v26 = vmul.f32 %v4555_v53, %v4552_v32 }
0x3afe   :  { %v4558_v9 = vadd.f32 %v4557_v26, %v4551_v54 }
0x3aff   :  { %v4653_v21 = vpop.permute.xlu1 %4652 }
0x3b00   :  { %v8114_v42 = vclamps-f32 %v4558_v9, 5.0 }
0x3b02   :  { %4635 = vst.msk [vmem:[#allocation18 + $0xc] sm:$0x3] %vm300_vm4, %v8114_v42  ;;  %6217 = vmatmul.mubr.msk.f32.vlgmr.msra.gmra.mxu0 %vm309_vm3, %v8114_v42 }
0x3b03   :  { %6233 = vmatpush3.msra.mxu0 %v7645_v48  ;;  %6236 = vmatprep.mubr.msk.f32.mxu0 %vm6750_vm0, %v6749_v0 }
0x3b04   :  { %6234 = vmatprep.subr.mxu0 %v6749_v0 }
0x3b05   :  { %6235 = vmatpush3.msra.mxu0 %v7651_v5 }
0x3b06   :  { %6246 = vmatprep.subr.mxu0 %v6749_v0 }
0x3bc2   :  { %v4630_v27 = vpop.f32.mrf.mxu0 }
0x3bc3   :  { %4645 = vst.msk [vmem:[#allocation21 + $0xc] sm:$0x3] %vm1026_vm15, %v4630_v27  ;;  %4649 = vrot.lane.b32.xlu0 %v4630_v27, %s6751_s8 }
0x3bc4   :  { %v6218_v20 = vpop.f32.mrf.mxu0 }
0x3bc7   :  { %4736 = vrot.lane.b32.xlu0 %v8022_v18, %s6751_s8 }
0x3c35   :  { %v4650_v48 = vpop.permute.xlu0 %4649 }
0x3c36   :  { %v4655_v22 = vsel %vm391_vm5, %v4647_v7, %v4650_v48 }
0x3c37   :  { %v4656_v45 = vsel %vm393_vm6, %v4655_v22, %v4653_v21 }
0x3c38   :  { %6230 = vmatmul.mubr.msk.f32.vlgmr.msra.gmra.mxu1 %vm401_vm7, %v4656_v45 }
0x3c39   :  { %6240 = vmatpush3.msra.mxu1 %v7665_v34  ;;  %6243 = vmatprep.mubr.msk.f32.mxu1 %vm6750_vm0, %v6749_v0  ;;  %v4737_v34 = vpop.permute.xlu0 %4736 }
0x3c3a   :  { %6241 = vmatprep.subr.mxu1 %v6749_v0 }
0x3c3b   :  { %6242 = vmatpush3.msra.mxu1 %v7674_v46 }
0x3c3c   :  { %6253 = vmatprep.subr.mxu1 %v6749_v0 }
0x3cf8   :  { %v4726_v5 = vpop.f32.mrf.mxu1 }
0x3cf9   :  { %v4727_v23 = vadd.f32 %v7678_v38, %v4726_v5 }
0x3cfa   :  { %v6231_v47 = vpop.f32.mrf.mxu1 }
0x3cfb   :  { %v5447_v24 = vmul.f32 -1.442695, %v4727_v23 }
0x3cfd   :  { %6412 = vpow2.f32 %v5447_v24 }
0x3d0a   :  { %v6413_v44 = vpop.eup %6412 }
0x3d0b   :  { %v4733_v33 = vadd.f32 1.0, %v6413_v44 }
0x3d0d   :  { %6414 = vrcp.f32 %v4733_v33 }
0x3d1a   :  { %v6415_v13 = vpop.eup %6414 }
0x3d1b   :  { %v4739_v35 = vmul.f32 %v6415_v13, %v4737_v34 }
0x3d1d   :  { %4741 = vrot.lane.b32.xlu1 %v4739_v35, %s6753_s7 }
0x3d8f   :  { %v4742_v36 = vpop.permute.xlu1 %4741 }
0x3d90   :  { %6237 = vmatmul.mubr.msk.f32.vlgmr.msra.gmra.mxu0 %vm391_vm5, %v4742_v36 }
0x3d91   :  { %6247 = vmatpush3.msra.mxu0 %v7686_v30  ;;  %6250 = vmatprep.mubr.msk.f32.mxu0 %vm6750_vm0, %v6749_v0 }
0x3d92   :  { %6248 = vmatprep.subr.mxu0 %v6749_v0 }
0x3d93   :  { %6249 = vmatpush3.msra.mxu0 %v7695_v31  ;;  %v4822_v31 = vsub.f32 1.0, %v6415_v13 }
0x3d94   :  { %6266 = vmatprep.subr.mxu0 %v6749_v0 }
0x3e50   :  { %v4811_v46 = vpop.f32.mrf.mxu0 }
0x3e51   :  { %v4812_v38 = vadd.f32 %v7702_v60, %v4811_v46  ;;  %v4821_v60 = vmul.f32 %v6415_v13, %v8022_v18 }
0x3e52   :  { %v6238_v55 = vpop.f32.mrf.mxu0 }
0x3e53   :  { %4816 = vrot.lane.b32.xlu0 %v4812_v38, %s8296_s5 }
0x3e57   :  { %4982 = vrot.lane.b32.xlu0 %v4647_v7, %s6754_s11 }
0x3e5b   :  { %5069 = vrot.lane.b32.xlu0 %v8114_v42, %s8296_s5 }
0x3ec5   :  { %v4817_v30 = vpop.permute.xlu0 %4816 }
0x3ec6   :  { %v4819_v56 = vadd.f32 %v4817_v30, %v4727_v23 }
0x3ec8   :  { %6416 = vtanh.f32 %v4819_v56 }
0x3ec9   :  { %v4983_v16 = vpop.permute.xlu0 %4982 }
0x3ecd   :  { %v5070_v17 = vpop.permute.xlu0 %5069 }
0x3ed5   :  { %v6417_v58 = vpop.eup %6416 }
0x3ed6   :  { %4824 = vrot.lane.b32.xlu1 %v6417_v58, %s6755_s12 }
0x3eda   :  { %4986 = vrot.lane.b32.xlu1 %v8114_v42, %s6756_s28 }
0x3f48   :  { %v4825_v41 = vpop.permute.xlu1 %4824 }
0x3f49   :  { %v4827_v28 = vmul.f32 %v4825_v41, %v4822_v31 }
0x3f4b   :  { %v4828_v29 = vadd.f32 %v4827_v28, %v4821_v60 }
0x3f4c   :  { %v4987_v1 = vpop.permute.xlu1 %4986 }
0x3f4d   :  { %v5449_v59 = vclamps-f32 %v4828_v29, 5.0 }
0x3f4f   :  { %5240 = vst.msk [vmem:[#allocation20 + $0xe] sm:$0x3] %vm1019_vm8, %v5449_v59  ;;  %6244 = vmatmul.mubr.msk.f32.vlgmr.msra.gmra.mxu1 %vm391_vm5, %v5449_v59  ;;  %6251 = vmatmul.mubr.msk.f32.vlgmr.msra.gmra.mxu0 %vm391_vm5, %v5449_v59 }
0x3f50   :  { %6254 = vmatpush3.msk.msra.mxu1 %vm764_vm9, %v7724_v62  ;;  %6263 = vmatprep.mubr.msk.f32.mxu1 %vm6750_vm0, %v6749_v0 }
0x3f51   :  { %6255 = vmatprep.subr.mxu1 %v6749_v0  ;;  %6267 = vmatpush3.msra.mxu0 %v7734_v37 }
0x3f52   :  { %6256 = vmatpush3.msra.mxu1 %v7740_v63  ;;  %6268 = vmatprep.subr.mxu0 %v6749_v0 }
0x3f53   :  { %6257 = vmatprep.subr.mxu1 %v6749_v0  ;;  %6269 = vmatpush3.msra.mxu0 %v7748_v11 }
0x3f54   :  { %6258 = vmatpush3.msra.mxu1 %v7754_v2  ;;  %6270 = vmatprep.subr.mxu0 %v6749_v0 }
0x3f55   :  { %6259 = vmatprep.subr.mxu1 %v6749_v0  ;;  %6271 = vmatpush3.msra.mxu0 %v7762_v25 }
0x3f56   :  { %6260 = vmatpush3.msra.mxu1 %v7768_v3  ;;  %6272 = vmatprep.subr.mxu0 %v6749_v0 }
0x3f57   :  { %6261 = vmatprep.subr.mxu1 %v6749_v0  ;;  %6273 = vmatpush3.msra.mxu0 %v7776_v8 }
0x3f58   :  { %6262 = vmatpush3.msra.mxu1 %v7782_v10  ;;  %6274 = vmatprep.mubr.msk.f32.mxu0 %vm6750_vm0, %v6749_v0  ;;  %v5452_v10 = vld [vmem:[%s8298_s6 + $0xe] sm:$0x3] }
0x3f59   :  { %6277 = vmatprep.subr.mxu0 %v6749_v0 }
0x400f   :  { %v4900_v62 = vpop.f32.mrf.mxu1  ;;  %v4970_v37 = vpop.f32.mrf.mxu0 }
0x4010   :  { %v4901_v63 = vadd.f32 %v7792_v12, %v4900_v62  ;;  %v4971_v11 = vadd.f32 %v7798_v19, %v4970_v37 }
0x4011   :  { %v6245_v2 = vpop.f32.mrf.mxu1  ;;  %v6252_v25 = vpop.f32.mrf.mxu0 }
0x4012   :  { %5459 = vst.msk [vmem:[%s8268_s22 + $0xe] sm:$0x3] %vm1021_vm10, %v4901_v63  ;;  %v4974_v3 = vmul.f32 0.5, %v4971_v11 }
0x4014   :  { %v4975_v8 = vmul.f32 1.442695, %v4974_v3 }
0x4016   :  { %6418 = vpow2.f32 %v4975_v8 }
0x4023   :  { %v6419_v18 = vpop.eup %6418 }
0x4024   :  { %5460 = vst.msk [vmem:[%s8269_s23 + $0xe] sm:$0x3] %vm1021_vm10, %v6419_v18  ;;  %v4979_v12 = vmul.f32 %v6419_v18, %v5452_v10 }
0x4026   :  { %v4980_v19 = vadd.f32 %v4979_v12, %v4901_v63 }
0x4028   :  { %v4985_v43 = vsel %vm747_vm11, %v4980_v19, %v4983_v16 }
0x4029   :  { %v4989_v61 = vsel %vm752_vm12, %v4985_v43, %v4987_v1  ;;  %5461 = vst.msk [vmem:[%s8270_s24 + $0xe] sm:$0x3] %vm1024_vm13, %v4985_v43 }
0x402a   :  { %6264 = vmatmul.mubr.msk.f32.vlgmr.msra.gmra.mxu1 %vm760_vm14, %v4989_v61 }
0x40ea   :  { %v5059_v14 = vpop.f32.mrf.mxu1 }
0x40eb   :  { %v5060_v49 = vadd.f32 %v7831_v57, %v5059_v14  ;;  %v6458_v57 = vld [vmem:[%s8264_s18 + $0x8] sm:$0xff] }
0x40ec   :  { %v6265_v15 = vpop.f32.mrf.mxu1 }
0x40ed   :  { %v5455_v40 = vmul.f32 -1.442695, %v5060_v49 }
0x40ef   :  { %6420 = vpow2.f32 %v5455_v40 }
0x40fc   :  { %v6421_v52 = vpop.eup %6420 }
0x40fd   :  { %v5066_v4 = vadd.f32 1.0, %v6421_v52 }
0x40ff   :  { %6422 = vrcp.f32 %v5066_v4 }
0x410c   :  { %v6423_v6 = vpop.eup %6422 }
0x410d   :  { %v5072_v32 = vmul.f32 %v6423_v6, %v5070_v17  ;;  %v5155_v7 = vsub.f32 1.0, %v6423_v6 }
0x410f   :  { %5074 = vrot.lane.b32.xlu1 %v5072_v32, %s6755_s12 }
0x4181   :  { %v5075_v53 = vpop.permute.xlu1 %5074 }
0x4182   :  { %6275 = vmatmul.mubr.msk.f32.vlgmr.msra.gmra.mxu0 %vm309_vm3, %v5075_v53 }
0x4183   :  { %6278 = vmatpush3.msra.mxu0 %v8091_v50  ;;  %6285 = vmatprep.mubr.msk.f32.mxu0 %vm6750_vm0, %v6749_v0  ;;  %v6459_v50 = vld [vmem:[%s8264_s18] sm:$0xff]  ;;  %s6758_s18 = smov [#allocation18]  }
0x4184   :  { %6279 = vmatprep.subr.mxu0 %v6749_v0  ;;  %s5264_s15 = sshll.u32 %s6758_s18, 4  ;;  %s5265_s15 = int_to_ptr.vmem [resolvable:$true] %s5264_s15 }
0x4185   :  { %6280 = vmatpush3.msra.mxu0 %v8100_v39  ;;  %s6640_s10 = scalar_lea.vmem %s5265_s15, 256  ;;  %p6645_p4 = scmp.lt.s32.totalorder %s5265_s15, %s5265_s15 }
0x4186   :  { %6281 = vmatprep.subr.mxu0 %v6749_v0  ;;  %p6641_p3 = scmp.ne.s32.totalorder %s5265_s15, %s6640_s10  ;;  %p6646_p5 = scmp.lt.s32.totalorder %s6640_s10, %s6640_s10 }
0x4187   :  { %6282 = vmatpush3.msra.mxu0 %v6458_v57 }
0x4188   :  { %6283 = vmatprep.subr.mxu0 %v6749_v0  ;;  %v5154_v0 = vmul.f32 %v6423_v6, %v8114_v42  ;;  %p6647_p6 = por %p6646_p5, %p6645_p4 }
0x4189   :  { %6284 = vmatpush3.msra.mxu0 %v6459_v50 }
0x418a   :  { %p6648_p7 = pnand %p6647_p6, %p6641_p3 }
0x4242   :  { %v5144_v54 = vpop.f32.mrf.mxu0 }
0x4243   :  { %v5145_v26 = vadd.f32 %v7846_v51, %v5144_v54 }
0x4244   :  { %v6276_v9 = vpop.f32.mrf.mxu0 }
0x4245   :  { %5149 = vrot.lane.b32.xlu0 %v5145_v26, %s6757_s30 }
0x42b7   :  { %v5150_v39 = vpop.permute.xlu0 %5149 }
0x42b8   :  { %v5152_v27 = vadd.f32 %v5150_v39, %v5060_v49 }
0x42ba   :  { %6424 = vtanh.f32 %v5152_v27 }
0x42c7   :  { %v6425_v20 = vpop.eup %6424 }
0x42c8   :  { %5157 = vrot.lane.b32.xlu1 %v6425_v20, %s6757_s30 }
0x433a   :  { %v5158_v48 = vpop.permute.xlu1 %5157 }
0x433b   :  { %v5160_v21 = vmul.f32 %v5158_v48, %v5155_v7 }
0x433d   :  { %v5161_v22 = vadd.f32 %v5160_v21, %v5154_v0 }
0x433f   :  { %v5457_v45 = vclamps-f32 %v5161_v22, 5.0 }
0x4341   :  { %5238 = vst.msk [vmem:[#allocation18 + $0xe] sm:$0x3] %vm300_vm4, %v5457_v45  ;;  %6286 = vmatmul.mubr.msk.f32.vlgmr.msra.gmra.mxu0 %vm309_vm3, %v5457_v45 }
0x4342   :  { %6651 = shalt.err (!%p6648_p7)
}
0x4343   :  { %s8300_s30 = smov 2   ;;  %s6660_s0 = scalar_lea.vmem %s5256_s17, 32 }
0x4344   :  { %5270 = dma.vmem_to_hbm [thread:$0]  %s5265_s15, 256, %s8266_s20, [#allocation19], %s8296_s5, %s8296_s5, %s8300_s30  }
0x4345   :  { %p6661_p8 = scmp.ne.s32.totalorder %s5256_s17, %s6660_s0  ;;  %p6665_p9 = scmp.lt.s32.totalorder %s5256_s17, %s5256_s17 }
0x4346   :  { %p6666_p10 = scmp.lt.s32.totalorder %s6660_s0, %s6660_s0 }
0x4348   :  { %p6667_p11 = por %p6666_p10, %p6665_p9 }
0x434a   :  { %p6668_p12 = pnand %p6667_p11, %p6661_p8 }
0x434c   :  { %6671 = shalt.err (!%p6668_p12)
}
0x434d   :  { %5258 = dma.vmem_to_hbm [thread:$0]  %s5256_s17, 32, %s8265_s19, [#allocation4]  }
0x434e   :  { %s6760_s1 = smov [#allocation20]  }
0x434f   :  { %s5276_s26 = sshll.u32 %s6760_s1, 4  ;;  %s5277_s26 = int_to_ptr.vmem [resolvable:$true] %s5276_s26 }
0x4350   :  { %s6680_s3 = scalar_lea.vmem %s5277_s26, 256  ;;  %p6685_p0 = scmp.lt.s32.totalorder %s5277_s26, %s5277_s26 }
0x4351   :  { %p6681_p13 = scmp.ne.s32.totalorder %s5277_s26, %s6680_s3  ;;  %p6686_p1 = scmp.lt.s32.totalorder %s6680_s3, %s6680_s3 }
0x4353   :  { %p6687_p2 = por %p6686_p1, %p6685_p0 }
0x4355   :  { %p6688_p3 = pnand %p6687_p2, %p6681_p13 }
0x4357   :  { %6691 = shalt.err (!%p6688_p3)
}
0x4358   :  { %5282 = dma.vmem_to_hbm [thread:$0]  %s5277_s26, 256, %s8267_s21, [#allocation19], %s8296_s5, %s8296_s5, %s8300_s30  }
0x4359   :  { %s6761_s9 = smov [#allocation21]  }
0x435a   :  { %s5294_s7 = sshll.u32 %s6761_s9, 4  ;;  %s5295_s7 = int_to_ptr.vmem [resolvable:$true] %s5294_s7 }
0x435b   :  { %s6700_s19 = scalar_lea.vmem %s5295_s7, 256  ;;  %p6705_p5 = scmp.lt.s32.totalorder %s5295_s7, %s5295_s7 }
0x435c   :  { %p6701_p4 = scmp.ne.s32.totalorder %s5295_s7, %s6700_s19  ;;  %p6706_p6 = scmp.lt.s32.totalorder %s6700_s19, %s6700_s19 }
0x435e   :  { %p6707_p7 = por %p6706_p6, %p6705_p5 }
0x4360   :  { %p6708_p8 = pnand %p6707_p7, %p6701_p4 }
0x4401   :  { %v5233_v51 = vpop.f32.mrf.mxu0 }
0x4402   :  { %5248 = vst.msk [vmem:[#allocation21 + $0xe] sm:$0x3] %vm1026_vm15, %v5233_v51 }
0x4403   :  { %v6287_v42 = vpop.f32.mrf.mxu0 }
0x4404   :  { %6711 = shalt.err (!%p6708_p8)
}
0x4405   :  { %5300 = dma.vmem_to_hbm [thread:$0]  %s5295_s7, 256, %s8271_s25, [#allocation22], %s8296_s5, %s8296_s5, %s8300_s30  }
0x4406   :  { %6730 = dma.done.wait [#allocation4], 32  }
0x4407   :  { %6731 = vsyncadd [#allocation4], 4294967264 }
0x4408   :  { %6732 = dma.done.wait [#allocation19], 512  }
0x4409   :  { %6733 = vsyncadd [#allocation19], 4294966784 }
0x440a   :  { %6734 = dma.done.wait [#allocation22], 256  }
0x440b   :  { %6735 = vsyncadd [#allocation22], 4294967040 }
0x440c   :  { %5319 = vsyncpa [#allocation3], 1 }
0x440d   :  { %5320 = vsyncpa [#allocation6], 1 }
0x440e   :  { %5321 = vsyncpa [#allocation9], 1 }
0x440f   :  { %5322 = vsyncpa [#allocation12], 1 }
0x4410   :  { %5323 = vsyncpa [#allocation15], 1 }
0x4411   :  { %5324 = vsyncpa [#allocation4], 1 }
0x4412   :  { %5325 = vsyncpa [#allocation19], 1 }
0x4413   :  { %5326 = vsyncpa [#allocation22], 1 }

</bundles_post_ra>
